<compile_context>
chip_gen: v6e
topology: v6e:2x2x1
jax: 0.10.0
libtpu: 0.0.40
codegen_flags: <defaults>
</compile_context>

<pallas_src>
import functools
import math

import jax
import jax.numpy as jnp
from jax.experimental import pallas as pl
from jax.experimental.pallas import tpu as pltpu


# ----------------------------------------------------------------------------
# Fused transformer-encoder Pallas kernel (one grid step == one encoder)
# ----------------------------------------------------------------------------
def _fused_encoder_kernel(x_emb_ref, mask_ref, pos_ref,
                          wqkv_ref, bqkv_ref, wo_ref, bo_ref,
                          ln1g_ref, ln1b_ref, w1_ref, b1_ref,
                          w2_ref, b2_ref, ln2g_ref, ln2b_ref,
                          out_ref, *, n_layers, n_heads, d_real, dh_pad,
                          emb_scale, eps):
    """Whole encoder forward for one encoder's (small) token batch.

    x_emb_ref : [1, R, S, Dp]  gathered (unscaled) embeddings, feature-padded
    mask_ref  : [1, R, S]      1.0 for real tokens, 0.0 for padding
    pos_ref   : [1, S, Dp]     positional embeddings (feature-padded)
    weights   : stacked over (encoder, layer); heads padded to 128 lanes each
    out_ref   : [1, R, Dp]     masked-mean sentence embeddings
    """
    _, r, s, dp = x_emb_ref.shape
    m = r * s
    dh_r = d_real // n_heads                 # real per-head dim (for the scale)
    scale = 1.0 / math.sqrt(dh_r)

    mask = mask_ref[0]                                      # [R, S]
    mask3 = mask[:, :, None]                                # [R, S, 1]
    key_bias = ((mask - 1.0) * 1e30)[:, None, :]            # [R, 1, S] (0 / -1e30)

    # Feature mask so LayerNorm statistics only see the real d_real dims.
    fmask = (jax.lax.broadcasted_iota(jnp.int32, (1, dp), 1) < d_real
             ).astype(jnp.float32)                          # [1, Dp]

    # embeddings_scale + positional + padding mask (f32)
    x = (x_emb_ref[0] * emb_scale + pos_ref[0][None, :, :]) * mask3   # [R,S,Dp]

    def layer_norm(y2, g, bta):
        # y2: [M, Dp]; padded lanes of y2 are zero by construction.
        mu = jnp.sum(y2 * fmask, axis=-1, keepdims=True) * (1.0 / d_real)
        diff = (y2 - mu) * fmask
        var = jnp.sum(diff * diff, axis=-1, keepdims=True) * (1.0 / d_real)
        # gamma/beta are zero on padded lanes -> padded lanes stay exactly 0.
        return diff * jax.lax.rsqrt(var + eps) * g + bta

    # TODO(synk): lax.fori_loop / layer-streaming grid axis once n_layers grows.
    for li in range(n_layers):                              # static unrolled (L=2)
        x2 = x.reshape(m, dp)

        # ---- fused QKV projection: [M, Dp](bf16) @ [Dp, 3*H*128](bf16) -----
        qkv = jnp.dot(x2.astype(jnp.bfloat16), wqkv_ref[0, li],
                      preferred_element_type=jnp.float32) + bqkv_ref[0, li]
        qkv_b = qkv.astype(jnp.bfloat16)

        # ---- multi-head self-attention: lane-dense 128-wide head slots -----
        heads = []
        for h in range(n_heads):                            # static, tiny
            qo = h * dh_pad
            ko = (n_heads + h) * dh_pad
            vo = (2 * n_heads + h) * dh_pad
            q = qkv_b[:, qo:qo + dh_pad].reshape(r, s, dh_pad)
            k = qkv_b[:, ko:ko + dh_pad].reshape(r, s, dh_pad)
            v = qkv_b[:, vo:vo + dh_pad].reshape(r, s, dh_pad)

            # contraction on the last axis of both operands -> no explicit .T
            sc = jnp.einsum("bqd,bkd->bqk", q, k,
                            preferred_element_type=jnp.float32) * scale + key_bias
            sc = sc - jnp.max(sc, axis=-1, keepdims=True)   # f32 softmax path
            p = jnp.exp(sc)
            p = p * pl.reciprocal(jnp.sum(p, axis=-1, keepdims=True), approx=True)
            o = jnp.einsum("bqk,bkd->bqd", p.astype(jnp.bfloat16), v,
                           preferred_element_type=jnp.float32)   # [R, S, 128]
            heads.append(o.reshape(m, dh_pad))

        # ONE full-width output projection: [M, H*128] @ [H*128, Dp]
        o_all = jnp.concatenate(heads, axis=-1).astype(jnp.bfloat16)
        attn2 = jnp.dot(o_all, wo_ref[0, li],
                        preferred_element_type=jnp.float32) + bo_ref[0, li]

        # ---- residual + LayerNorm + padding mask (post-LN variant) ---------
        y2 = layer_norm(x2 + attn2, ln1g_ref[0, li], ln1b_ref[0, li])
        y2 = (y2.reshape(r, s, dp) * mask3).reshape(m, dp)

        # ---- position-wise FFN ----------------------------------------------
        h1 = jnp.maximum(
            jnp.dot(y2.astype(jnp.bfloat16), w1_ref[0, li],
                    preferred_element_type=jnp.float32) + b1_ref[0, li], 0.0)
        h2 = jnp.dot(h1.astype(jnp.bfloat16), w2_ref[0, li],
                     preferred_element_type=jnp.float32) + b2_ref[0, li]
        y2 = layer_norm(y2 + h2, ln2g_ref[0, li], ln2b_ref[0, li])
        x = y2.reshape(r, s, dp) * mask3

    # ---- masked mean over the sequence (reduction_type='mean') --------------
    denom = jnp.maximum(jnp.sum(mask, axis=1, keepdims=True), 1.0)   # [R, 1]
    out_ref[0] = (jnp.sum(x * mask3, axis=1) / denom).astype(out_ref.dtype)


def _enc_block(shape):
    """BlockSpec: full slab for one encoder (leading grid axis selects it)."""
    nd = len(shape)
    blk = (1,) + tuple(shape[1:])
    return pl.BlockSpec(blk, lambda e, _n=nd: (e,) + (0,) * (_n - 1))


def encode_multi(stacked, tokens_list):
    """Encode several token batches, one per encoder in `stacked`, in ONE
    pallas_call with a 'which encoder' parallel grid axis.

    tokens_list[i] : [R_i, S_i] int tokens for encoder i.
    Returns a list of [R_i, D] f32 sentence embeddings (real, unpadded dim).
    """
    n_enc = stacked["n_enc"]
    assert len(tokens_list) == n_enc
    d, d_pad = stacked["d"], stacked["d_pad"]
    pad_idx = stacked["pad_idx"]

    rows = [t.shape[0] for t in tokens_list]
    seqs = [t.shape[1] for t in tokens_list]
    r_max, s_max = max(rows), max(seqs)

    toks = jnp.stack([
        jnp.pad(t.astype(jnp.int32),
                ((0, r_max - t.shape[0]), (0, s_max - t.shape[1])),
                constant_values=pad_idx)
        for t in tokens_list], axis=0)                               # [E, R, S]
    mask = (toks != pad_idx).astype(jnp.float32)                     # [E, R, S]
    # TODO(synk): at real sizes move this gather in-kernel (scalar-prefetched
    # token ids + VMEM embedding table) to avoid the [E,R,S,Dp] HBM round trip.
    embs = jnp.stack([jnp.take(stacked["embs"][e], toks[e], axis=0)
                      for e in range(n_enc)], axis=0)                # [E,R,S,Dp]
    pos = stacked["pos"][:, :s_max, :]                               # [E, S, Dp]

    kernel = functools.partial(
        _fused_encoder_kernel,
        n_layers=stacked["n_layers"], n_heads=stacked["n_heads"],
        d_real=d, dh_pad=stacked["dh_pad"],
        emb_scale=math.sqrt(d), eps=1e-5)

    args = (embs, mask, pos,
            stacked["wqkv"], stacked["bqkv"], stacked["wo"], stacked["bo"],
            stacked["ln1_g"], stacked["ln1_b"],
            stacked["w1"], stacked["b1"], stacked["w2"], stacked["b2"],
            stacked["ln2_g"], stacked["ln2_b"])

    out = pl.pallas_call(
        kernel,
        out_shape=jax.ShapeDtypeStruct((n_enc, r_max, d_pad), jnp.float32),
        grid=(n_enc,),
        in_specs=[_enc_block(a.shape) for a in args],
        out_specs=_enc_block((n_enc, r_max, d_pad)),
        compiler_params=pltpu.CompilerParams(
            dimension_semantics=("parallel",),          # x/y encoders -> 2 TCs on v7x
            vmem_limit_bytes=48 * 1024 * 1024),
    )(*args)
    return [out[e, :rows[e], :d] for e in range(n_enc)]


# ----------------------------------------------------------------------------
# Parameter init (deterministic, synthetic — no checkpoint loading)
# ----------------------------------------------------------------------------
def _round_up(x, m):
    return ((x + m - 1) // m) * m


def _dense(key, fan_in, fan_out):
    return jax.random.normal(key, (fan_in, fan_out), jnp.float32) * (fan_in ** -0.5)


def _pad_matrix(w, rows, cols):
    out = jnp.zeros((rows, cols), jnp.float32)
    return out.at[: w.shape[0], : w.shape[1]].set(w)


def _pad_head_cols(w, d, n_heads, d_pad, dh_pad):
    """Pad a [d,d] Q/K/V weight so real head h lands in padded 128-lane slot h."""
    dh_r = d // n_heads
    out = jnp.zeros((d_pad, n_heads * dh_pad), jnp.float32)
    for h in range(n_heads):
        out = out.at[:d, h * dh_pad: h * dh_pad + dh_r].set(
            w[:, h * dh_r:(h + 1) * dh_r])
    return out


def _pad_head_rows(w, d, n_heads, d_pad, dh_pad):
    """Pad the [d,d] output projection so real head h's rows move with it."""
    dh_r = d // n_heads
    out = jnp.zeros((n_heads * dh_pad, d_pad), jnp.float32)
    for h in range(n_heads):
        out = out.at[h * dh_pad: h * dh_pad + dh_r, :d].set(
            w[h * dh_r:(h + 1) * dh_r, :])
    return out


def init_embeddings(key, vocab, d, pad_idx, d_pad):
    emb = jax.random.normal(key, (vocab, d), jnp.float32) * (d ** -0.5)
    emb = emb.at[pad_idx].set(0.0)          # padding_idx row zero (nn.Embedding)
    return _pad_matrix(emb, vocab, d_pad)


def init_encoder_params(key, emb_padded, d, ffn, n_layers, n_heads,
                        max_len, pad_idx, d_pad, ffn_pad, dh_pad):
    keys = jax.random.split(key, 1 + n_layers)
    pos = jax.random.normal(keys[0], (max_len, d), jnp.float32) * 0.02
    pos = _pad_matrix(pos, max_len, d_pad)

    wqkv, bqkv, wo, bo = [], [], [], []
    ln1_g, ln1_b, ln2_g, ln2_b = [], [], [], []
    w1, b1, w2, b2 = [], [], [], []
    for li in range(n_layers):
        lk = jax.random.split(keys[1 + li], 6)
        wq = _pad_head_cols(_dense(lk[0], d, d), d, n_heads, d_pad, dh_pad)
        wk = _pad_head_cols(_dense(lk[1], d, d), d, n_heads, d_pad, dh_pad)
        wv = _pad_head_cols(_dense(lk[2], d, d), d, n_heads, d_pad, dh_pad)
        # bf16 MXU operands (f32 accumulation in-kernel); padded zeros stay 0.
        wqkv.append(jnp.concatenate([wq, wk, wv], axis=1).astype(jnp.bfloat16))
        bqkv.append(jnp.zeros((1, 3 * n_heads * dh_pad), jnp.float32))
        wo.append(_pad_head_rows(_dense(lk[3], d, d), d, n_heads, d_pad, dh_pad
                                 ).astype(jnp.bfloat16))
        bo.append(jnp.zeros((1, d_pad), jnp.float32))
        ln1_g.append(jnp.zeros((1, d_pad), jnp.float32).at[0, :d].set(1.0))
        ln1_b.append(jnp.zeros((1, d_pad), jnp.float32))
        w1.append(_pad_matrix(_dense(lk[4], d, ffn), d_pad, ffn_pad
                              ).astype(jnp.bfloat16))
        b1.append(jnp.zeros((1, ffn_pad), jnp.float32))
        w2.append(_pad_matrix(_dense(lk[5], ffn, d), ffn_pad, d_pad
                              ).astype(jnp.bfloat16))
        b2.append(jnp.zeros((1, d_pad), jnp.float32))
        ln2_g.append(jnp.zeros((1, d_pad), jnp.float32).at[0, :d].set(1.0))
        ln2_b.append(jnp.zeros((1, d_pad), jnp.float32))

    stack = lambda xs: jnp.stack(xs, axis=0)
    return dict(
        emb=emb_padded, pos=pos,
        wqkv=stack(wqkv), bqkv=stack(bqkv), wo=stack(wo), bo=stack(bo),
        ln1_g=stack(ln1_g), ln1_b=stack(ln1_b),
        w1=stack(w1), b1=stack(b1), w2=stack(w2), b2=stack(b2),
        ln2_g=stack(ln2_g), ln2_b=stack(ln2_b),
        d=d, d_pad=d_pad, dh_pad=dh_pad, n_layers=n_layers, n_heads=n_heads,
        pad_idx=pad_idx,
    )


def stack_encoders(encs):
    """Stack N encoders' weights on a new leading axis (the grid axis)."""
    keys = ["pos", "wqkv", "bqkv", "wo", "bo", "ln1_g", "ln1_b",
            "w1", "b1", "w2", "b2", "ln2_g", "ln2_b"]
    stacked = {k: jnp.stack([e[k] for e in encs], axis=0) for k in keys}
    stacked["embs"] = [e["emb"] for e in encs]
    for k in ("d", "d_pad", "dh_pad", "n_layers", "n_heads", "pad_idx"):
        stacked[k] = encs[0][k]
    stacked["n_enc"] = len(encs)
    return stacked


# ----------------------------------------------------------------------------
# SelfFeedingModel (functional) — dialog / feedback / satisfaction heads
# ----------------------------------------------------------------------------
class SelfFeedingModelPallas:
    def __init__(self, key, vocab=32, dim=32, ffn=64, n_layers=2, n_heads=2,
                 max_len=64, pad_idx=0, normalize_sent_emb=False):
        d_pad = max(128, _round_up(dim, 128))
        ffn_pad = max(128, _round_up(ffn, 128))
        dh_pad = 128                         # each head gets a full 128-lane slot
        k_emb, k_xenc, k_yenc, k_semb, k_senc, k_head = jax.random.split(key, 6)

        # dialog: x/y encoders share embeddings, have separate weights
        dia_emb = init_embeddings(k_emb, vocab, dim, pad_idx, d_pad)
        self.x_dia = init_encoder_params(k_xenc, dia_emb, dim, ffn, n_layers,
                                         n_heads, max_len, pad_idx, d_pad,
                                         ffn_pad, dh_pad)
        self.y_dia = init_encoder_params(k_yenc, dia_emb, dim, ffn, n_layers,
                                         n_heads, max_len, pad_idx, d_pad,
                                         ffn_pad, dh_pad)
        # satisfaction: own embeddings + encoder (share_sat_* defaults False)
        sat_emb = init_embeddings(k_semb, vocab, dim, pad_idx, d_pad)
        self.sat = init_encoder_params(k_senc, sat_emb, dim, ffn, n_layers,
                                       n_heads, max_len, pad_idx, d_pad,
                                       ffn_pad, dh_pad)

        # Precomputed weight stacks for the fused "which encoder" grid axis.
        self.dia_xy_stack = stack_encoders([self.x_dia, self.y_dia])
        self.dia_x_stack = stack_encoders([self.x_dia])
        self.dia_y_stack = stack_encoders([self.y_dia])
        # feedback shares the dialog encoders (share_fee_* defaults True)
        self.fee_xy_stack = self.dia_xy_stack
        self.sat_stack = stack_encoders([self.sat])

        # sat head: sat_head_layers=1 -> single Linear(dim, 1)
        self.sat_w = _dense(k_head, dim, 1)
        self.sat_b = jnp.zeros((1,), jnp.float32)
        self.normalize_sent_emb = normalize_sent_emb

    # --- dialog ---------------------------------------------------------
    def score_dialog(self, x_vecs, y_vecs):
        if jnp.issubdtype(y_vecs.dtype, jnp.floating):
            (x_enc,) = encode_multi(self.dia_x_stack, [x_vecs])
            y_enc = y_vecs                     # precomputed candidate encodings
        elif y_vecs.ndim == 2:
            x_enc, y_enc = encode_multi(self.dia_xy_stack, [x_vecs, y_vecs])
        elif y_vecs.ndim == 3:
            b, n, s = y_vecs.shape
            x_enc, y_enc = encode_multi(self.dia_xy_stack,
                                        [x_vecs, y_vecs.reshape(b * n, s)])
            y_enc = y_enc.reshape(b, n, -1)
        else:
            raise ValueError("bad y_vecs rank")
        return self.score_similarity(x_enc, y_enc)

    def encode_dia_y(self, y_vecs):
        if y_vecs.ndim == 2:
            (enc,) = encode_multi(self.dia_y_stack, [y_vecs])
            return enc
        elif y_vecs.ndim == 3:
            b, n, s = y_vecs.shape
            (enc,) = encode_multi(self.dia_y_stack, [y_vecs.reshape(b * n, s)])
            return enc.reshape(b, n, -1)
        raise ValueError("bad y_vecs rank")

    # --- feedback (shares the dialog encoders) --------------------------
    def score_feedback(self, x_vecs, y_vecs):
        x_enc, y_enc = encode_multi(self.fee_xy_stack, [x_vecs, y_vecs])
        return self.score_similarity(x_enc, y_enc)

    # --- satisfaction ----------------------------------------------------
    def score_satisfaction(self, x_vecs):
        (enc,) = encode_multi(self.sat_stack, [x_vecs])            # [B, D]
        # Linear(D,1)+sigmoid in plain XLA: an N=1 Pallas launch would cost
        # far more than the compute.
        out = jax.nn.sigmoid(enc @ self.sat_w + self.sat_b)
        return out[:, 0]

    # --- similarity -------------------------------------------------------
    def score_similarity(self, context_h, cand_h):
        if self.normalize_sent_emb:
            context_h = context_h / jnp.maximum(
                jnp.linalg.norm(context_h, axis=-1, keepdims=True), 1e-12)
            cand_h = cand_h / jnp.maximum(
                jnp.linalg.norm(cand_h, axis=-1, keepdims=True), 1e-12)
        if cand_h.ndim == 2:
            return jnp.matmul(context_h, cand_h.T)
        elif cand_h.ndim == 3:
            return jnp.einsum("bd,bnd->bn", context_h, cand_h)
        raise ValueError("bad cand rank")


# ----------------------------------------------------------------------------
if __name__ == "__main__":
    key = jax.random.PRNGKey(0)
    k_model, k_x, k_y, k_f = jax.random.split(key, 4)

    VOCAB, DIM, FFN, SEQ, BATCH, NCANDS, PAD = 32, 32, 64, 8, 2, 4, 0
    model = SelfFeedingModelPallas(k_model, vocab=VOCAB, dim=DIM, ffn=FFN,
                                   n_layers=2, n_heads=2, max_len=64, pad_idx=PAD)

    x_vecs = jax.random.randint(k_x, (BATCH, SEQ), 1, VOCAB, dtype=jnp.int32)
    x_vecs = x_vecs.at[:, -2:].set(PAD)                 # exercise padding mask
    y_vecs = jax.random.randint(k_y, (NCANDS, SEQ), 1, VOCAB, dtype=jnp.int32)
    y_vecs = y_vecs.at[:, -1:].set(PAD)
    f_vecs = jax.random.randint(k_f, (BATCH, SEQ), 1, VOCAB, dtype=jnp.int32)

    dia_scores = jax.block_until_ready(model.score_dialog(x_vecs, y_vecs))
    fee_scores = jax.block_until_ready(model.score_feedback(x_vecs, f_vecs))
    sat_scores = jax.block_until_ready(model.score_satisfaction(x_vecs))

    # 3D per-batch candidate path
    y3 = jnp.stack([y_vecs] * BATCH, axis=0)            # [B, N, S]
    dia3_scores = jax.block_until_ready(model.score_dialog(x_vecs, y3))

    assert dia_scores.shape == (BATCH, NCANDS)
    assert dia3_scores.shape == (BATCH, NCANDS)
    assert fee_scores.shape == (BATCH, BATCH)
    assert sat_scores.shape == (BATCH,)
    assert bool(jnp.all(jnp.isfinite(dia_scores)))
    assert bool(jnp.all(jnp.isfinite(dia3_scores)))
    assert bool(jnp.all(jnp.isfinite(fee_scores)))
    assert bool(jnp.all((sat_scores >= 0.0) & (sat_scores <= 1.0)))

    print("KERNEL_OK")
</pallas_src>

<mosaic_0001>
module attributes {stable_mosaic.version = 11 : i64} {
  func.func @_fused_encoder_kernel(%arg0: i32, %arg1: memref<1x4x8x128xf32, #tpu.memory_space<vmem>>, %arg2: memref<1x4x8xf32, #tpu.memory_space<vmem>>, %arg3: memref<1x8x128xf32, #tpu.memory_space<vmem>>, %arg4: memref<1x2x128x768xbf16, #tpu.memory_space<vmem>>, %arg5: memref<1x2x1x768xf32, #tpu.memory_space<vmem>>, %arg6: memref<1x2x256x128xbf16, #tpu.memory_space<vmem>>, %arg7: memref<1x2x1x128xf32, #tpu.memory_space<vmem>>, %arg8: memref<1x2x1x128xf32, #tpu.memory_space<vmem>>, %arg9: memref<1x2x1x128xf32, #tpu.memory_space<vmem>>, %arg10: memref<1x2x128x128xbf16, #tpu.memory_space<vmem>>, %arg11: memref<1x2x1x128xf32, #tpu.memory_space<vmem>>, %arg12: memref<1x2x128x128xbf16, #tpu.memory_space<vmem>>, %arg13: memref<1x2x1x128xf32, #tpu.memory_space<vmem>>, %arg14: memref<1x2x1x128xf32, #tpu.memory_space<vmem>>, %arg15: memref<1x2x1x128xf32, #tpu.memory_space<vmem>>, %arg16: memref<1x4x128xf32, #tpu.memory_space<vmem>>) attributes {dimension_semantics = [#tpu.dimension_semantics<parallel>], iteration_bounds = array<i64: 2>, scalar_prefetch = 0 : i64, scratch_operands = 0 : i64, tpu.core_type = #tpu.core_type<tc>, window_params = [{transform_indices = @transform_0, window_bounds = array<i64: 1, 4, 8, 128>}, {transform_indices = @transform_1, window_bounds = array<i64: 1, 4, 8>}, {transform_indices = @transform_2, window_bounds = array<i64: 1, 8, 128>}, {transform_indices = @transform_3, window_bounds = array<i64: 1, 2, 128, 768>}, {transform_indices = @transform_4, window_bounds = array<i64: 1, 2, 1, 768>}, {transform_indices = @transform_5, window_bounds = array<i64: 1, 2, 256, 128>}, {transform_indices = @transform_6, window_bounds = array<i64: 1, 2, 1, 128>}, {transform_indices = @transform_7, window_bounds = array<i64: 1, 2, 1, 128>}, {transform_indices = @transform_8, window_bounds = array<i64: 1, 2, 1, 128>}, {transform_indices = @transform_9, window_bounds = array<i64: 1, 2, 128, 128>}, {transform_indices = @transform_10, window_bounds = array<i64: 1, 2, 1, 128>}, {transform_indices = @transform_11, window_bounds = array<i64: 1, 2, 128, 128>}, {transform_indices = @transform_12, window_bounds = array<i64: 1, 2, 1, 128>}, {transform_indices = @transform_13, window_bounds = array<i64: 1, 2, 1, 128>}, {transform_indices = @transform_14, window_bounds = array<i64: 1, 2, 1, 128>}, {transform_indices = @transform_15, window_bounds = array<i64: 1, 4, 128>}]} {
    %c0 = arith.constant 0 : index
    %c0_0 = arith.constant 0 : index
    %c0_1 = arith.constant 0 : index
    %0 = vector.load %arg2[%c0, %c0_0, %c0_1] : memref<1x4x8xf32, #tpu.memory_space<vmem>>, vector<1x4x8xf32>
    %1 = vector.shape_cast %0 : vector<1x4x8xf32> to vector<4x8xf32>
    %2 = vector.shape_cast %1 : vector<4x8xf32> to vector<4x8x1xf32>
    %cst = arith.constant 1.000000e+00 : f32
    %3 = vector.broadcast %cst : f32 to vector<4x8xf32>
    %4 = arith.subf %1, %3 : vector<4x8xf32>
    %cst_2 = arith.constant 1.000000e+30 : f32
    %5 = vector.broadcast %cst_2 : f32 to vector<4x8xf32>
    %6 = arith.mulf %4, %5 : vector<4x8xf32>
    %7 = vector.shape_cast %6 : vector<4x8xf32> to vector<4x1x8xf32>
    %8 = tpu.iota {dimensions = array<i32: 1>} : vector<1x128xi32>
    %c32_i32 = arith.constant 32 : i32
    %9 = vector.broadcast %c32_i32 : i32 to vector<1x128xi32>
    %10 = arith.cmpi slt, %8, %9 : vector<1x128xi32>
    %11 = arith.extui %10 : vector<1x128xi1> to vector<1x128xi32>
    %12 = arith.sitofp %11 : vector<1x128xi32> to vector<1x128xf32>
    %c0_3 = arith.constant 0 : index
    %c0_4 = arith.constant 0 : index
    %c0_5 = arith.constant 0 : index
    %c0_6 = arith.constant 0 : index
    %13 = vector.load %arg1[%c0_3, %c0_4, %c0_5, %c0_6] : memref<1x4x8x128xf32, #tpu.memory_space<vmem>>, vector<1x4x8x128xf32>
    %14 = vector.shape_cast %13 : vector<1x4x8x128xf32> to vector<4x8x128xf32>
    %cst_7 = arith.constant 5.65685415 : f32
    %15 = vector.broadcast %cst_7 : f32 to vector<4x8x128xf32>
    %16 = arith.mulf %14, %15 : vector<4x8x128xf32>
    %c0_8 = arith.constant 0 : index
    %c0_9 = arith.constant 0 : index
    %c0_10 = arith.constant 0 : index
    %17 = vector.load %arg3[%c0_8, %c0_9, %c0_10] : memref<1x8x128xf32, #tpu.memory_space<vmem>>, vector<1x8x128xf32>
    %18 = vector.shape_cast %17 : vector<1x8x128xf32> to vector<8x128xf32>
    %19 = vector.shape_cast %18 : vector<8x128xf32> to vector<1x8x128xf32>
    %20 = vector.broadcast %19 : vector<1x8x128xf32> to vector<4x8x128xf32>
    %21 = arith.addf %16, %20 : vector<4x8x128xf32>
    %22 = vector.broadcast %2 : vector<4x8x1xf32> to vector<4x8x128xf32>
    %23 = arith.mulf %21, %22 : vector<4x8x128xf32>
    %24 = vector.shape_cast %23 : vector<4x8x128xf32> to vector<32x128xf32>
    %25 = arith.truncf %24 : vector<32x128xf32> to vector<32x128xbf16>
    %c0_11 = arith.constant 0 : index
    %c0_12 = arith.constant 0 : index
    %c0_13 = arith.constant 0 : index
    %c0_14 = arith.constant 0 : index
    %26 = vector.load %arg4[%c0_11, %c0_12, %c0_13, %c0_14] : memref<1x2x128x768xbf16, #tpu.memory_space<vmem>>, vector<1x1x128x768xbf16>
    %27 = vector.shape_cast %26 : vector<1x1x128x768xbf16> to vector<128x768xbf16>
    %cst_15 = arith.constant dense<0.000000e+00> : vector<32x768xf32>
    %28 = tpu.matmul %25, %27, %cst_15 {dimension_numbers = #tpu.dot_dimension_numbers<[1], [0], [0], [1], [0, 0, 1, 1], [], []>} : vector<32x128xbf16>, vector<128x768xbf16>, vector<32x768xf32> -> vector<32x768xf32>
    %c0_16 = arith.constant 0 : index
    %c0_17 = arith.constant 0 : index
    %c0_18 = arith.constant 0 : index
    %c0_19 = arith.constant 0 : index
    %29 = vector.load %arg5[%c0_16, %c0_17, %c0_18, %c0_19] : memref<1x2x1x768xf32, #tpu.memory_space<vmem>>, vector<1x1x1x768xf32>
    %30 = vector.shape_cast %29 : vector<1x1x1x768xf32> to vector<1x768xf32>
    %31 = vector.broadcast %30 : vector<1x768xf32> to vector<32x768xf32>
    %32 = arith.addf %28, %31 : vector<32x768xf32>
    %33 = arith.truncf %32 : vector<32x768xf32> to vector<32x768xbf16>
    %34 = vector.extract_strided_slice %33 {offsets = [0, 0], sizes = [32, 128], strides = [1, 1]} : vector<32x768xbf16> to vector<32x128xbf16>
    %35 = vector.shape_cast %34 : vector<32x128xbf16> to vector<4x8x128xbf16>
    %36 = vector.extract_strided_slice %33 {offsets = [0, 256], sizes = [32, 128], strides = [1, 1]} : vector<32x768xbf16> to vector<32x128xbf16>
    %37 = vector.shape_cast %36 : vector<32x128xbf16> to vector<4x8x128xbf16>
    %38 = vector.extract_strided_slice %33 {offsets = [0, 512], sizes = [32, 128], strides = [1, 1]} : vector<32x768xbf16> to vector<32x128xbf16>
    %39 = vector.shape_cast %38 : vector<32x128xbf16> to vector<4x8x128xbf16>
    "tpu.trace_start"() <{level = 10 : i32, message = "bqd,bkd->bqk"}> : () -> ()
    %cst_20 = arith.constant dense<0.000000e+00> : vector<4x8x8xf32>
    %40 = tpu.matmul %35, %37, %cst_20 {dimension_numbers = #tpu.dot_dimension_numbers<[2], [2], [1], [1], [0, 0, 0, 1, 1, 1], [0], [0]>} : vector<4x8x128xbf16>, vector<4x8x128xbf16>, vector<4x8x8xf32> -> vector<4x8x8xf32>
    "tpu.trace_stop"() : () -> ()
    %cst_21 = arith.constant 2.500000e-01 : f32
    %41 = vector.broadcast %cst_21 : f32 to vector<4x8x8xf32>
    %42 = arith.mulf %40, %41 : vector<4x8x8xf32>
    %43 = vector.broadcast %7 : vector<4x1x8xf32> to vector<4x8x8xf32>
    %44 = arith.addf %42, %43 : vector<4x8x8xf32>
    %cst_22 = arith.constant dense<0xFF800000> : vector<4x8xf32>
    %45 = vector.multi_reduction <maximumf>, %44, %cst_22 [2] : vector<4x8x8xf32> to vector<4x8xf32>
    %46 = vector.shape_cast %45 : vector<4x8xf32> to vector<4x8x1xf32>
    %47 = vector.broadcast %46 : vector<4x8x1xf32> to vector<4x8x8xf32>
    %48 = arith.subf %44, %47 : vector<4x8x8xf32>
    %49 = math.exp %48 : vector<4x8x8xf32>
    %cst_23 = arith.constant dense<0.000000e+00> : vector<4x8xf32>
    %50 = vector.multi_reduction <add>, %49, %cst_23 [2] : vector<4x8x8xf32> to vector<4x8xf32>
    %51 = vector.shape_cast %50 : vector<4x8xf32> to vector<4x8x1xf32>
    %52 = tpu.reciprocal %51 {approx = true} : vector<4x8x1xf32> -> vector<4x8x1xf32>
    %53 = vector.broadcast %52 : vector<4x8x1xf32> to vector<4x8x8xf32>
    %54 = arith.mulf %49, %53 : vector<4x8x8xf32>
    %55 = arith.truncf %54 : vector<4x8x8xf32> to vector<4x8x8xbf16>
    "tpu.trace_start"() <{level = 10 : i32, message = "bqk,bkd->bqd"}> : () -> ()
    %cst_24 = arith.constant dense<0.000000e+00> : vector<4x8x128xf32>
    %56 = tpu.matmul %55, %39, %cst_24 {dimension_numbers = #tpu.dot_dimension_numbers<[2], [1], [1], [2], [0, 0, 0, 1, 1, 2], [0], [0]>} : vector<4x8x8xbf16>, vector<4x8x128xbf16>, vector<4x8x128xf32> -> vector<4x8x128xf32>
    "tpu.trace_stop"() : () -> ()
    %57 = vector.shape_cast %56 : vector<4x8x128xf32> to vector<32x128xf32>
    %58 = vector.extract_strided_slice %33 {offsets = [0, 128], sizes = [32, 128], strides = [1, 1]} : vector<32x768xbf16> to vector<32x128xbf16>
    %59 = vector.shape_cast %58 : vector<32x128xbf16> to vector<4x8x128xbf16>
    %60 = vector.extract_strided_slice %33 {offsets = [0, 384], sizes = [32, 128], strides = [1, 1]} : vector<32x768xbf16> to vector<32x128xbf16>
    %61 = vector.shape_cast %60 : vector<32x128xbf16> to vector<4x8x128xbf16>
    %62 = vector.extract_strided_slice %33 {offsets = [0, 640], sizes = [32, 128], strides = [1, 1]} : vector<32x768xbf16> to vector<32x128xbf16>
    %63 = vector.shape_cast %62 : vector<32x128xbf16> to vector<4x8x128xbf16>
    "tpu.trace_start"() <{level = 10 : i32, message = "bqd,bkd->bqk"}> : () -> ()
    %cst_25 = arith.constant dense<0.000000e+00> : vector<4x8x8xf32>
    %64 = tpu.matmul %59, %61, %cst_25 {dimension_numbers = #tpu.dot_dimension_numbers<[2], [2], [1], [1], [0, 0, 0, 1, 1, 1], [0], [0]>} : vector<4x8x128xbf16>, vector<4x8x128xbf16>, vector<4x8x8xf32> -> vector<4x8x8xf32>
    "tpu.trace_stop"() : () -> ()
    %cst_26 = arith.constant 2.500000e-01 : f32
    %65 = vector.broadcast %cst_26 : f32 to vector<4x8x8xf32>
    %66 = arith.mulf %64, %65 : vector<4x8x8xf32>
    %67 = vector.broadcast %7 : vector<4x1x8xf32> to vector<4x8x8xf32>
    %68 = arith.addf %66, %67 : vector<4x8x8xf32>
    %cst_27 = arith.constant dense<0xFF800000> : vector<4x8xf32>
    %69 = vector.multi_reduction <maximumf>, %68, %cst_27 [2] : vector<4x8x8xf32> to vector<4x8xf32>
    %70 = vector.shape_cast %69 : vector<4x8xf32> to vector<4x8x1xf32>
    %71 = vector.broadcast %70 : vector<4x8x1xf32> to vector<4x8x8xf32>
    %72 = arith.subf %68, %71 : vector<4x8x8xf32>
    %73 = math.exp %72 : vector<4x8x8xf32>
    %cst_28 = arith.constant dense<0.000000e+00> : vector<4x8xf32>
    %74 = vector.multi_reduction <add>, %73, %cst_28 [2] : vector<4x8x8xf32> to vector<4x8xf32>
    %75 = vector.shape_cast %74 : vector<4x8xf32> to vector<4x8x1xf32>
    %76 = tpu.reciprocal %75 {approx = true} : vector<4x8x1xf32> -> vector<4x8x1xf32>
    %77 = vector.broadcast %76 : vector<4x8x1xf32> to vector<4x8x8xf32>
    %78 = arith.mulf %73, %77 : vector<4x8x8xf32>
    %79 = arith.truncf %78 : vector<4x8x8xf32> to vector<4x8x8xbf16>
    "tpu.trace_start"() <{level = 10 : i32, message = "bqk,bkd->bqd"}> : () -> ()
    %cst_29 = arith.constant dense<0.000000e+00> : vector<4x8x128xf32>
    %80 = tpu.matmul %79, %63, %cst_29 {dimension_numbers = #tpu.dot_dimension_numbers<[2], [1], [1], [2], [0, 0, 0, 1, 1, 2], [0], [0]>} : vector<4x8x8xbf16>, vector<4x8x128xbf16>, vector<4x8x128xf32> -> vector<4x8x128xf32>
    "tpu.trace_stop"() : () -> ()
    %81 = vector.shape_cast %80 : vector<4x8x128xf32> to vector<32x128xf32>
    %82 = tpu.concatenate %57, %81 in 1 : vector<32x128xf32>, vector<32x128xf32> -> vector<32x256xf32>
    %83 = arith.truncf %82 : vector<32x256xf32> to vector<32x256xbf16>
    %c0_30 = arith.constant 0 : index
    %c0_31 = arith.constant 0 : index
    %c0_32 = arith.constant 0 : index
    %c0_33 = arith.constant 0 : index
    %84 = vector.load %arg6[%c0_30, %c0_31, %c0_32, %c0_33] : memref<1x2x256x128xbf16, #tpu.memory_space<vmem>>, vector<1x1x256x128xbf16>
    %85 = vector.shape_cast %84 : vector<1x1x256x128xbf16> to vector<256x128xbf16>
    %cst_34 = arith.constant dense<0.000000e+00> : vector<32x128xf32>
    %86 = tpu.matmul %83, %85, %cst_34 {dimension_numbers = #tpu.dot_dimension_numbers<[1], [0], [0], [1], [0, 0, 1, 1], [], []>} : vector<32x256xbf16>, vector<256x128xbf16>, vector<32x128xf32> -> vector<32x128xf32>
    %c0_35 = arith.constant 0 : index
    %c0_36 = arith.constant 0 : index
    %c0_37 = arith.constant 0 : index
    %c0_38 = arith.constant 0 : index
    %87 = vector.load %arg7[%c0_35, %c0_36, %c0_37, %c0_38] : memref<1x2x1x128xf32, #tpu.memory_space<vmem>>, vector<1x1x1x128xf32>
    %88 = vector.shape_cast %87 : vector<1x1x1x128xf32> to vector<1x128xf32>
    %89 = vector.broadcast %88 : vector<1x128xf32> to vector<32x128xf32>
    %90 = arith.addf %86, %89 : vector<32x128xf32>
    %91 = arith.addf %24, %90 : vector<32x128xf32>
    %c0_39 = arith.constant 0 : index
    %c0_40 = arith.constant 0 : index
    %c0_41 = arith.constant 0 : index
    %c0_42 = arith.constant 0 : index
    %92 = vector.load %arg8[%c0_39, %c0_40, %c0_41, %c0_42] : memref<1x2x1x128xf32, #tpu.memory_space<vmem>>, vector<1x1x1x128xf32>
    %93 = vector.shape_cast %92 : vector<1x1x1x128xf32> to vector<1x128xf32>
    %c0_43 = arith.constant 0 : index
    %c0_44 = arith.constant 0 : index
    %c0_45 = arith.constant 0 : index
    %c0_46 = arith.constant 0 : index
    %94 = vector.load %arg9[%c0_43, %c0_44, %c0_45, %c0_46] : memref<1x2x1x128xf32, #tpu.memory_space<vmem>>, vector<1x1x1x128xf32>
    %95 = vector.shape_cast %94 : vector<1x1x1x128xf32> to vector<1x128xf32>
    %96 = vector.broadcast %12 : vector<1x128xf32> to vector<32x128xf32>
    %97 = arith.mulf %91, %96 : vector<32x128xf32>
    %cst_47 = arith.constant dense<0.000000e+00> : vector<32xf32>
    %98 = vector.multi_reduction <add>, %97, %cst_47 [1] : vector<32x128xf32> to vector<32xf32>
    %99 = vector.shape_cast %98 : vector<32xf32> to vector<32x1xf32>
    %cst_48 = arith.constant 3.125000e-02 : f32
    %100 = vector.broadcast %cst_48 : f32 to vector<32x1xf32>
    %101 = arith.mulf %99, %100 : vector<32x1xf32>
    %102 = vector.broadcast %101 : vector<32x1xf32> to vector<32x128xf32>
    %103 = arith.subf %91, %102 : vector<32x128xf32>
    %104 = vector.broadcast %12 : vector<1x128xf32> to vector<32x128xf32>
    %105 = arith.mulf %103, %104 : vector<32x128xf32>
    %106 = arith.mulf %105, %105 : vector<32x128xf32>
    %cst_49 = arith.constant dense<0.000000e+00> : vector<32xf32>
    %107 = vector.multi_reduction <add>, %106, %cst_49 [1] : vector<32x128xf32> to vector<32xf32>
    %108 = vector.shape_cast %107 : vector<32xf32> to vector<32x1xf32>
    %cst_50 = arith.constant 3.125000e-02 : f32
    %109 = vector.broadcast %cst_50 : f32 to vector<32x1xf32>
    %110 = arith.mulf %108, %109 : vector<32x1xf32>
    %cst_51 = arith.constant 9.99999974E-6 : f32
    %111 = vector.broadcast %cst_51 : f32 to vector<32x1xf32>
    %112 = arith.addf %110, %111 : vector<32x1xf32>
    %113 = math.rsqrt %112 : vector<32x1xf32>
    %114 = vector.broadcast %113 : vector<32x1xf32> to vector<32x128xf32>
    %115 = arith.mulf %105, %114 : vector<32x128xf32>
    %116 = vector.broadcast %93 : vector<1x128xf32> to vector<32x128xf32>
    %117 = arith.mulf %115, %116 : vector<32x128xf32>
    %118 = vector.broadcast %95 : vector<1x128xf32> to vector<32x128xf32>
    %119 = arith.addf %117, %118 : vector<32x128xf32>
    %120 = vector.shape_cast %119 : vector<32x128xf32> to vector<4x8x128xf32>
    %121 = vector.broadcast %2 : vector<4x8x1xf32> to vector<4x8x128xf32>
    %122 = arith.mulf %120, %121 : vector<4x8x128xf32>
    %123 = vector.shape_cast %122 : vector<4x8x128xf32> to vector<32x128xf32>
    %124 = arith.truncf %123 : vector<32x128xf32> to vector<32x128xbf16>
    %c0_52 = arith.constant 0 : index
    %c0_53 = arith.constant 0 : index
    %c0_54 = arith.constant 0 : index
    %c0_55 = arith.constant 0 : index
    %125 = vector.load %arg10[%c0_52, %c0_53, %c0_54, %c0_55] : memref<1x2x128x128xbf16, #tpu.memory_space<vmem>>, vector<1x1x128x128xbf16>
    %126 = vector.shape_cast %125 : vector<1x1x128x128xbf16> to vector<128x128xbf16>
    %cst_56 = arith.constant dense<0.000000e+00> : vector<32x128xf32>
    %127 = tpu.matmul %124, %126, %cst_56 {dimension_numbers = #tpu.dot_dimension_numbers<[1], [0], [0], [1], [0, 0, 1, 1], [], []>} : vector<32x128xbf16>, vector<128x128xbf16>, vector<32x128xf32> -> vector<32x128xf32>
    %c0_57 = arith.constant 0 : index
    %c0_58 = arith.constant 0 : index
    %c0_59 = arith.constant 0 : index
    %c0_60 = arith.constant 0 : index
    %128 = vector.load %arg11[%c0_57, %c0_58, %c0_59, %c0_60] : memref<1x2x1x128xf32, #tpu.memory_space<vmem>>, vector<1x1x1x128xf32>
    %129 = vector.shape_cast %128 : vector<1x1x1x128xf32> to vector<1x128xf32>
    %130 = vector.broadcast %129 : vector<1x128xf32> to vector<32x128xf32>
    %131 = arith.addf %127, %130 : vector<32x128xf32>
    %cst_61 = arith.constant 0.000000e+00 : f32
    %132 = vector.broadcast %cst_61 : f32 to vector<32x128xf32>
    %133 = arith.maximumf %131, %132 : vector<32x128xf32>
    %134 = arith.truncf %133 : vector<32x128xf32> to vector<32x128xbf16>
    %c0_62 = arith.constant 0 : index
    %c0_63 = arith.constant 0 : index
    %c0_64 = arith.constant 0 : index
    %c0_65 = arith.constant 0 : index
    %135 = vector.load %arg12[%c0_62, %c0_63, %c0_64, %c0_65] : memref<1x2x128x128xbf16, #tpu.memory_space<vmem>>, vector<1x1x128x128xbf16>
    %136 = vector.shape_cast %135 : vector<1x1x128x128xbf16> to vector<128x128xbf16>
    %cst_66 = arith.constant dense<0.000000e+00> : vector<32x128xf32>
    %137 = tpu.matmul %134, %136, %cst_66 {dimension_numbers = #tpu.dot_dimension_numbers<[1], [0], [0], [1], [0, 0, 1, 1], [], []>} : vector<32x128xbf16>, vector<128x128xbf16>, vector<32x128xf32> -> vector<32x128xf32>
    %c0_67 = arith.constant 0 : index
    %c0_68 = arith.constant 0 : index
    %c0_69 = arith.constant 0 : index
    %c0_70 = arith.constant 0 : index
    %138 = vector.load %arg13[%c0_67, %c0_68, %c0_69, %c0_70] : memref<1x2x1x128xf32, #tpu.memory_space<vmem>>, vector<1x1x1x128xf32>
    %139 = vector.shape_cast %138 : vector<1x1x1x128xf32> to vector<1x128xf32>
    %140 = vector.broadcast %139 : vector<1x128xf32> to vector<32x128xf32>
    %141 = arith.addf %137, %140 : vector<32x128xf32>
    %142 = arith.addf %123, %141 : vector<32x128xf32>
    %c0_71 = arith.constant 0 : index
    %c0_72 = arith.constant 0 : index
    %c0_73 = arith.constant 0 : index
    %c0_74 = arith.constant 0 : index
    %143 = vector.load %arg14[%c0_71, %c0_72, %c0_73, %c0_74] : memref<1x2x1x128xf32, #tpu.memory_space<vmem>>, vector<1x1x1x128xf32>
    %144 = vector.shape_cast %143 : vector<1x1x1x128xf32> to vector<1x128xf32>
    %c0_75 = arith.constant 0 : index
    %c0_76 = arith.constant 0 : index
    %c0_77 = arith.constant 0 : index
    %c0_78 = arith.constant 0 : index
    %145 = vector.load %arg15[%c0_75, %c0_76, %c0_77, %c0_78] : memref<1x2x1x128xf32, #tpu.memory_space<vmem>>, vector<1x1x1x128xf32>
    %146 = vector.shape_cast %145 : vector<1x1x1x128xf32> to vector<1x128xf32>
    %147 = vector.broadcast %12 : vector<1x128xf32> to vector<32x128xf32>
    %148 = arith.mulf %142, %147 : vector<32x128xf32>
    %cst_79 = arith.constant dense<0.000000e+00> : vector<32xf32>
    %149 = vector.multi_reduction <add>, %148, %cst_79 [1] : vector<32x128xf32> to vector<32xf32>
    %150 = vector.shape_cast %149 : vector<32xf32> to vector<32x1xf32>
    %cst_80 = arith.constant 3.125000e-02 : f32
    %151 = vector.broadcast %cst_80 : f32 to vector<32x1xf32>
    %152 = arith.mulf %150, %151 : vector<32x1xf32>
    %153 = vector.broadcast %152 : vector<32x1xf32> to vector<32x128xf32>
    %154 = arith.subf %142, %153 : vector<32x128xf32>
    %155 = vector.broadcast %12 : vector<1x128xf32> to vector<32x128xf32>
    %156 = arith.mulf %154, %155 : vector<32x128xf32>
    %157 = arith.mulf %156, %156 : vector<32x128xf32>
    %cst_81 = arith.constant dense<0.000000e+00> : vector<32xf32>
    %158 = vector.multi_reduction <add>, %157, %cst_81 [1] : vector<32x128xf32> to vector<32xf32>
    %159 = vector.shape_cast %158 : vector<32xf32> to vector<32x1xf32>
    %cst_82 = arith.constant 3.125000e-02 : f32
    %160 = vector.broadcast %cst_82 : f32 to vector<32x1xf32>
    %161 = arith.mulf %159, %160 : vector<32x1xf32>
    %cst_83 = arith.constant 9.99999974E-6 : f32
    %162 = vector.broadcast %cst_83 : f32 to vector<32x1xf32>
    %163 = arith.addf %161, %162 : vector<32x1xf32>
    %164 = math.rsqrt %163 : vector<32x1xf32>
    %165 = vector.broadcast %164 : vector<32x1xf32> to vector<32x128xf32>
    %166 = arith.mulf %156, %165 : vector<32x128xf32>
    %167 = vector.broadcast %144 : vector<1x128xf32> to vector<32x128xf32>
    %168 = arith.mulf %166, %167 : vector<32x128xf32>
    %169 = vector.broadcast %146 : vector<1x128xf32> to vector<32x128xf32>
    %170 = arith.addf %168, %169 : vector<32x128xf32>
    %171 = vector.shape_cast %170 : vector<32x128xf32> to vector<4x8x128xf32>
    %172 = vector.broadcast %2 : vector<4x8x1xf32> to vector<4x8x128xf32>
    %173 = arith.mulf %171, %172 : vector<4x8x128xf32>
    %174 = vector.shape_cast %173 : vector<4x8x128xf32> to vector<32x128xf32>
    %175 = arith.truncf %174 : vector<32x128xf32> to vector<32x128xbf16>
    %c0_84 = arith.constant 0 : index
    %c1 = arith.constant 1 : index
    %c0_85 = arith.constant 0 : index
    %c0_86 = arith.constant 0 : index
    %176 = vector.load %arg4[%c0_84, %c1, %c0_85, %c0_86] : memref<1x2x128x768xbf16, #tpu.memory_space<vmem>>, vector<1x1x128x768xbf16>
    %177 = vector.shape_cast %176 : vector<1x1x128x768xbf16> to vector<128x768xbf16>
    %cst_87 = arith.constant dense<0.000000e+00> : vector<32x768xf32>
    %178 = tpu.matmul %175, %177, %cst_87 {dimension_numbers = #tpu.dot_dimension_numbers<[1], [0], [0], [1], [0, 0, 1, 1], [], []>} : vector<32x128xbf16>, vector<128x768xbf16>, vector<32x768xf32> -> vector<32x768xf32>
    %c0_88 = arith.constant 0 : index
    %c1_89 = arith.constant 1 : index
    %c0_90 = arith.constant 0 : index
    %c0_91 = arith.constant 0 : index
    %179 = vector.load %arg5[%c0_88, %c1_89, %c0_90, %c0_91] : memref<1x2x1x768xf32, #tpu.memory_space<vmem>>, vector<1x1x1x768xf32>
    %180 = vector.shape_cast %179 : vector<1x1x1x768xf32> to vector<1x768xf32>
    %181 = vector.broadcast %180 : vector<1x768xf32> to vector<32x768xf32>
    %182 = arith.addf %178, %181 : vector<32x768xf32>
    %183 = arith.truncf %182 : vector<32x768xf32> to vector<32x768xbf16>
    %184 = vector.extract_strided_slice %183 {offsets = [0, 0], sizes = [32, 128], strides = [1, 1]} : vector<32x768xbf16> to vector<32x128xbf16>
    %185 = vector.shape_cast %184 : vector<32x128xbf16> to vector<4x8x128xbf16>
    %186 = vector.extract_strided_slice %183 {offsets = [0, 256], sizes = [32, 128], strides = [1, 1]} : vector<32x768xbf16> to vector<32x128xbf16>
    %187 = vector.shape_cast %186 : vector<32x128xbf16> to vector<4x8x128xbf16>
    %188 = vector.extract_strided_slice %183 {offsets = [0, 512], sizes = [32, 128], strides = [1, 1]} : vector<32x768xbf16> to vector<32x128xbf16>
    %189 = vector.shape_cast %188 : vector<32x128xbf16> to vector<4x8x128xbf16>
    "tpu.trace_start"() <{level = 10 : i32, message = "bqd,bkd->bqk"}> : () -> ()
    %cst_92 = arith.constant dense<0.000000e+00> : vector<4x8x8xf32>
    %190 = tpu.matmul %185, %187, %cst_92 {dimension_numbers = #tpu.dot_dimension_numbers<[2], [2], [1], [1], [0, 0, 0, 1, 1, 1], [0], [0]>} : vector<4x8x128xbf16>, vector<4x8x128xbf16>, vector<4x8x8xf32> -> vector<4x8x8xf32>
    "tpu.trace_stop"() : () -> ()
    %cst_93 = arith.constant 2.500000e-01 : f32
    %191 = vector.broadcast %cst_93 : f32 to vector<4x8x8xf32>
    %192 = arith.mulf %190, %191 : vector<4x8x8xf32>
    %193 = vector.broadcast %7 : vector<4x1x8xf32> to vector<4x8x8xf32>
    %194 = arith.addf %192, %193 : vector<4x8x8xf32>
    %cst_94 = arith.constant dense<0xFF800000> : vector<4x8xf32>
    %195 = vector.multi_reduction <maximumf>, %194, %cst_94 [2] : vector<4x8x8xf32> to vector<4x8xf32>
    %196 = vector.shape_cast %195 : vector<4x8xf32> to vector<4x8x1xf32>
    %197 = vector.broadcast %196 : vector<4x8x1xf32> to vector<4x8x8xf32>
    %198 = arith.subf %194, %197 : vector<4x8x8xf32>
    %199 = math.exp %198 : vector<4x8x8xf32>
    %cst_95 = arith.constant dense<0.000000e+00> : vector<4x8xf32>
    %200 = vector.multi_reduction <add>, %199, %cst_95 [2] : vector<4x8x8xf32> to vector<4x8xf32>
    %201 = vector.shape_cast %200 : vector<4x8xf32> to vector<4x8x1xf32>
    %202 = tpu.reciprocal %201 {approx = true} : vector<4x8x1xf32> -> vector<4x8x1xf32>
    %203 = vector.broadcast %202 : vector<4x8x1xf32> to vector<4x8x8xf32>
    %204 = arith.mulf %199, %203 : vector<4x8x8xf32>
    %205 = arith.truncf %204 : vector<4x8x8xf32> to vector<4x8x8xbf16>
    "tpu.trace_start"() <{level = 10 : i32, message = "bqk,bkd->bqd"}> : () -> ()
    %cst_96 = arith.constant dense<0.000000e+00> : vector<4x8x128xf32>
    %206 = tpu.matmul %205, %189, %cst_96 {dimension_numbers = #tpu.dot_dimension_numbers<[2], [1], [1], [2], [0, 0, 0, 1, 1, 2], [0], [0]>} : vector<4x8x8xbf16>, vector<4x8x128xbf16>, vector<4x8x128xf32> -> vector<4x8x128xf32>
    "tpu.trace_stop"() : () -> ()
    %207 = vector.shape_cast %206 : vector<4x8x128xf32> to vector<32x128xf32>
    %208 = vector.extract_strided_slice %183 {offsets = [0, 128], sizes = [32, 128], strides = [1, 1]} : vector<32x768xbf16> to vector<32x128xbf16>
    %209 = vector.shape_cast %208 : vector<32x128xbf16> to vector<4x8x128xbf16>
    %210 = vector.extract_strided_slice %183 {offsets = [0, 384], sizes = [32, 128], strides = [1, 1]} : vector<32x768xbf16> to vector<32x128xbf16>
    %211 = vector.shape_cast %210 : vector<32x128xbf16> to vector<4x8x128xbf16>
    %212 = vector.extract_strided_slice %183 {offsets = [0, 640], sizes = [32, 128], strides = [1, 1]} : vector<32x768xbf16> to vector<32x128xbf16>
    %213 = vector.shape_cast %212 : vector<32x128xbf16> to vector<4x8x128xbf16>
    "tpu.trace_start"() <{level = 10 : i32, message = "bqd,bkd->bqk"}> : () -> ()
    %cst_97 = arith.constant dense<0.000000e+00> : vector<4x8x8xf32>
    %214 = tpu.matmul %209, %211, %cst_97 {dimension_numbers = #tpu.dot_dimension_numbers<[2], [2], [1], [1], [0, 0, 0, 1, 1, 1], [0], [0]>} : vector<4x8x128xbf16>, vector<4x8x128xbf16>, vector<4x8x8xf32> -> vector<4x8x8xf32>
    "tpu.trace_stop"() : () -> ()
    %cst_98 = arith.constant 2.500000e-01 : f32
    %215 = vector.broadcast %cst_98 : f32 to vector<4x8x8xf32>
    %216 = arith.mulf %214, %215 : vector<4x8x8xf32>
    %217 = vector.broadcast %7 : vector<4x1x8xf32> to vector<4x8x8xf32>
    %218 = arith.addf %216, %217 : vector<4x8x8xf32>
    %cst_99 = arith.constant dense<0xFF800000> : vector<4x8xf32>
    %219 = vector.multi_reduction <maximumf>, %218, %cst_99 [2] : vector<4x8x8xf32> to vector<4x8xf32>
    %220 = vector.shape_cast %219 : vector<4x8xf32> to vector<4x8x1xf32>
    %221 = vector.broadcast %220 : vector<4x8x1xf32> to vector<4x8x8xf32>
    %222 = arith.subf %218, %221 : vector<4x8x8xf32>
    %223 = math.exp %222 : vector<4x8x8xf32>
    %cst_100 = arith.constant dense<0.000000e+00> : vector<4x8xf32>
    %224 = vector.multi_reduction <add>, %223, %cst_100 [2] : vector<4x8x8xf32> to vector<4x8xf32>
    %225 = vector.shape_cast %224 : vector<4x8xf32> to vector<4x8x1xf32>
    %226 = tpu.reciprocal %225 {approx = true} : vector<4x8x1xf32> -> vector<4x8x1xf32>
    %227 = vector.broadcast %226 : vector<4x8x1xf32> to vector<4x8x8xf32>
    %228 = arith.mulf %223, %227 : vector<4x8x8xf32>
    %229 = arith.truncf %228 : vector<4x8x8xf32> to vector<4x8x8xbf16>
    "tpu.trace_start"() <{level = 10 : i32, message = "bqk,bkd->bqd"}> : () -> ()
    %cst_101 = arith.constant dense<0.000000e+00> : vector<4x8x128xf32>
    %230 = tpu.matmul %229, %213, %cst_101 {dimension_numbers = #tpu.dot_dimension_numbers<[2], [1], [1], [2], [0, 0, 0, 1, 1, 2], [0], [0]>} : vector<4x8x8xbf16>, vector<4x8x128xbf16>, vector<4x8x128xf32> -> vector<4x8x128xf32>
    "tpu.trace_stop"() : () -> ()
    %231 = vector.shape_cast %230 : vector<4x8x128xf32> to vector<32x128xf32>
    %232 = tpu.concatenate %207, %231 in 1 : vector<32x128xf32>, vector<32x128xf32> -> vector<32x256xf32>
    %233 = arith.truncf %232 : vector<32x256xf32> to vector<32x256xbf16>
    %c0_102 = arith.constant 0 : index
    %c1_103 = arith.constant 1 : index
    %c0_104 = arith.constant 0 : index
    %c0_105 = arith.constant 0 : index
    %234 = vector.load %arg6[%c0_102, %c1_103, %c0_104, %c0_105] : memref<1x2x256x128xbf16, #tpu.memory_space<vmem>>, vector<1x1x256x128xbf16>
    %235 = vector.shape_cast %234 : vector<1x1x256x128xbf16> to vector<256x128xbf16>
    %cst_106 = arith.constant dense<0.000000e+00> : vector<32x128xf32>
    %236 = tpu.matmul %233, %235, %cst_106 {dimension_numbers = #tpu.dot_dimension_numbers<[1], [0], [0], [1], [0, 0, 1, 1], [], []>} : vector<32x256xbf16>, vector<256x128xbf16>, vector<32x128xf32> -> vector<32x128xf32>
    %c0_107 = arith.constant 0 : index
    %c1_108 = arith.constant 1 : index
    %c0_109 = arith.constant 0 : index
    %c0_110 = arith.constant 0 : index
    %237 = vector.load %arg7[%c0_107, %c1_108, %c0_109, %c0_110] : memref<1x2x1x128xf32, #tpu.memory_space<vmem>>, vector<1x1x1x128xf32>
    %238 = vector.shape_cast %237 : vector<1x1x1x128xf32> to vector<1x128xf32>
    %239 = vector.broadcast %238 : vector<1x128xf32> to vector<32x128xf32>
    %240 = arith.addf %236, %239 : vector<32x128xf32>
    %241 = arith.addf %174, %240 : vector<32x128xf32>
    %c0_111 = arith.constant 0 : index
    %c1_112 = arith.constant 1 : index
    %c0_113 = arith.constant 0 : index
    %c0_114 = arith.constant 0 : index
    %242 = vector.load %arg8[%c0_111, %c1_112, %c0_113, %c0_114] : memref<1x2x1x128xf32, #tpu.memory_space<vmem>>, vector<1x1x1x128xf32>
    %243 = vector.shape_cast %242 : vector<1x1x1x128xf32> to vector<1x128xf32>
    %c0_115 = arith.constant 0 : index
    %c1_116 = arith.constant 1 : index
    %c0_117 = arith.constant 0 : index
    %c0_118 = arith.constant 0 : index
    %244 = vector.load %arg9[%c0_115, %c1_116, %c0_117, %c0_118] : memref<1x2x1x128xf32, #tpu.memory_space<vmem>>, vector<1x1x1x128xf32>
    %245 = vector.shape_cast %244 : vector<1x1x1x128xf32> to vector<1x128xf32>
    %246 = vector.broadcast %12 : vector<1x128xf32> to vector<32x128xf32>
    %247 = arith.mulf %241, %246 : vector<32x128xf32>
    %cst_119 = arith.constant dense<0.000000e+00> : vector<32xf32>
    %248 = vector.multi_reduction <add>, %247, %cst_119 [1] : vector<32x128xf32> to vector<32xf32>
    %249 = vector.shape_cast %248 : vector<32xf32> to vector<32x1xf32>
    %cst_120 = arith.constant 3.125000e-02 : f32
    %250 = vector.broadcast %cst_120 : f32 to vector<32x1xf32>
    %251 = arith.mulf %249, %250 : vector<32x1xf32>
    %252 = vector.broadcast %251 : vector<32x1xf32> to vector<32x128xf32>
    %253 = arith.subf %241, %252 : vector<32x128xf32>
    %254 = vector.broadcast %12 : vector<1x128xf32> to vector<32x128xf32>
    %255 = arith.mulf %253, %254 : vector<32x128xf32>
    %256 = arith.mulf %255, %255 : vector<32x128xf32>
    %cst_121 = arith.constant dense<0.000000e+00> : vector<32xf32>
    %257 = vector.multi_reduction <add>, %256, %cst_121 [1] : vector<32x128xf32> to vector<32xf32>
    %258 = vector.shape_cast %257 : vector<32xf32> to vector<32x1xf32>
    %cst_122 = arith.constant 3.125000e-02 : f32
    %259 = vector.broadcast %cst_122 : f32 to vector<32x1xf32>
    %260 = arith.mulf %258, %259 : vector<32x1xf32>
    %cst_123 = arith.constant 9.99999974E-6 : f32
    %261 = vector.broadcast %cst_123 : f32 to vector<32x1xf32>
    %262 = arith.addf %260, %261 : vector<32x1xf32>
    %263 = math.rsqrt %262 : vector<32x1xf32>
    %264 = vector.broadcast %263 : vector<32x1xf32> to vector<32x128xf32>
    %265 = arith.mulf %255, %264 : vector<32x128xf32>
    %266 = vector.broadcast %243 : vector<1x128xf32> to vector<32x128xf32>
    %267 = arith.mulf %265, %266 : vector<32x128xf32>
    %268 = vector.broadcast %245 : vector<1x128xf32> to vector<32x128xf32>
    %269 = arith.addf %267, %268 : vector<32x128xf32>
    %270 = vector.shape_cast %269 : vector<32x128xf32> to vector<4x8x128xf32>
    %271 = vector.broadcast %2 : vector<4x8x1xf32> to vector<4x8x128xf32>
    %272 = arith.mulf %270, %271 : vector<4x8x128xf32>
    %273 = vector.shape_cast %272 : vector<4x8x128xf32> to vector<32x128xf32>
    %274 = arith.truncf %273 : vector<32x128xf32> to vector<32x128xbf16>
    %c0_124 = arith.constant 0 : index
    %c1_125 = arith.constant 1 : index
    %c0_126 = arith.constant 0 : index
    %c0_127 = arith.constant 0 : index
    %275 = vector.load %arg10[%c0_124, %c1_125, %c0_126, %c0_127] : memref<1x2x128x128xbf16, #tpu.memory_space<vmem>>, vector<1x1x128x128xbf16>
    %276 = vector.shape_cast %275 : vector<1x1x128x128xbf16> to vector<128x128xbf16>
    %cst_128 = arith.constant dense<0.000000e+00> : vector<32x128xf32>
    %277 = tpu.matmul %274, %276, %cst_128 {dimension_numbers = #tpu.dot_dimension_numbers<[1], [0], [0], [1], [0, 0, 1, 1], [], []>} : vector<32x128xbf16>, vector<128x128xbf16>, vector<32x128xf32> -> vector<32x128xf32>
    %c0_129 = arith.constant 0 : index
    %c1_130 = arith.constant 1 : index
    %c0_131 = arith.constant 0 : index
    %c0_132 = arith.constant 0 : index
    %278 = vector.load %arg11[%c0_129, %c1_130, %c0_131, %c0_132] : memref<1x2x1x128xf32, #tpu.memory_space<vmem>>, vector<1x1x1x128xf32>
    %279 = vector.shape_cast %278 : vector<1x1x1x128xf32> to vector<1x128xf32>
    %280 = vector.broadcast %279 : vector<1x128xf32> to vector<32x128xf32>
    %281 = arith.addf %277, %280 : vector<32x128xf32>
    %cst_133 = arith.constant 0.000000e+00 : f32
    %282 = vector.broadcast %cst_133 : f32 to vector<32x128xf32>
    %283 = arith.maximumf %281, %282 : vector<32x128xf32>
    %284 = arith.truncf %283 : vector<32x128xf32> to vector<32x128xbf16>
    %c0_134 = arith.constant 0 : index
    %c1_135 = arith.constant 1 : index
    %c0_136 = arith.constant 0 : index
    %c0_137 = arith.constant 0 : index
    %285 = vector.load %arg12[%c0_134, %c1_135, %c0_136, %c0_137] : memref<1x2x128x128xbf16, #tpu.memory_space<vmem>>, vector<1x1x128x128xbf16>
    %286 = vector.shape_cast %285 : vector<1x1x128x128xbf16> to vector<128x128xbf16>
    %cst_138 = arith.constant dense<0.000000e+00> : vector<32x128xf32>
    %287 = tpu.matmul %284, %286, %cst_138 {dimension_numbers = #tpu.dot_dimension_numbers<[1], [0], [0], [1], [0, 0, 1, 1], [], []>} : vector<32x128xbf16>, vector<128x128xbf16>, vector<32x128xf32> -> vector<32x128xf32>
    %c0_139 = arith.constant 0 : index
    %c1_140 = arith.constant 1 : index
    %c0_141 = arith.constant 0 : index
    %c0_142 = arith.constant 0 : index
    %288 = vector.load %arg13[%c0_139, %c1_140, %c0_141, %c0_142] : memref<1x2x1x128xf32, #tpu.memory_space<vmem>>, vector<1x1x1x128xf32>
    %289 = vector.shape_cast %288 : vector<1x1x1x128xf32> to vector<1x128xf32>
    %290 = vector.broadcast %289 : vector<1x128xf32> to vector<32x128xf32>
    %291 = arith.addf %287, %290 : vector<32x128xf32>
    %292 = arith.addf %273, %291 : vector<32x128xf32>
    %c0_143 = arith.constant 0 : index
    %c1_144 = arith.constant 1 : index
    %c0_145 = arith.constant 0 : index
    %c0_146 = arith.constant 0 : index
    %293 = vector.load %arg14[%c0_143, %c1_144, %c0_145, %c0_146] : memref<1x2x1x128xf32, #tpu.memory_space<vmem>>, vector<1x1x1x128xf32>
    %294 = vector.shape_cast %293 : vector<1x1x1x128xf32> to vector<1x128xf32>
    %c0_147 = arith.constant 0 : index
    %c1_148 = arith.constant 1 : index
    %c0_149 = arith.constant 0 : index
    %c0_150 = arith.constant 0 : index
    %295 = vector.load %arg15[%c0_147, %c1_148, %c0_149, %c0_150] : memref<1x2x1x128xf32, #tpu.memory_space<vmem>>, vector<1x1x1x128xf32>
    %296 = vector.shape_cast %295 : vector<1x1x1x128xf32> to vector<1x128xf32>
    %297 = vector.broadcast %12 : vector<1x128xf32> to vector<32x128xf32>
    %298 = arith.mulf %292, %297 : vector<32x128xf32>
    %cst_151 = arith.constant dense<0.000000e+00> : vector<32xf32>
    %299 = vector.multi_reduction <add>, %298, %cst_151 [1] : vector<32x128xf32> to vector<32xf32>
    %300 = vector.shape_cast %299 : vector<32xf32> to vector<32x1xf32>
    %cst_152 = arith.constant 3.125000e-02 : f32
    %301 = vector.broadcast %cst_152 : f32 to vector<32x1xf32>
    %302 = arith.mulf %300, %301 : vector<32x1xf32>
    %303 = vector.broadcast %302 : vector<32x1xf32> to vector<32x128xf32>
    %304 = arith.subf %292, %303 : vector<32x128xf32>
    %305 = vector.broadcast %12 : vector<1x128xf32> to vector<32x128xf32>
    %306 = arith.mulf %304, %305 : vector<32x128xf32>
    %307 = arith.mulf %306, %306 : vector<32x128xf32>
    %cst_153 = arith.constant dense<0.000000e+00> : vector<32xf32>
    %308 = vector.multi_reduction <add>, %307, %cst_153 [1] : vector<32x128xf32> to vector<32xf32>
    %309 = vector.shape_cast %308 : vector<32xf32> to vector<32x1xf32>
    %cst_154 = arith.constant 3.125000e-02 : f32
    %310 = vector.broadcast %cst_154 : f32 to vector<32x1xf32>
    %311 = arith.mulf %309, %310 : vector<32x1xf32>
    %cst_155 = arith.constant 9.99999974E-6 : f32
    %312 = vector.broadcast %cst_155 : f32 to vector<32x1xf32>
    %313 = arith.addf %311, %312 : vector<32x1xf32>
    %314 = math.rsqrt %313 : vector<32x1xf32>
    %315 = vector.broadcast %314 : vector<32x1xf32> to vector<32x128xf32>
    %316 = arith.mulf %306, %315 : vector<32x128xf32>
    %317 = vector.broadcast %294 : vector<1x128xf32> to vector<32x128xf32>
    %318 = arith.mulf %316, %317 : vector<32x128xf32>
    %319 = vector.broadcast %296 : vector<1x128xf32> to vector<32x128xf32>
    %320 = arith.addf %318, %319 : vector<32x128xf32>
    %321 = vector.shape_cast %320 : vector<32x128xf32> to vector<4x8x128xf32>
    %322 = vector.broadcast %2 : vector<4x8x1xf32> to vector<4x8x128xf32>
    %323 = arith.mulf %321, %322 : vector<4x8x128xf32>
    %cst_156 = arith.constant dense<0.000000e+00> : vector<4xf32>
    %324 = vector.multi_reduction <add>, %1, %cst_156 [1] : vector<4x8xf32> to vector<4xf32>
    %325 = vector.shape_cast %324 : vector<4xf32> to vector<4x1xf32>
    %cst_157 = arith.constant 1.000000e+00 : f32
    %326 = vector.broadcast %cst_157 : f32 to vector<4x1xf32>
    %327 = arith.maximumf %325, %326 : vector<4x1xf32>
    %328 = vector.broadcast %2 : vector<4x8x1xf32> to vector<4x8x128xf32>
    %329 = arith.mulf %323, %328 : vector<4x8x128xf32>
    %cst_158 = arith.constant dense<0.000000e+00> : vector<4x128xf32>
    %330 = vector.multi_reduction <add>, %329, %cst_158 [1] : vector<4x8x128xf32> to vector<4x128xf32>
    %331 = vector.broadcast %327 : vector<4x1xf32> to vector<4x128xf32>
    %332 = arith.divf %330, %331 : vector<4x128xf32>
    %c0_159 = arith.constant 0 : index
    %c0_160 = arith.constant 0 : index
    %c0_161 = arith.constant 0 : index
    %333 = vector.load %arg16[%c0_159, %c0_160, %c0_161] : memref<1x4x128xf32, #tpu.memory_space<vmem>>, vector<1x4x128xf32>
    %334 = vector.shape_cast %333 : vector<1x4x128xf32> to vector<4x128xf32>
    %335 = vector.shape_cast %332 : vector<4x128xf32> to vector<1x4x128xf32>
    tpu.vector_store %arg16[%c0_159, %c0_160, %c0_161], %335 {strides = array<i32>} : memref<1x4x128xf32, #tpu.memory_space<vmem>>, vector<1x4x128xf32>,
    return
  }
  func.func @transform_0(%arg0: i32) -> (i32, i32, i32, i32) {
    %c0_i32 = arith.constant 0 : i32
    %c0_i32_0 = arith.constant 0 : i32
    %c0_i32_1 = arith.constant 0 : i32
    %c0_i32_2 = arith.constant 0 : i32
    return %arg0, %c0_i32, %c0_i32_0, %c0_i32_1 : i32, i32, i32, i32
  }
  func.func @transform_1(%arg0: i32) -> (i32, i32, i32) {
    %c0_i32 = arith.constant 0 : i32
    %c0_i32_0 = arith.constant 0 : i32
    %c0_i32_1 = arith.constant 0 : i32
    return %arg0, %c0_i32, %c0_i32_0 : i32, i32, i32
  }
  func.func @transform_2(%arg0: i32) -> (i32, i32, i32) {
    %c0_i32 = arith.constant 0 : i32
    %c0_i32_0 = arith.constant 0 : i32
    %c0_i32_1 = arith.constant 0 : i32
    return %arg0, %c0_i32, %c0_i32_0 : i32, i32, i32
  }
  func.func @transform_3(%arg0: i32) -> (i32, i32, i32, i32) {
    %c0_i32 = arith.constant 0 : i32
    %c0_i32_0 = arith.constant 0 : i32
    %c0_i32_1 = arith.constant 0 : i32
    %c0_i32_2 = arith.constant 0 : i32
    return %arg0, %c0_i32, %c0_i32_0, %c0_i32_1 : i32, i32, i32, i32
  }
  func.func @transform_4(%arg0: i32) -> (i32, i32, i32, i32) {
    %c0_i32 = arith.constant 0 : i32
    %c0_i32_0 = arith.constant 0 : i32
    %c0_i32_1 = arith.constant 0 : i32
    %c0_i32_2 = arith.constant 0 : i32
    return %arg0, %c0_i32, %c0_i32_0, %c0_i32_1 : i32, i32, i32, i32
  }
  func.func @transform_5(%arg0: i32) -> (i32, i32, i32, i32) {
    %c0_i32 = arith.constant 0 : i32
    %c0_i32_0 = arith.constant 0 : i32
    %c0_i32_1 = arith.constant 0 : i32
    %c0_i32_2 = arith.constant 0 : i32
    return %arg0, %c0_i32, %c0_i32_0, %c0_i32_1 : i32, i32, i32, i32
  }
  func.func @transform_6(%arg0: i32) -> (i32, i32, i32, i32) {
    %c0_i32 = arith.constant 0 : i32
    %c0_i32_0 = arith.constant 0 : i32
    %c0_i32_1 = arith.constant 0 : i32
    %c0_i32_2 = arith.constant 0 : i32
    return %arg0, %c0_i32, %c0_i32_0, %c0_i32_1 : i32, i32, i32, i32
  }
  func.func @transform_7(%arg0: i32) -> (i32, i32, i32, i32) {
    %c0_i32 = arith.constant 0 : i32
    %c0_i32_0 = arith.constant 0 : i32
    %c0_i32_1 = arith.constant 0 : i32
    %c0_i32_2 = arith.constant 0 : i32
    return %arg0, %c0_i32, %c0_i32_0, %c0_i32_1 : i32, i32, i32, i32
  }
  func.func @transform_8(%arg0: i32) -> (i32, i32, i32, i32) {
    %c0_i32 = arith.constant 0 : i32
    %c0_i32_0 = arith.constant 0 : i32
    %c0_i32_1 = arith.constant 0 : i32
    %c0_i32_2 = arith.constant 0 : i32
    return %arg0, %c0_i32, %c0_i32_0, %c0_i32_1 : i32, i32, i32, i32
  }
  func.func @transform_9(%arg0: i32) -> (i32, i32, i32, i32) {
    %c0_i32 = arith.constant 0 : i32
    %c0_i32_0 = arith.constant 0 : i32
    %c0_i32_1 = arith.constant 0 : i32
    %c0_i32_2 = arith.constant 0 : i32
    return %arg0, %c0_i32, %c0_i32_0, %c0_i32_1 : i32, i32, i32, i32
  }
  func.func @transform_10(%arg0: i32) -> (i32, i32, i32, i32) {
    %c0_i32 = arith.constant 0 : i32
    %c0_i32_0 = arith.constant 0 : i32
    %c0_i32_1 = arith.constant 0 : i32
    %c0_i32_2 = arith.constant 0 : i32
    return %arg0, %c0_i32, %c0_i32_0, %c0_i32_1 : i32, i32, i32, i32
  }
  func.func @transform_11(%arg0: i32) -> (i32, i32, i32, i32) {
    %c0_i32 = arith.constant 0 : i32
    %c0_i32_0 = arith.constant 0 : i32
    %c0_i32_1 = arith.constant 0 : i32
    %c0_i32_2 = arith.constant 0 : i32
    return %arg0, %c0_i32, %c0_i32_0, %c0_i32_1 : i32, i32, i32, i32
  }
  func.func @transform_12(%arg0: i32) -> (i32, i32, i32, i32) {
    %c0_i32 = arith.constant 0 : i32
    %c0_i32_0 = arith.constant 0 : i32
    %c0_i32_1 = arith.constant 0 : i32
    %c0_i32_2 = arith.constant 0 : i32
    return %arg0, %c0_i32, %c0_i32_0, %c0_i32_1 : i32, i32, i32, i32
  }
  func.func @transform_13(%arg0: i32) -> (i32, i32, i32, i32) {
    %c0_i32 = arith.constant 0 : i32
    %c0_i32_0 = arith.constant 0 : i32
    %c0_i32_1 = arith.constant 0 : i32
    %c0_i32_2 = arith.constant 0 : i32
    return %arg0, %c0_i32, %c0_i32_0, %c0_i32_1 : i32, i32, i32, i32
  }
  func.func @transform_14(%arg0: i32) -> (i32, i32, i32, i32) {
    %c0_i32 = arith.constant 0 : i32
    %c0_i32_0 = arith.constant 0 : i32
    %c0_i32_1 = arith.constant 0 : i32
    %c0_i32_2 = arith.constant 0 : i32
    return %arg0, %c0_i32, %c0_i32_0, %c0_i32_1 : i32, i32, i32, i32
  }
  func.func @transform_15(%arg0: i32) -> (i32, i32, i32) {
    %c0_i32 = arith.constant 0 : i32
    %c0_i32_0 = arith.constant 0 : i32
    %c0_i32_1 = arith.constant 0 : i32
    return %arg0, %c0_i32, %c0_i32_0 : i32, i32, i32
  }
}

</mosaic_0001>

<bundles_post_ra>
// kernel: tpu_custom_call.1
= control target key start
LH: loop header
LB: loop body
LE: loop exit
PB: predicated region body
PF: predicated region fallthrough
CT: control target
= control target key end

     0   :  { %s8355_s0 = inlined_call_operand.hbm [shape: f32[2,4,8,128], index: 0, kind: input, shape index: {}]   ;;  %s8356_s1 = inlined_call_operand.hbm [shape: f32[2,4,8], index: 1, kind: input, shape index: {}]   ;;  %s8357_s2 = inlined_call_operand.hbm [shape: f32[2,8,128], index: 2, kind: input, shape index: {}]   ;;  %s8358_s3 = inlined_call_operand.hbm [shape: bf16[2,2,128,768], index: 3, kind: input, shape index: {}]   ;;  %s8359_s4 = inlined_call_operand.hbm [shape: f32[2,2,1,768], index: 4, kind: input, shape index: {}]   ;;  %s8360_s5 = inlined_call_operand.hbm [shape: bf16[2,2,256,128], index: 5, kind: input, shape index: {}]   ;;  %s8361_s6 = inlined_call_operand.vmem [shape: f32[2,2,1,128], index: 6, kind: input, shape index: {}]   ;;  %s8362_s7 = inlined_call_operand.vmem [shape: f32[2,2,1,128], index: 7, kind: input, shape index: {}]   ;;  %s8363_s8 = inlined_call_operand.vmem [shape: f32[2,2,1,128], index: 8, kind: input, shape index: {}]   ;;  %s8364_s9 = inlined_call_operand.hbm [shape: bf16[2,2,128,128], index: 9, kind: input, shape index: {}]   ;;  %s8365_s10 = inlined_call_operand.vmem [shape: f32[2,2,1,128], index: 10, kind: input, shape index: {}]   ;;  %s8366_s11 = inlined_call_operand.hbm [shape: bf16[2,2,128,128], index: 11, kind: input, shape index: {}]   ;;  %s8367_s12 = inlined_call_operand.vmem [shape: f32[2,2,1,128], index: 12, kind: input, shape index: {}]   ;;  %s8368_s13 = inlined_call_operand.hbm [shape: f32[2,2,1,128], index: 13, kind: input, shape index: {}]   ;;  %s8369_s14 = inlined_call_operand.vmem [shape: f32[2,2,1,128], index: 14, kind: input, shape index: {}]   ;;  %s8370_s15 = inlined_call_operand.hbm [shape: f32[2,4,128], index: 15, kind: output, shape index: {}]  }
   0x1   :  { %8387 = sst [smem:[#allocation30_spill]] %s8355_s0 }
   0x2   :  { %8388 = sst [smem:[#allocation31_spill]] %s8356_s1 }
   0x3   :  { %8389 = sst [smem:[#allocation32_spill]] %s8358_s3 }
   0x4   :  { %8390 = sst [smem:[#allocation33_spill]] %s8360_s5 }
   0x5   :  { %8391 = sst [smem:[#allocation34_spill]] %s8361_s6 }
   0x6   :  { %8392 = sst [smem:[#allocation35_spill]] %s8362_s7 }
   0x7   :  { %8393 = sst [smem:[#allocation36_spill]] %s8363_s8 }
   0x8   :  { %8394 = sst [smem:[#allocation37_spill]] %s8365_s10 }
   0x9   :  { %8395 = sst [smem:[#allocation38_spill]] %s8366_s11 }
   0xa   :  { %8396 = sst [smem:[#allocation39_spill]] %s8367_s12 }
   0xb   :  { %8397 = sst [smem:[#allocation40_spill]] %s8369_s14 }
   0xc   :  { %8398 = sst [smem:[#allocation41_spill]] %s8370_s15 }
   0xd   :  { %20 = vsyncpa [#allocation3], 0 }
   0xe   :  { %22 = vsyncpa [#allocation3 + $0x1], 0 }
   0xf   :  { %23 = vsyncpa [#allocation6], 0 }
  0x10   :  { %25 = vsyncpa [#allocation6 + $0x1], 0 }
  0x11   :  { %26 = vsyncpa [#allocation9], 0 }
  0x12   :  { %28 = vsyncpa [#allocation9 + $0x1], 0 }
  0x13   :  { %29 = vsyncpa [#allocation12], 0 }
  0x14   :  { %31 = vsyncpa [#allocation12 + $0x1], 0 }
  0x15   :  { %32 = vsyncpa [#allocation15], 0 }
  0x16   :  { %34 = vsyncpa [#allocation15 + $0x1], 0 }
  0x17   :  { %35 = vsyncpa [#allocation4], 0 }
  0x18   :  { %37 = vsyncpa [#allocation4 + $0x1], 0  ;;  %s7121_s18 = smov 0   ;;  %s7123_s19 = smov 0  }
  0x19   :  { %s7125_s20 = smov 0   ;;  %s7127_s21 = smov 0  }
  0x1a LB: > { %8399 = sst [smem:[#allocation24_spill]] %s7003_s18  ;;  %s7142_s22 = sadd.s32 4294967295, %s7015_s21   ;;  %s7015_s21 = sphi %s7127_s21, %s8439_s21   ;;  %s7011_s20 = sphi %s7125_s20, %s8441_s20   ;;  %s7007_s19 = sphi %s7123_s19, %s8443_s19   ;;  %s7003_s18 = sphi %s7121_s18, %s8442_s18  }
  0x1b   : > { %8400 = sst [smem:[#allocation25_spill]] %s7011_s20  ;;  %s5360_s23 = sadd.s32 4294967294, %s7015_s21  }
  0x1c   : > { %s7146_s24 = sadd.s32 1, %s7015_s21   ;;  %s50_s25 = sadd.s32 1, %s7011_s20 }
  0x1d   : > { %8401 = sst [smem:[#allocation26_spill]] %s7146_s24  ;;  %s47_s26 = ssub.s32 %s7015_s21, %s7146_s24 }
  0x1e   : > { %p57_p0 = scmp.ne.s32.totalorder %s7011_s20, %s7007_s19  ;;  %p48_p1 = scmp.eq.s32.totalorder %s47_s26, 0 }
  0x1f   : > { %p58_p2 = scmp.eq.s32.totalorder %s7015_s21, 0  ;;  %p63_p3 = scmp.ne.s32.totalorder %s7007_s19, %s7003_s18 }
  0x20   : > { %p64_p4 = scmp.eq.s32.totalorder %s7142_s22, 0  ;;  %p451_p7 = scmp.eq.s32.totalorder %s7142_s22, 1 }
  0x21   : > { %s7158_s27 = scalar_select %p48_p1, %s7011_s20, %s50_s25  }
  0x22   : > { %p59_p5 = por %p58_p2, %p57_p0  ;;  %p7160_p6 = por %p64_p4, %p63_p3 }
  0x23   : > { %8402 = sst [smem:[#allocation27_spill]] %s7158_s27  ;;  %p457_p8 = scmp.eq.s32.totalorder %s5360_s23, 1 }
  0x24   : > { %s8403_s28 = scalar_select %p7160_p6, 1, 0 }
  0x25   : > { %p6322_p10 = scmp.lt.s32.totalorder %s7015_s21, 2  ;;  %p7167_p11 = por %p451_p7, %p57_p0 }
  0x26   : > { %p7171_p12 = por %p457_p8, %p63_p3  ;;  %s7176_s16 = sand.u32 1, %s7011_s20  }
  0x27   : > { %s8404_s29 = scalar_select %p7167_p11, 1, 0 }
  0x28   : > { %s8406_s30 = scalar_select %p7171_p12, 1, 0 }
  0x29   : > { %8405 = sst [smem:[#allocation28_spill]] %s8404_s29  ;;  %p7178_p13 = pnand %p6322_p10, %p59_p5 }
  0x2a   : > { %8407 = sst [smem:[#allocation29_spill]] %s8406_s30  ;;  %s7183_s25 = sand.u32 1, %s7015_s21  }
  0x2b   : > { %s5366_s23 = sshll.u32 %s7176_s16, 2  ;;  %s5367_s26 = sshll.u32 %s7015_s21, 6 }
  0x2c   : > { %s8409_s1 = sld [smem:[#allocation31_spill]]  ;;  %s502_s20 = scalar_lea.vmem [#allocation5], %s5366_s23 }
  0x2d   : > { %s509_s30 = sshll.u32 %s502_s20, 4  ;;  %p7198_p2 = pneg %p7178_p13  ;;  %s510_s30 = int_to_ptr.vmem [resolvable:$true] %s509_s30 }
  0x32   : > { %s7190_s18 = scalar_lea.hbm %s8409_s1, %s5367_s26  ;;  %s6688_s26 = scalar_lea.hbm %s8409_s1, 128 }
  0x33   : > { %s6683_s29 = scalar_lea.hbm %s7190_s18, 64  ;;  %p6689_p5 = scmp.lt.s32.totalorder %s7190_s18, %s8409_s1 }
  0x34   : > { %p6684_p1 = scmp.ne.s32.totalorder %s7190_s18, %s6683_s29  ;;  %p6690_p7 = scmp.lt.s32.totalorder %s6688_s26, %s6683_s29 }
  0x36   : > { %p6686_p3 = pnand %p7198_p2, %p6684_p1  ;;  %p6691_p8 = por %p6690_p7, %p6689_p5 }
  0x38   : > { %p6687_p4 = pneg %p6686_p3 }
  0x3a   : > { %p6692_p10 = pnand %p6691_p8, %p6687_p4 }
  0x3c   : > { %6695 = shalt.err (!%p6692_p10)
}
  0x3d   : > { %s6696_s15 = scalar_lea.vmem %s510_s30, 64  ;;  %s7017_s12 = smov [#allocation5]  }
  0x3e   : > { %p6697_p9 = scmp.ne.s32.totalorder %s510_s30, %s6696_s15  ;;  %s6701_s10 = sshll.u32 %s7017_s12, 4  ;;  %s6702_s10 = int_to_ptr.vmem [resolvable:$false] %s6701_s10 }
  0x3f   : > { %s6703_s8 = scalar_lea.vmem %s6702_s10, 128  ;;  %p6704_p1 = scmp.lt.s32.totalorder %s510_s30, %s6702_s10 }
  0x40   : > { %p6699_p0 = pnand %p6697_p9, %p7198_p2  ;;  %p6705_p3 = scmp.lt.s32.totalorder %s6703_s8, %s6696_s15 }
  0x42   : > { %p6700_p12 = pneg %p6699_p0  ;;  %p6706_p11 = por %p6705_p3, %p6704_p1 }
  0x44   : > { %p6707_p6 = pnand %p6706_p11, %p6700_p12 }
  0x46   : > { %6710 = shalt.err (!%p6707_p6)
}
  0x47   : > { %s8411_s29 = scalar_lea.sflag [#allocation6], %s7183_s25  ;;  %p700_p9 = scmp.lt.s32.totalorder %s7015_s21, 3 }
  0x48   : > { %6296 = dma.hbm_to_vmem [thread:$0]  (!%p7178_p13), %s7190_s18, 64, %s510_s30, %s8411_s29  }
  0x49   : > { %s6264_s12 = smul.u32 768, %s7176_s16  ;;  %p8412_p0 = scmp.ge.s32.totalorder %s7015_s21, 1 }
  0x4a   : > { %s6265_s10 = smul.u32 12288, %s7015_s21  ;;  %s8414_s3 = sld [smem:[#allocation32_spill]] }
  0x4b   : > { %p7222_p4 = pnand %p8412_p0, %p700_p9  ;;  %s538_s26 = scalar_lea.vmem [#allocation8], %s6264_s12 }
  0x4c   : > { %s545_s23 = sshll.u32 %s538_s26, 4  ;;  %s8381_s18 = scalar_lea.sflag [#allocation9], %s7183_s25  ;;  %s7232_s23 = int_to_ptr.vmem [resolvable:$true] %s545_s23 }
  0x4d   : > { %s8413_s8 = scalar_select %p7222_p4, 1, 0 }
  0x50   : > { %s7230_s27 = scalar_lea.hbm %s8414_s3, %s6265_s10  ;;  %s6716_s1 = scalar_lea.hbm %s8414_s3, 24576 }
  0x51   : > { %s6711_s30 = scalar_lea.hbm %s7230_s27, 12288  ;;  %p6717_p5 = scmp.lt.s32.totalorder %s7230_s27, %s8414_s3 }
  0x52   : > { %p6712_p6 = scmp.ne.s32.totalorder %s7230_s27, %s6711_s30  ;;  %p6718_p7 = scmp.lt.s32.totalorder %s6716_s1, %s6711_s30 }
  0x54   : > { %p6714_p11 = pnand %p6712_p6, %p7198_p2  ;;  %p6719_p8 = por %p6718_p7, %p6717_p5 }
  0x56   : > { %p6715_p12 = pneg %p6714_p11 }
  0x58   : > { %p6720_p10 = pnand %p6719_p8, %p6715_p12 }
  0x5a   : > { %6723 = shalt.err (!%p6720_p10)
}
  0x5b   : > { %s6724_s12 = scalar_lea.vmem %s7232_s23, 12288  ;;  %s7018_s24 = smov [#allocation8]  }
  0x5c   : > { %p6725_p1 = scmp.ne.s32.totalorder %s7232_s23, %s6724_s12  ;;  %s6729_s26 = sshll.u32 %s7018_s24, 4  ;;  %s6730_s26 = int_to_ptr.vmem [resolvable:$false] %s6729_s26 }
  0x5d   : > { %s6731_s20 = scalar_lea.vmem %s6730_s26, 24576  ;;  %p6732_p0 = scmp.lt.s32.totalorder %s7232_s23, %s6730_s26 }
  0x5e   : > { %p6727_p3 = pnand %p6725_p1, %p7198_p2  ;;  %p6733_p6 = scmp.lt.s32.totalorder %s6731_s20, %s6724_s12 }
  0x60   : > { %p6728_p9 = pneg %p6727_p3  ;;  %p6734_p11 = por %p6733_p6, %p6732_p0 }
  0x62   : > { %p6735_p4 = pnand %p6734_p11, %p6728_p9 }
  0x64   : > { %6738 = shalt.err (!%p6735_p4)
}
  0x65   : > { %s7019_s1 = smov 384   ;;  %s7020_s30 = smov 24  }
  0x66   : > { %6302 = dma.hbm_to_vmem [thread:$0]  (!%p7178_p13), %s7230_s27, 12288, %s7232_s23, %s8381_s18, %s7019_s1, %s7019_s1, %s7020_s30  }
  0x67   : > { %s5372_s29 = sshll.u32 %s7176_s16, 8  ;;  %s5764_s15 = sshll.u32 %s7015_s21, 12 }
  0x68   : > { %s8415_s5 = sld [smem:[#allocation33_spill]]  ;;  %s580_s26 = scalar_lea.vmem [#allocation11], %s5372_s29 }
  0x69   : > { %s587_s20 = sshll.u32 %s580_s26, 4  ;;  %s8382_s3 = scalar_lea.sflag [#allocation12], %s7183_s25  ;;  %s7264_s20 = int_to_ptr.vmem [resolvable:$true] %s587_s20 }
  0x6e   : > { %s7262_s24 = scalar_lea.hbm %s8415_s5, %s5764_s15  ;;  %s6744_s1 = scalar_lea.hbm %s8415_s5, 8192 }
  0x6f   : > { %s6739_s7 = scalar_lea.hbm %s7262_s24, 4096  ;;  %p6745_p7 = scmp.lt.s32.totalorder %s7262_s24, %s8415_s5 }
  0x70   : > { %p6740_p4 = scmp.ne.s32.totalorder %s7262_s24, %s6739_s7  ;;  %p6746_p8 = scmp.lt.s32.totalorder %s6744_s1, %s6739_s7 }
  0x72   : > { %p6742_p12 = pnand %p6740_p4, %p7198_p2  ;;  %p6747_p10 = por %p6746_p8, %p6745_p7 }
  0x74   : > { %p6743_p5 = pneg %p6742_p12 }
  0x76   : > { %p6748_p1 = pnand %p6747_p10, %p6743_p5 }
  0x78   : > { %6751 = shalt.err (!%p6748_p1)
}
  0x79   : > { %s6752_s29 = scalar_lea.vmem %s7264_s20, 4096  ;;  %s7021_s10 = smov [#allocation11]  }
  0x7a   : > { %p6753_p3 = scmp.ne.s32.totalorder %s7264_s20, %s6752_s29  ;;  %s6757_s12 = sshll.u32 %s7021_s10, 4  ;;  %s6758_s12 = int_to_ptr.vmem [resolvable:$false] %s6757_s12 }
  0x7b   : > { %s6759_s26 = scalar_lea.vmem %s6758_s12, 8192  ;;  %p6760_p6 = scmp.lt.s32.totalorder %s7264_s20, %s6758_s12 }
  0x7c   : > { %p6755_p9 = pnand %p6753_p3, %p7198_p2  ;;  %p6761_p11 = scmp.lt.s32.totalorder %s6759_s26, %s6752_s29 }
  0x7e   : > { %p6756_p0 = pneg %p6755_p9  ;;  %p6762_p4 = por %p6761_p11, %p6760_p6 }
  0x80   : > { %p6763_p12 = pnand %p6762_p4, %p6756_p0 }
  0x82   : > { %6766 = shalt.err (!%p6763_p12)
}
  0x83   : > { %s8383_s7 = smov 64   ;;  %s8386_s27 = smov 4  }
  0x84   : > { %6308 = dma.hbm_to_vmem [thread:$0]  (!%p7178_p13), %s7262_s24, 4096, %s7264_s20, %s8382_s3, %s8383_s7, %s8383_s7, %s8386_s27  }
  0x85   : > { %s5375_s23 = sshll.u32 %s7176_s16, 7  ;;  %s5765_s1 = sshll.u32 %s7015_s21, 11 }
  0x86   : > { %s7297_s29 = scalar_lea.hbm %s8364_s9, %s5765_s1  ;;  %s622_s10 = scalar_lea.vmem [#allocation13], %s5375_s23 }
  0x87   : > { %s629_s12 = sshll.u32 %s622_s10, 4  ;;  %s8416_s11 = sld [smem:[#allocation38_spill]]  ;;  %s7299_s12 = int_to_ptr.vmem [resolvable:$true] %s629_s12 }
  0x88   : > { %s650_s24 = scalar_lea.vmem [#allocation14], %s5375_s23  ;;  %s8385_s3 = scalar_lea.sflag [#allocation15], %s7183_s25 }
  0x89   : > { %s657_s20 = sshll.u32 %s650_s24, 4  ;;  %s7306_s20 = int_to_ptr.vmem [resolvable:$true] %s657_s20 }
  0x8d   : > { %s7304_s5 = scalar_lea.hbm %s8416_s11, %s5765_s1  ;;  %s6772_s7 = scalar_lea.hbm %s8416_s11, 4096 }
  0x8e   : > { %s6767_s30 = scalar_lea.hbm %s7304_s5, 2048  ;;  %p6773_p10 = scmp.lt.s32.totalorder %s7304_s5, %s8416_s11 }
  0x8f   : > { %p6768_p5 = scmp.ne.s32.totalorder %s7304_s5, %s6767_s30  ;;  %p6774_p1 = scmp.lt.s32.totalorder %s6772_s7, %s6767_s30 }
  0x91   : > { %p6770_p7 = pnand %p6768_p5, %p7198_p2  ;;  %p6775_p3 = por %p6774_p1, %p6773_p10 }
  0x93   : > { %p6771_p8 = pneg %p6770_p7 }
  0x95   : > { %p6776_p9 = pnand %p6775_p3, %p6771_p8 }
  0x97   : > { %6779 = shalt.err (!%p6776_p9)
}
  0x98   : > { %s6780_s23 = scalar_lea.vmem %s7306_s20, 2048  ;;  %s7024_s26 = smov [#allocation14]  }
  0x99   : > { %p6781_p0 = scmp.ne.s32.totalorder %s7306_s20, %s6780_s23  ;;  %s6785_s24 = sshll.u32 %s7024_s26, 4  ;;  %s6786_s24 = int_to_ptr.vmem [resolvable:$false] %s6785_s24 }
  0x9a   : > { %s6787_s15 = scalar_lea.vmem %s6786_s24, 4096  ;;  %p6788_p4 = scmp.lt.s32.totalorder %s7306_s20, %s6786_s24 }
  0x9b   : > { %p6783_p6 = pnand %p6781_p0, %p7198_p2  ;;  %p6789_p12 = scmp.lt.s32.totalorder %s6787_s15, %s6780_s23 }
  0x9d   : > { %p6784_p11 = pneg %p6783_p6  ;;  %p6790_p5 = por %p6789_p12, %p6788_p4 }
  0x9f   : > { %p6791_p7 = pnand %p6790_p5, %p6784_p11 }
  0xa1   : > { %6794 = shalt.err (!%p6791_p7)
}
  0xa2   : > { %s8417_s7 = smov 64   ;;  %s5363_s30 = sshll.u32 %s7176_s16, 5 }
  0xa3   : > { %6314 = dma.hbm_to_vmem [thread:$0]  (!%p7178_p13), %s7304_s5, 2048, %s7306_s20, %s8385_s3, %s8417_s7, %s8417_s7, %s8386_s27  }
  0xa4   : > { %s5763_s10 = sshll.u32 %s7015_s21, 9  ;;  %s8418_s0 = sld [smem:[#allocation30_spill]] }
  0xa5   : > { %s481_s26 = scalar_lea.vmem [#allocation2], %s5363_s30  ;;  %s478_s15 = scalar_lea.sflag [#allocation3], %s7176_s16 }
  0xa6   : > { %s488_s24 = sshll.u32 %s481_s26, 4  ;;  %s7341_s24 = int_to_ptr.vmem [resolvable:$true] %s488_s24 }
  0xaa   : > { %s7339_s23 = scalar_lea.hbm %s8418_s0, %s5763_s10  ;;  %s6800_s3 = scalar_lea.hbm %s8418_s0, 1024 }
  0xab   : > { %s6795_s11 = scalar_lea.hbm %s7339_s23, 512  ;;  %p6801_p3 = scmp.lt.s32.totalorder %s7339_s23, %s8418_s0 }
  0xac   : > { %p6796_p8 = scmp.ne.s32.totalorder %s7339_s23, %s6795_s11  ;;  %p6802_p9 = scmp.lt.s32.totalorder %s6800_s3, %s6795_s11 }
  0xae   : > { %p6798_p10 = pnand %p6796_p8, %p7198_p2  ;;  %p6803_p0 = por %p6802_p9, %p6801_p3 }
  0xb0   : > { %p6799_p1 = pneg %p6798_p10 }
  0xb2   : > { %p6804_p6 = pnand %p6803_p0, %p6799_p1 }
  0xb4   : > { %6807 = shalt.err (!%p6804_p6)
}
  0xb5   : > { %s6808_s30 = scalar_lea.vmem %s7341_s24, 512  ;;  %s7025_s1 = smov [#allocation2]  }
  0xb6   : > { %p6809_p11 = scmp.ne.s32.totalorder %s7341_s24, %s6808_s30  ;;  %s6813_s26 = sshll.u32 %s7025_s1, 4  ;;  %s6814_s26 = int_to_ptr.vmem [resolvable:$false] %s6813_s26 }
  0xb7   : > { %s6815_s5 = scalar_lea.vmem %s6814_s26, 1024  ;;  %p6816_p5 = scmp.lt.s32.totalorder %s7341_s24, %s6814_s26 }
  0xb8   : > { %p6811_p4 = pnand %p6809_p11, %p7198_p2  ;;  %p6817_p7 = scmp.lt.s32.totalorder %s6815_s5, %s6808_s30 }
  0xba   : > { %p6812_p12 = pneg %p6811_p4  ;;  %p6818_p8 = por %p6817_p7, %p6816_p5 }
  0xbc   : > { %p6819_p10 = pnand %p6818_p8, %p6812_p12 }
  0xbe   : > { %6822 = shalt.err (!%p6819_p10)
}
  0xbf   : > { %s7026_s3 = smov 128   ;;  %s7027_s11 = smov 8  }
  0xc0   : > { %6293 = dma.hbm_to_vmem [thread:$0]  (!%p7178_p13), %s7339_s23, 512, %s7341_s24, %s478_s15, %s7026_s3, %s7026_s3, %s7027_s11  }
  0xc1   : > { %s5368_s20 = sshll.u32 %s7176_s16, 3  ;;  %s5369_s18 = sshll.u32 %s7015_s21, 7 }
  0xc2   : > { %s7371_s1 = scalar_lea.hbm %s8357_s2, %s5369_s18  ;;  %s520_s26 = scalar_lea.vmem [#allocation7], %s5368_s20 }
  0xc3   : > { %s527_s5 = sshll.u32 %s520_s26, 4  ;;  %s6266_s27 = smul.u32 12, %s7176_s16  ;;  %s528_s5 = int_to_ptr.vmem [resolvable:$true] %s527_s5 }
  0xc4   : > { %s6267_s0 = smul.u32 192, %s7015_s21  ;;  %s6823_s6 = scalar_lea.hbm %s7371_s1, 128 }
  0xc5   : > { %p6824_p1 = scmp.ne.s32.totalorder %s7371_s1, %s6823_s6  ;;  %s6828_s15 = scalar_lea.hbm %s8357_s2, 256 }
  0xc6   : > { %p6829_p0 = scmp.lt.s32.totalorder %s7371_s1, %s8357_s2  ;;  %p6830_p6 = scmp.lt.s32.totalorder %s6828_s15, %s6823_s6 }
  0xc7   : > { %p6826_p3 = pnand %p6824_p1, %p7198_p2 }
  0xc8   : > { %p6831_p11 = por %p6830_p6, %p6829_p0 }
  0xc9   : > { %p6827_p9 = pneg %p6826_p3 }
  0xcb   : > { %p6832_p4 = pnand %p6831_p11, %p6827_p9 }
  0xcd   : > { %6835 = shalt.err (!%p6832_p4)
}
  0xce   : > { %s6836_s20 = scalar_lea.vmem %s528_s5, 128  ;;  %s7028_s18 = smov [#allocation7]  }
  0xcf   : > { %p6837_p12 = scmp.ne.s32.totalorder %s528_s5, %s6836_s20  ;;  %s6841_s10 = sshll.u32 %s7028_s18, 4  ;;  %s6842_s10 = int_to_ptr.vmem [resolvable:$false] %s6841_s10 }
  0xd0   : > { %s6843_s30 = scalar_lea.vmem %s6842_s10, 256  ;;  %p6844_p8 = scmp.lt.s32.totalorder %s528_s5, %s6842_s10 }
  0xd1   : > { %p6839_p5 = pnand %p6837_p12, %p7198_p2  ;;  %p6845_p10 = scmp.lt.s32.totalorder %s6843_s30, %s6836_s20 }
  0xd3   : > { %p6840_p7 = pneg %p6839_p5  ;;  %p6846_p1 = por %p6845_p10, %p6844_p8 }
  0xd5   : > { %p6847_p3 = pnand %p6846_p1, %p6840_p7 }
  0xd7   : > { %6850 = shalt.err (!%p6847_p3)
}
  0xd8   : > { %s8419_s6 = scalar_lea.sflag [#allocation6], %s7183_s25  ;;  %s7396_s24 = scalar_lea.hbm %s8359_s4, %s6267_s0 }
  0xd9   : > { %6299 = dma.hbm_to_vmem [thread:$0]  (!%p7178_p13), %s7371_s1, 128, %s528_s5, %s8419_s6  }
  0xda   : > { %s559_s15 = scalar_lea.vmem [#allocation10], %s6266_s27  ;;  %s6851_s11 = scalar_lea.hbm %s7396_s24, 192 }
  0xdb   : > { %s566_s3 = sshll.u32 %s559_s15, 4  ;;  %p6852_p9 = scmp.ne.s32.totalorder %s7396_s24, %s6851_s11  ;;  %s7398_s3 = int_to_ptr.vmem [resolvable:$true] %s566_s3 }
  0xdc   : > { %s6856_s1 = scalar_lea.hbm %s8359_s4, 384  ;;  %p6857_p11 = scmp.lt.s32.totalorder %s7396_s24, %s8359_s4 }
  0xdd   : > { %p6854_p0 = pnand %p6852_p9, %p7198_p2  ;;  %p6858_p4 = scmp.lt.s32.totalorder %s6856_s1, %s6851_s11 }
  0xdf   : > { %p6855_p6 = pneg %p6854_p0  ;;  %p6859_p12 = por %p6858_p4, %p6857_p11 }
  0xe1   : > { %p6860_p5 = pnand %p6859_p12, %p6855_p6 }
  0xe3   : > { %6863 = shalt.err (!%p6860_p5)
}
  0xe4   : > { %s6864_s0 = scalar_lea.vmem %s7398_s3, 192  ;;  %s7029_s27 = smov [#allocation10]  }
  0xe5   : > { %p6865_p7 = scmp.ne.s32.totalorder %s7398_s3, %s6864_s0  ;;  %s6869_s30 = sshll.u32 %s7029_s27, 4  ;;  %s6870_s30 = int_to_ptr.vmem [resolvable:$false] %s6869_s30 }
  0xe6   : > { %s6871_s6 = scalar_lea.vmem %s6870_s30, 384  ;;  %p6872_p1 = scmp.lt.s32.totalorder %s7398_s3, %s6870_s30 }
  0xe7   : > { %p6867_p8 = pnand %p6865_p7, %p7198_p2  ;;  %p6873_p3 = scmp.lt.s32.totalorder %s6871_s6, %s6864_s0 }
  0xe9   : > { %p6868_p10 = pneg %p6867_p8  ;;  %p6874_p9 = por %p6873_p3, %p6872_p1 }
  0xeb   : > { %p6875_p0 = pnand %p6874_p9, %p6868_p10 }
  0xed   : > { %6878 = shalt.err (!%p6875_p0)
}
  0xee   : > { %s7030_s26 = smov 96   ;;  %s7031_s23 = smov 6  }
  0xef   : > { %s8420_s15 = scalar_lea.sflag [#allocation9], %s7183_s25  ;;  %s6879_s11 = scalar_lea.hbm %s7297_s29, 2048 }
  0xf0   : > { %6305 = dma.hbm_to_vmem [thread:$0]  (!%p7178_p13), %s7396_s24, 192, %s7398_s3, %s8420_s15, %s7030_s26, %s7030_s26, %s7031_s23  }
  0xf1   : > { %p6880_p6 = scmp.ne.s32.totalorder %s7297_s29, %s6879_s11  ;;  %s6884_s1 = scalar_lea.hbm %s8364_s9, 4096 }
  0xf2   : > { %p6885_p12 = scmp.lt.s32.totalorder %s7297_s29, %s8364_s9  ;;  %p6886_p5 = scmp.lt.s32.totalorder %s6884_s1, %s6879_s11 }
  0xf3   : > { %p6882_p11 = pnand %p6880_p6, %p7198_p2 }
  0xf4   : > { %p6887_p7 = por %p6886_p5, %p6885_p12 }
  0xf5   : > { %p6883_p4 = pneg %p6882_p11 }
  0xf7   : > { %p6888_p8 = pnand %p6887_p7, %p6883_p4 }
  0xf9   : > { %6891 = shalt.err (!%p6888_p8)
}
  0xfa   : > { %s6892_s24 = scalar_lea.vmem %s7299_s12, 2048  ;;  %s7032_s3 = smov [#allocation13]  }
  0xfb   : > { %p6893_p10 = scmp.ne.s32.totalorder %s7299_s12, %s6892_s24  ;;  %s6897_s0 = sshll.u32 %s7032_s3, 4  ;;  %s6898_s0 = int_to_ptr.vmem [resolvable:$false] %s6897_s0 }
  0xfc   : > { %s6899_s27 = scalar_lea.vmem %s6898_s0, 4096  ;;  %p6900_p9 = scmp.lt.s32.totalorder %s7299_s12, %s6898_s0 }
  0xfd   : > { %p6895_p1 = pnand %p6893_p10, %p7198_p2  ;;  %p6901_p0 = scmp.lt.s32.totalorder %s6899_s27, %s6892_s24 }
  0xff   : > { %p6896_p3 = pneg %p6895_p1  ;;  %p6902_p6 = por %p6901_p0, %p6900_p9 }
 0x101   : > { %p6903_p11 = pnand %p6902_p6, %p6896_p3 }
 0x103   : > { %6906 = shalt.err (!%p6903_p11)
}
 0x104   : > { %s8421_s30 = smov 4   ;;  %s8422_s6 = scalar_lea.sflag [#allocation12], %s7183_s25 }
 0x105   : > { %6311 = dma.hbm_to_vmem [thread:$0]  (!%p7178_p13), %s7297_s29, 2048, %s7299_s12, %s8422_s6, %s8417_s7, %s8417_s7, %s8421_s30  }
 0x106   : > { %s5381_s26 = sshll.u32 %s7176_s16, 1  ;;  %s5767_s23 = sshll.u32 %s7015_s21, 5 }
 0x107   : > { %s7452_s20 = scalar_lea.hbm %s8368_s13, %s5767_s23  ;;  %s678_s18 = scalar_lea.vmem [#allocation16], %s5381_s26 }
 0x108   : > { %s685_s1 = sshll.u32 %s678_s18, 4  ;;  %s6907_s5 = scalar_lea.hbm %s7452_s20, 32  ;;  %s7454_s1 = int_to_ptr.vmem [resolvable:$true] %s685_s1 }
 0x109   : > { %p6908_p4 = scmp.ne.s32.totalorder %s7452_s20, %s6907_s5  ;;  %s6912_s12 = scalar_lea.hbm %s8368_s13, 64 }
 0x10a   : > { %p6913_p7 = scmp.lt.s32.totalorder %s7452_s20, %s8368_s13  ;;  %p6914_p8 = scmp.lt.s32.totalorder %s6912_s12, %s6907_s5 }
 0x10b   : > { %p6910_p12 = pnand %p6908_p4, %p7198_p2 }
 0x10c   : > { %p6915_p10 = por %p6914_p8, %p6913_p7 }
 0x10d   : > { %p6911_p5 = pneg %p6910_p12 }
 0x10f   : > { %p6916_p1 = pnand %p6915_p10, %p6911_p5 }
 0x111   : > { %6919 = shalt.err (!%p6916_p1)
}
 0x112   : > { %s6920_s24 = scalar_lea.vmem %s7454_s1, 32  ;;  %s7033_s3 = smov [#allocation16]  }
 0x113   : > { %p6921_p3 = scmp.ne.s32.totalorder %s7454_s1, %s6920_s24  ;;  %s6925_s0 = sshll.u32 %s7033_s3, 4  ;;  %s6926_s0 = int_to_ptr.vmem [resolvable:$false] %s6925_s0 }
 0x114   : > { %s6927_s27 = scalar_lea.vmem %s6926_s0, 64  ;;  %p6928_p6 = scmp.lt.s32.totalorder %s7454_s1, %s6926_s0 }
 0x115   : > { %p6923_p9 = pnand %p6921_p3, %p7198_p2  ;;  %p6929_p11 = scmp.lt.s32.totalorder %s6927_s27, %s6920_s24 }
 0x117   : > { %p6924_p0 = pneg %p6923_p9  ;;  %p6930_p4 = por %p6929_p11, %p6928_p6 }
 0x119   : > { %p6931_p12 = pnand %p6930_p4, %p6924_p0 }
 0x11b   : > { %6934 = shalt.err (!%p6931_p12)
}
 0x11c   : > { %s7034_s30 = smov 16   ;;  %s7035_s6 = smov 1  }
 0x11d   : > { %s8423_s26 = scalar_lea.sflag [#allocation15], %s7183_s25  ;;  %p8424_p2 = scmp.ne.s32.totalorder %s8413_s8, 0 }
 0x11e   : > { %6317 = dma.hbm_to_vmem [thread:$0]  (!%p7178_p13), %s7452_s20, 32, %s7454_s1, %s8423_s26, %s7034_s30, %s7034_s30, %s7035_s6  }
 0x11f   : > { %704 = sbr.rel (%p8424_p2) target bundleno = 5869 (0x16ed), region = 80  ;;  %s7481_s14 = sand.u32 (!%p8424_p2), 1, %s7007_s19  }
 0x120   : > { %s5385_s23 = sshll.u32 (!%p8424_p2), %s7481_s14, 5  ;;  %s707_s15 = scalar_lea.sflag (!%p8424_p2), [#allocation3], %s7481_s14 }
 0x121   : > { %s7485_s11 = scalar_lea.vmem (!%p8424_p2), [#allocation2], %s5385_s23  ;;  %p8425_p5 = scmp.ne.s32.totalorder (!%p8424_p2), %s8403_s28, 0 }
 0x124   : > { %6978 = dma.done.wait (%p8425_p5), %s707_s15, 512  }
 0x125   : > { %6980 = vsyncadd (%p8425_p5), %s707_s15, 4294966784  ;;  %s715_s17 = sand.u32 1, %s7142_s22   ;;  %s5386_s25 = sshll.u32 %s7481_s14, 2 }
 0x126   : > { %s716_s8 = scalar_lea.sflag [#allocation6], %s715_s17  ;;  %s7495_s20 = scalar_lea.vmem [#allocation5], %s5386_s25 }
 0x127   : > { %6982 = dma.done.wait (%p8425_p5), %s716_s8, 192  }
 0x128   : > { %6984 = vsyncadd (%p8425_p5), %s716_s8, 4294967104  ;;  %s5387_s18 = sshll.u32 %s7481_s14, 3  ;;  %s6268_s1 = smul.u32 768, %s7481_s14 }
 0x129   : > { %s7503_s5 = scalar_lea.vmem [#allocation7], %s5387_s18  ;;  %s734_s29 = scalar_lea.sflag [#allocation9], %s715_s17 }
 0x12a   : > { %s7505_s16 = scalar_lea.vmem [#allocation8], %s6268_s1 }
 0x12b   : > { %6986 = dma.done.wait (%p8425_p5), %s734_s29, 12480  }
 0x12c   : > { %6988 = vsyncadd (%p8425_p5), %s734_s29, 4294954816  ;;  %s6269_s12 = smul.u32 12, %s7481_s14  ;;  %s5388_s7 = sshll.u32 %s7481_s14, 8 }
 0x12d   : > { %s752_s24 = scalar_lea.sflag [#allocation12], %s715_s17  ;;  %s7515_s3 = scalar_lea.vmem [#allocation11], %s5388_s7 }
 0x12e   : > { %s7513_s10 = scalar_lea.vmem [#allocation10], %s6269_s12 }
 0x12f   : > { %6990 = dma.done.wait (%p8425_p5), %s752_s24, 6144  }
 0x130   : > { %6992 = vsyncadd (%p8425_p5), %s752_s24, 4294961152  ;;  %s5389_s0 = sshll.u32 %s7481_s14, 7  ;;  %s770_s30 = scalar_lea.sflag [#allocation15], %s715_s17 }
 0x131   : > { %s7522_s27 = scalar_lea.vmem [#allocation13], %s5389_s0  ;;  %s7524_s6 = scalar_lea.vmem [#allocation14], %s5389_s0 }
 0x132   : > { %6994 = dma.done.wait (%p8425_p5), %s770_s30, 2080  }
 0x133   : > { %6996 = vsyncadd (%p8425_p5), %s770_s30, 4294965216  ;;  %v919_v0 = vlaneseq  ;;  %v7036_v1 = vmov 0   ;;  %v7548_v7 = vld [vmem:[%s7495_s20] sm:$0xf]  ;;  %v6372_v11 = vld [vmem:[%s7505_s16 + $0x15c] ss:$24 sps:$4 sm:$0xff]  }
 0x134   : > { %1350 = vmatprep.mubr.bf16.mxu0 %v7036_v1  ;;  %1403 = vmatprep.mubr.bf16.mxu1 %v7036_v1  ;;  %v6370_v10 = vld [vmem:[%s7505_s16 + $0x154] ss:$24 sps:$4 sm:$0xff]   ;;  %v6374_v12 = vld [vmem:[%s7505_s16 + $0x150] ss:$24 sps:$4 sm:$0xff]   ;;  %v6376_v16 = vld [vmem:[%s7505_s16 + $0x124] ss:$24 sps:$4 sm:$0xff]  }
 0x135   : > { %v7533_v2 = vshrl.u32 %v919_v0, 7  ;;  %v6375_v13 = vld [vmem:[%s7505_s16 + $0x158] ss:$24 sps:$4 sm:$0xff]   ;;  %1318 = vmatprep.subr.bf16.mxu0 %v6370_v10  ;;  %1371 = vmatprep.subr.bf16.mxu1 %v6372_v11  ;;  %v6378_v17 = vld [vmem:[%s7505_s16 + $0x12c] ss:$24 sps:$4 sm:$0xff]   ;;  %vm7038_vm0 = vmmov 0  }
 0x136   : > { %1319 = vmatpush1.bf16.msra.mxu0 %v6374_v12  ;;  %1372 = vmatpush1.bf16.msra.mxu1 %v6375_v13  ;;  %v6380_v18 = vld [vmem:[%s7505_s16 + $0x120] ss:$24 sps:$4 sm:$0xff]   ;;  %v6382_v20 = vld [vmem:[%s7505_s16 + $0xf4] ss:$24 sps:$4 sm:$0xff]   ;;  %v6386_v22 = vld [vmem:[%s7505_s16 + $0xf0] ss:$24 sps:$4 sm:$0xff]  }
 0x137   : > { %v7536_v3 = vsub.s32 0, %v7533_v2  ;;  %v7539_v4 = vsub.s32 2, %v7533_v2  ;;  %v7542_v5 = vsub.s32 1, %v7533_v2  ;;  %v7545_v6 = vsub.s32 3, %v7533_v2  ;;  %v6381_v19 = vld [vmem:[%s7505_s16 + $0x128] ss:$24 sps:$4 sm:$0xff]   ;;  %1320 = vmatprep.subr.bf16.mxu0 %v6376_v16  ;;  %1373 = vmatprep.subr.bf16.mxu1 %v6378_v17 }
 0x138   : > { %v6384_v21 = vld [vmem:[%s7505_s16 + $0xfc] ss:$24 sps:$4 sm:$0xff]   ;;  %v6387_v23 = vld [vmem:[%s7505_s16 + $0xf8] ss:$24 sps:$4 sm:$0xff]   ;;  %v6390_v25 = vld [vmem:[%s7505_s16 + $0xcc] ss:$24 sps:$4 sm:$0xff]  }
 0x139   : > { %v922_v8 = vrot.slane %v7548_v7, %v7536_v3  ;;  %v936_v9 = vrot.slane %v7548_v7, %v7539_v4  ;;  %v929_v14 = vrot.slane %v7548_v7, %v7542_v5  ;;  %v943_v15 = vrot.slane %v7548_v7, %v7545_v6  ;;  %v6388_v24 = vld [vmem:[%s7505_s16 + $0xc4] ss:$24 sps:$4 sm:$0xff]   ;;  %v6392_v26 = vld [vmem:[%s7505_s16 + $0xc0] ss:$24 sps:$4 sm:$0xff]   ;;  %v6394_v28 = vld [vmem:[%s7505_s16 + $0x94] ss:$24 sps:$4 sm:$0xff]  }
 0x13a   : > { %1321 = vmatpush1.bf16.msra.mxu0 %v6380_v18  ;;  %1374 = vmatpush1.bf16.msra.mxu1 %v6381_v19  ;;  %v6393_v27 = vld [vmem:[%s7505_s16 + $0xc8] ss:$24 sps:$4 sm:$0xff]   ;;  %v6396_v29 = vld [vmem:[%s7505_s16 + $0x9c] ss:$24 sps:$4 sm:$0xff]   ;;  %v6399_v31 = vld [vmem:[%s7505_s16 + $0x98] ss:$24 sps:$4 sm:$0xff]  }
 0x13b   : > { %924 = vbcast.lane.b32.xlu0 %v922_v8, 256  ;;  %938 = vbcast.lane.b32.xlu1 %v936_v9, 256  ;;  %v6398_v30 = vld [vmem:[%s7505_s16 + $0x90] ss:$24 sps:$4 sm:$0xff]   ;;  %v6400_v32 = vld [vmem:[%s7505_s16 + $0x64] ss:$24 sps:$4 sm:$0xff]  }
 0x13c   : > { %1322 = vmatprep.subr.bf16.mxu0 %v6382_v20  ;;  %1375 = vmatprep.subr.bf16.mxu1 %v6384_v21  ;;  %v6402_v33 = vld [vmem:[%s7505_s16 + $0x6c] ss:$24 sps:$4 sm:$0xff]   ;;  %v6404_v34 = vld [vmem:[%s7505_s16 + $0x60] ss:$24 sps:$4 sm:$0xff]   ;;  %v6408_v37 = vld [vmem:[%s7505_s16 + $0x3c] ss:$24 sps:$4 sm:$0xff]  }
 0x13d   : > { %v6405_v35 = vld [vmem:[%s7505_s16 + $0x68] ss:$24 sps:$4 sm:$0xff]   ;;  %v6406_v36 = vld [vmem:[%s7505_s16 + $0x34] ss:$24 sps:$4 sm:$0xff]   ;;  %v6411_v39 = vld [vmem:[%s7505_s16 + $0x38] ss:$24 sps:$4 sm:$0xff]  }
 0x13e   : > { %1323 = vmatpush1.bf16.msra.mxu0 %v6386_v22  ;;  %1376 = vmatpush1.bf16.msra.mxu1 %v6387_v23  ;;  %v6410_v38 = vld [vmem:[%s7505_s16 + $0x30] ss:$24 sps:$4 sm:$0xff]   ;;  %v6412_v40 = vld [vmem:[%s7505_s16 + $0x4] ss:$24 sps:$4 sm:$0xff]   ;;  %v6416_v42 = vld [vmem:[%s7505_s16] ss:$24 sps:$4 sm:$0xff]  }
 0x13f   : > { %931 = vbcast.lane.b32.xlu0 %v929_v14, 256  ;;  %945 = vbcast.lane.b32.xlu1 %v943_v15, 256  ;;  %v6414_v41 = vld [vmem:[%s7505_s16 + $0xc] ss:$24 sps:$4 sm:$0xff]   ;;  %v6417_v43 = vld [vmem:[%s7505_s16 + $0x8] ss:$24 sps:$4 sm:$0xff]  }
 0x140   : > { %1324 = vmatprep.subr.bf16.mxu0 %v6388_v24  ;;  %1377 = vmatprep.subr.bf16.mxu1 %v6390_v25  ;;  %v6420_v44 = vld [vmem:[%s7505_s16 + $0x164] ss:$24 sps:$4 sm:$0xff]   ;;  %v979_v45 = vld [vmem:[%s7485_s11] sm:$0xff]  ;;  %v980_v46 = vld [vmem:[%s7485_s11 + $0x8] sm:$0xff]  ;;  %vm1767_vm1 = vcmask 1043456   ;;  %vm1715_vm2 = vcmask 64512  }
 0x141   : > { %v983_v47 = vmul.f32 5.656854, %v979_v45  ;;  %v984_v48 = vmul.f32 5.656854, %v980_v46  ;;  %v987_v49 = vld [vmem:[%s7503_s5] sm:$0xff]  ;;  %v982_v51 = vld [vmem:[%s7485_s11 + $0x18] sm:$0xff] }
 0x142   : > { %1325 = vmatpush1.bf16.msra.mxu0 %v6392_v26  ;;  %1378 = vmatpush1.bf16.msra.mxu1 %v6393_v27  ;;  %v981_v50 = vld [vmem:[%s7485_s11 + $0x10] sm:$0xff]  ;;  %v986_v57 = vmul.f32 5.656854, %v982_v51  ;;  %v6423_v10 = vld [vmem:[%s7505_s16 + $0x134] ss:$24 sps:$4 sm:$0xff]   ;;  %v7037_v27 = vmov 0.0  }
 0x143   : > { %1326 = vmatprep.subr.bf16.mxu0 %v6394_v28  ;;  %1379 = vmatprep.subr.bf16.mxu1 %v6396_v29  ;;  %v988_v54 = vadd.f32 %v987_v49, %v983_v47  ;;  %v989_v55 = vadd.f32 %v987_v49, %v984_v48  ;;  %v985_v56 = vmul.f32 5.656854, %v981_v50  ;;  %v6418_v63 = vld [vmem:[%s7505_s16 + $0x160] ss:$24 sps:$4 sm:$0xff]   ;;  %v6421_v13 = vld [vmem:[%s7505_s16 + $0x130] ss:$24 sps:$4 sm:$0xff]  }
 0x144   : > { %v991_v62 = vadd.f32 %v987_v49, %v986_v57  ;;  %v6426_v14 = vld [vmem:[%s7505_s16 + $0x104] ss:$24 sps:$4 sm:$0xff]   ;;  %v6424_v16 = vld [vmem:[%s7505_s16 + $0x100] ss:$24 sps:$4 sm:$0xff]   ;;  %v6429_v17 = vld [vmem:[%s7505_s16 + $0xd4] ss:$24 sps:$4 sm:$0xff]  }
 0x145   : > { %v990_v61 = vadd.f32 %v987_v49, %v985_v56  ;;  %v6427_v18 = vld [vmem:[%s7505_s16 + $0xd0] ss:$24 sps:$4 sm:$0xff]   ;;  %v6432_v19 = vld [vmem:[%s7505_s16 + $0xa4] ss:$24 sps:$4 sm:$0xff]   ;;  %v6430_v20 = vld [vmem:[%s7505_s16 + $0xa0] ss:$24 sps:$4 sm:$0xff]  }
 0x146   : > { %1327 = vmatpush1.bf16.msra.mxu0 %v6398_v30  ;;  %1380 = vmatpush1.bf16.msra.mxu1 %v6399_v31  ;;  %v6435_v21 = vld [vmem:[%s7505_s16 + $0x74] ss:$24 sps:$4 sm:$0xff]   ;;  %v6433_v22 = vld [vmem:[%s7505_s16 + $0x70] ss:$24 sps:$4 sm:$0xff]   ;;  %v6438_v23 = vld [vmem:[%s7505_s16 + $0x44] ss:$24 sps:$4 sm:$0xff]  }
 0x147   : > { %1328 = vmatprep.subr.bf16.mxu0 %v6400_v32  ;;  %1381 = vmatprep.subr.bf16.mxu1 %v6402_v33  ;;  %v6436_v24 = vld [vmem:[%s7505_s16 + $0x40] ss:$24 sps:$4 sm:$0xff]   ;;  %v6441_v25 = vld [vmem:[%s7505_s16 + $0x14] ss:$24 sps:$4 sm:$0xff]   ;;  %v6439_v26 = vld [vmem:[%s7505_s16 + $0x10] ss:$24 sps:$4 sm:$0xff]  }
 0x148   : > { %v7646_v28 = vld [vmem:[%s7513_s10] sm:$0x3f]  ;;  %p893_p13 = scmp.lt.s32.totalorder %s7142_s22, 1  ;;  %s8426_s11 = sld [smem:[#allocation34_spill]]  ;;  %vm4968_vm4 = vcmask 60416   ;;  %vm5022_vm5 = vcmask 1041409  }
 0x149   : > { %v1059_v29 = vrot.slane %v7646_v28, %v7539_v4  ;;  %v1051_v32 = vrot.slane %v7646_v28, %v7536_v3  ;;  %s8427_s1 = sld [smem:[#allocation35_spill]]  ;;  %vm5025_vm6 = vcmask 1042434   ;;  %vm5028_vm7 = vcmask 1043459  }
 0x14a   : > { %1329 = vmatpush1.bf16.msra.mxu0 %v6404_v34  ;;  %1382 = vmatpush1.bf16.msra.mxu1 %v6405_v35  ;;  %s894_s28 = scalar_select %p893_p13, %s7142_s22, 1 }
 0x14b   : > { %1330 = vmatprep.subr.bf16.mxu0 %v6406_v36  ;;  %1383 = vmatprep.subr.bf16.mxu1 %v6408_v37  ;;  %s8428_s7 = sld [smem:[#allocation36_spill]] }
 0x14c   : > { %s7844_s26 = sshll.u32 %s894_s28, 1  ;;  %s8429_s28 = sld [smem:[#allocation37_spill]] }
 0x14d   : > { %s8430_s8 = sld [smem:[#allocation39_spill]] }
 0x14e   : > { %1331 = vmatpush1.bf16.msra.mxu0 %v6410_v38  ;;  %1384 = vmatpush1.bf16.msra.mxu1 %v6411_v39  ;;  %s7851_s17 = scalar_lea.vmem %s8426_s11, %s7844_s26  ;;  %s8431_s0 = sld [smem:[#allocation40_spill]] }
 0x14f   : > { %1332 = vmatprep.subr.bf16.mxu0 %v6412_v40  ;;  %1385 = vmatprep.subr.bf16.mxu1 %v6414_v41  ;;  %s7902_s5 = scalar_lea.vmem %s8427_s1, %s7844_s26  ;;  %s5391_s1 = sshll.u32 %s7481_s14, 1 }
 0x150   : > { %s7998_s29 = scalar_lea.vmem [#allocation16], %s5391_s1 }
 0x151   : > { %s7909_s24 = scalar_lea.vmem %s8428_s7, %s7844_s26 }
 0x152   : > { %1333 = vmatpush1.bf16.msra.mxu0 %v6416_v42  ;;  %1386 = vmatpush1.bf16.msra.mxu1 %v6417_v43  ;;  %s7928_s23 = scalar_lea.vmem %s8429_s28, %s7844_s26 }
 0x153   : > { %1424 = vmatprep.subr.bf16.mxu0 %v6420_v44  ;;  %6248 = vmatprep.subr.bf16.mxu1 %v6420_v44  ;;  %s7936_s18 = scalar_lea.vmem %s8430_s8, %s7844_s26 }
 0x154   : > { %s8005_s30 = scalar_lea.vmem %s8431_s0, %s7844_s26  ;;  %s8433_s26 = sld [smem:[#allocation41_spill]] }
 0x1ad   : > { %v7596_v52 = vpop.permute.xlu0 %924  ;;  %v7598_v53 = vpop.permute.xlu1 %938 }
 0x1ae   : > { %v7603_v59 = vmul.f32 %v988_v54, %v7596_v52  ;;  %v7615_v11 = vmul.f32 %v990_v61, %v7598_v53  ;;  %v1066_v61 = vsub.s32 4, %v7533_v2 }
 0x1b1   : > { %v7600_v58 = vpop.permute.xlu0 %931  ;;  %v7609_v8 = vpop.permute.xlu1 %945 }
 0x1b2   : > { %v7606_v60 = vmul.f32 %v989_v55, %v7600_v58  ;;  %v7618_v12 = vmul.f32 %v991_v62, %v7609_v8 }
 0x1b4   : > { %v996_v9 = vpack.c.bf16 %v7606_v60, %v7603_v59  ;;  %v997_v15 = vpack.c.bf16 %v7618_v12, %v7615_v11 }
 0x1b6   : > { %1351 = vmatmul.mubr.bf16.vlgmr.msra.gmra.mxu0 %v996_v9  ;;  %1404 = vmatmul.mubr.bf16.vlgmr.msra.gmra.mxu1 %v996_v9 }
 0x1b7   : > { %1425 = vmatpush1.bf16.msra.mxu0 %v6418_v63  ;;  %6256 = vmatpush1.bf16.msra.mxu1 %v6418_v63 }
 0x1b8   : > { %1426 = vmatprep.subr.bf16.mxu0 %v6423_v10  ;;  %6249 = vmatprep.subr.bf16.mxu1 %v6423_v10  ;;  %v1070_v10 = vsub.s32 5, %v7533_v2 }
 0x1b9   : > { %1360 = vmatprep.mubr.bf16.mxu0 %v7036_v1  ;;  %1413 = vmatprep.mubr.bf16.mxu1 %v7036_v1 }
 0x1bb   : > { %1427 = vmatpush1.bf16.msra.mxu0 %v6421_v13  ;;  %6257 = vmatpush1.bf16.msra.mxu1 %v6421_v13  ;;  %v1067_v13 = vrot.slane %v7646_v28, %v1066_v61 }
 0x1bc   : > { %1428 = vmatprep.subr.bf16.mxu0 %v6426_v14  ;;  %6250 = vmatprep.subr.bf16.mxu1 %v6426_v14 }
 0x1be   : > { %1361 = vmatmul.mubr.bf16.gmra.mxu0 %v997_v15  ;;  %1414 = vmatmul.mubr.bf16.gmra.mxu1 %v997_v15 }
 0x1bf   : > { %1429 = vmatpush1.bf16.msra.mxu0 %v6424_v16  ;;  %6258 = vmatpush1.bf16.msra.mxu1 %v6424_v16 }
 0x1c0   : > { %1430 = vmatprep.subr.bf16.mxu0 %v6429_v17  ;;  %6251 = vmatprep.subr.bf16.mxu1 %v6429_v17  ;;  %v7686_v17 = vrot.slane %v7646_v28, %v1070_v10 }
 0x1c1   : > { %1456 = vmatprep.mubr.bf16.mxu0 %v7036_v1  ;;  %1466 = vmatprep.mubr.bf16.mxu1 %v7036_v1 }
 0x1c3   : > { %1431 = vmatpush1.bf16.msra.mxu0 %v6427_v18  ;;  %6259 = vmatpush1.bf16.msra.mxu1 %v6427_v18 }
 0x1c4   : > { %1432 = vmatprep.subr.bf16.mxu0 %v6432_v19  ;;  %6252 = vmatprep.subr.bf16.mxu1 %v6432_v19 }
 0x1c7   : > { %1433 = vmatpush1.bf16.msra.mxu0 %v6430_v20  ;;  %6260 = vmatpush1.bf16.msra.mxu1 %v6430_v20 }
 0x1c8   : > { %1434 = vmatprep.subr.bf16.mxu0 %v6435_v21  ;;  %6253 = vmatprep.subr.bf16.mxu1 %v6435_v21 }
 0x1cb   : > { %1435 = vmatpush1.bf16.msra.mxu0 %v6433_v22  ;;  %6261 = vmatpush1.bf16.msra.mxu1 %v6433_v22 }
 0x1cc   : > { %1436 = vmatprep.subr.bf16.mxu0 %v6438_v23  ;;  %6254 = vmatprep.subr.bf16.mxu1 %v6438_v23 }
 0x1cf   : > { %1437 = vmatpush1.bf16.msra.mxu0 %v6436_v24  ;;  %6262 = vmatpush1.bf16.msra.mxu1 %v6436_v24 }
 0x1d0   : > { %1438 = vmatprep.subr.bf16.mxu0 %v6441_v25  ;;  %6255 = vmatprep.subr.bf16.mxu1 %v6441_v25 }
 0x1d3   : > { %1439 = vmatpush1.bf16.msra.mxu0 %v6439_v26  ;;  %6263 = vmatpush1.bf16.msra.mxu1 %v6439_v26 }
 0x1d4   : > { %5976 = vmatprep.subr.bf16.mxu1 %v7037_v27  ;;  %6000 = vmatprep.subr.bf16.mxu0 %v7037_v27 }
 0x1d6   : > { %1457 = vmatmul.mubr.bf16.vlgmr.msra.gmra.mxu0 %v996_v9  ;;  %1467 = vmatmul.mubr.bf16.vlgmr.msra.gmra.mxu1 %v997_v15 }
 0x1d7   : > { %5978 = vmatprep.mubr.msk.bf16.mxu1 %vm7038_vm0, %v7037_v27  ;;  %6002 = vmatprep.mubr.msk.bf16.mxu0 %vm7038_vm0, %v7037_v27 }
 0x276   : > { %v1405_v30 = vpop.f32.mrf.mxu1  ;;  %v1352_v33 = vpop.f32.mrf.mxu0 }
 0x277   : > { %v1406_v31 = vadd.f32 %v1405_v30, %v1059_v29  ;;  %v1353_v37 = vadd.f32 %v1352_v33, %v1051_v32 }
 0x278   : > { %v7652_v34 = vpop.f32.mrf.mxu1  ;;  %v7654_v38 = vpop.f32.mrf.mxu0 }
 0x279   : > { %v5772_v35 = vpack.c.bf16 %v1406_v31, %v1406_v31  ;;  %v5768_v41 = vpack.c.bf16 %v1353_v37, %v1353_v37  ;;  %v7039_v37 = vmov 1966171168  }
 0x27a   : > { %v1409_v36 = vpop.f32.mrf.mxu1  ;;  %v1356_v42 = vpop.f32.mrf.mxu0 }
 0x27b   : > { %5977 = vmatpush3.bf16.xpose.msra.mxu1 %v5772_v35  ;;  %v1410_v39 = vadd.f32 %v1409_v36, %v1059_v29  ;;  %v1357_v45 = vadd.f32 %v1356_v42, %v1051_v32 }
 0x27c   : > { %5982 = vmatprep.subr.bf16.mxu1 %v7037_v27  ;;  %v7657_v40 = vpop.f32.mrf.mxu1  ;;  %v7659_v46 = vpop.f32.mrf.mxu0 }
 0x27d   : > { %v5773_v43 = vpack.c.bf16 %v1410_v39, %v1410_v39  ;;  %v5769_v49 = vpack.c.bf16 %v1357_v45, %v1357_v45  ;;  %v951_v39 = vunpack.c.l.s4 %v7039_v37 }
 0x27e   : > { %v1415_v44 = vpop.f32.mrf.mxu1  ;;  %v1362_v50 = vpop.f32.mrf.mxu0 }
 0x27f   : > { %v1416_v47 = vadd.f32 %v1415_v44, %v1059_v29  ;;  %v1363_v55 = vadd.f32 %v1362_v50, %v1051_v32  ;;  %v952_v42 = vunpack.c.0.s8 %v951_v39 }
 0x280   : > { %v7664_v48 = vpop.f32.mrf.mxu1  ;;  %v7668_v56 = vpop.f32.mrf.mxu0 }
 0x281   : > { %v5774_v51 = vpack.c.bf16 %v1416_v47, %v1416_v47  ;;  %v5770_v62 = vpack.c.bf16 %v1363_v55, %v1363_v55  ;;  %v955_v44 = vsub.s32 %v952_v42, %v7533_v2 }
 0x282   : > { %5979 = vmatmul.mubr.bf16.vlgmr.msra.gmra.mxu1 %v5768_v41  ;;  %v1419_v54 = vpop.f32.mrf.mxu1  ;;  %v1366_v63 = vpop.f32.mrf.mxu0  ;;  %v5399_v41 = vadd.f32 -1.0, %v7548_v7 }
 0x283   : > { %5983 = vmatpush3.bf16.xpose.msra.mxu1 %v5773_v43  ;;  %5984 = vmatprep.mubr.msk.bf16.mxu1 %vm7038_vm0, %v7037_v27  ;;  %v1420_v57 = vadd.f32 %v1419_v54, %v1059_v29  ;;  %v1367_v14 = vadd.f32 %v1366_v63, %v1051_v32 }
 0x284   : > { %5988 = vmatprep.subr.bf16.mxu1 %v7037_v27  ;;  %v7678_v15 = vpop.f32.mrf.mxu0  ;;  %v7680_v16 = vpop.f32.mrf.mxu1  ;;  %v948_v43 = vmul.f32 1e+30, %v5399_v41 }
 0x285   : > { %v5775_v9 = vpack.c.bf16 %v1420_v57, %v1420_v57  ;;  %v5771_v22 = vpack.c.bf16 %v1367_v14, %v1367_v14 }
 0x286   : > { %v956_v45 = vrot.slane %v948_v43, %v955_v44 }
 0x288   : > { %v964_v47 = vrot.slane %v956_v45, %v955_v44 }
 0x28a   : > { %5985 = vmatmul.mubr.bf16.vlgmr.msra.gmra.mxu1 %v5769_v49  ;;  %v7708_v50 = vrot.slane %v964_v47, %v7536_v3 }
 0x28b   : > { %5989 = vmatpush3.bf16.xpose.msra.mxu1 %v5774_v51  ;;  %5990 = vmatprep.mubr.msk.bf16.mxu1 %vm7038_vm0, %v7037_v27  ;;  %v957_v51 = vcombine.high %v956_v45, %v956_v45 }
 0x28c   : > { %5994 = vmatprep.subr.bf16.mxu1 %v7037_v27 }
 0x28d   : > { %v971_v63 = vrot.slane %v957_v51, %v955_v44 }
 0x28f   : > { %v7713_v14 = vrot.slane %v971_v63, %v7536_v3  ;;  %v973_v39 = vcombine.high %v971_v63, %v971_v63 }
 0x291   : > { %v7723_v44 = vrot.slane %v973_v39, %v7536_v3 }
 0x292   : > { %5991 = vmatmul.mubr.bf16.vlgmr.msra.gmra.mxu1 %v5770_v62 }
 0x293   : > { %5995 = vmatpush3.bf16.xpose.msra.mxu1 %v5775_v9  ;;  %5996 = vmatprep.mubr.msk.bf16.mxu1 %vm7038_vm0, %v7037_v27 }
 0x294   : > { %6006 = vmatprep.subr.bf16.mxu1 %v7037_v27 }
 0x296   : > { %v1458_v18 = vpop.f32.mrf.mxu0  ;;  %v1468_v19 = vpop.f32.mrf.mxu1 }
 0x297   : > { %v1459_v20 = vadd.f32 %v1458_v18, %v1067_v13  ;;  %v7688_v21 = vadd.f32 %v1468_v19, %v1067_v13 }
 0x298   : > { %v7690_v23 = vpop.f32.mrf.mxu0  ;;  %v1470_v24 = vpop.f32.mrf.mxu1 }
 0x299   : > { %v5776_v25 = vpack.c.bf16 %v1459_v20, %v1459_v20  ;;  %v7693_v26 = vadd.f32 %v1470_v24, %v7686_v17  ;;  %v972_v24 = vcombine.high %v964_v47, %v964_v47 }
 0x29a   : > { %v1462_v29 = vpop.f32.mrf.mxu0  ;;  %v1472_v30 = vpop.f32.mrf.mxu1  ;;  %5997 = vmatmul.mubr.bf16.vlgmr.msra.gmra.mxu1 %v5771_v22 }
 0x29b   : > { %v1769_v31 = vsel %vm1767_vm1, %v5776_v25, 0  ;;  %6008 = vmatprep.mubr.msk.bf16.mxu1 %vm7038_vm0, %v7037_v27  ;;  %v1463_v32 = vadd.f32 %v1462_v29, %v1067_v13  ;;  %v7698_v33 = vadd.f32 %v1472_v30, %v1067_v13 }
 0x29c   : > { %6001 = vmatpush3.bf16.msra.mxu0 %v1769_v31  ;;  %v7705_v49 = vpop.f32.mrf.mxu1  ;;  %v7718_v31 = vrot.slane %v972_v24, %v7536_v3 }
 0x29d   : > { %6012 = vmatprep.subr.bf16.mxu0 %v7037_v27  ;;  %v5777_v35 = vpack.c.bf16 %v1463_v32, %v1463_v32 }
 0x29f   : > { %v1815_v36 = vsel %vm1767_vm1, %v5777_v35, 0 }
 0x2a0   : > { %6007 = vmatpush3.bf16.msra.mxu1 %v1815_v36 }
 0x2a1   : > { %6018 = vmatprep.subr.bf16.mxu1 %v7037_v27 }
 0x342   : > { %v1561_v54 = vpop.f32.mrf.mxu1 }
 0x343   : > { %v1687_v55 = vmul.f32 0.25, %v1561_v54 }
 0x344   : > { %v5980_v57 = vpop.f32.mrf.mxu1 }
 0x345   : > { %v1711_v62 = vadd.f32 %v7708_v50, %v1687_v55 }
 0x346   : > { %v1564_v7 = vpop.f32.mrf.mxu1 }
 0x347   : > { %v1716_v9 = vsel %vm1715_vm2, %v1711_v62, -inf }
 0x348   : > { %1717 = vmax.xlane.f32.xlu0 %v1716_v9  ;;  %v5981_v13 = vpop.f32.mrf.mxu1 }
 0x34a   : > { %v1601_v18 = vpop.f32.mrf.mxu1 }
 0x34b   : > { %v1688_v19 = vmul.f32 0.25, %v1601_v18 }
 0x34c   : > { %v5986_v20 = vpop.f32.mrf.mxu1 }
 0x34d   : > { %v1712_v22 = vadd.f32 %v7713_v14, %v1688_v19 }
 0x34e   : > { %v1604_v25 = vpop.f32.mrf.mxu1 }
 0x34f   : > { %v1719_v29 = vsel %vm1715_vm2, %v1712_v22, -inf }
 0x350   : > { %1720 = vmax.xlane.f32.xlu1 %v1719_v29  ;;  %v5987_v30 = vpop.f32.mrf.mxu1 }
 0x352   : > { %v1641_v32 = vpop.f32.mrf.mxu1 }
 0x353   : > { %v1689_v35 = vmul.f32 0.25, %v1641_v32 }
 0x354   : > { %v5992_v36 = vpop.f32.mrf.mxu1 }
 0x355   : > { %v1713_v37 = vadd.f32 %v7718_v31, %v1689_v35 }
 0x356   : > { %v1644_v41 = vpop.f32.mrf.mxu1 }
 0x357   : > { %v1722_v42 = vsel %vm1715_vm2, %v1713_v37, -inf }
 0x358   : > { %1723 = vmax.xlane.f32.xlu0 %v1722_v42  ;;  %v5993_v43 = vpop.f32.mrf.mxu1 }
 0x35a   : > { %v1681_v45 = vpop.f32.mrf.mxu1 }
 0x35b   : > { %v1690_v47 = vmul.f32 0.25, %v1681_v45 }
 0x35c   : > { %v5998_v51 = vpop.f32.mrf.mxu1 }
 0x35d   : > { %v1714_v54 = vadd.f32 %v7723_v44, %v1690_v47 }
 0x35e   : > { %v1684_v55 = vpop.f32.mrf.mxu1 }
 0x35f   : > { %v1725_v57 = vsel %vm1715_vm2, %v1714_v54, -inf }
 0x360   : > { %1726 = vmax.xlane.f32.xlu0 %v1725_v57  ;;  %v5999_v7 = vpop.f32.mrf.mxu1 }
 0x3d1   : > { %v1718_v9 = vpop.xlane.xlu0 %1717 }
 0x3d2   : > { %v1728_v63 = vsub.f32 %v1711_v62, %v1718_v9 }
 0x3d4   : > { %v1732_v13 = vmul.f32 1.442695, %v1728_v63 }
 0x3d6   : > { %6578 = vpow2.f32 %v1732_v13  ;;  %v5779_v13 = vpack.c.bf16 %v7698_v33, %v7698_v33 }
 0x3d9   : > { %v1721_v18 = vpop.xlane.xlu1 %1720 }
 0x3da   : > { %v1729_v19 = vsub.f32 %v1712_v22, %v1721_v18 }
 0x3dc   : > { %v1734_v20 = vmul.f32 1.442695, %v1729_v19 }
 0x3de   : > { %6580 = vpow2.f32 %v1734_v20  ;;  %v1063_v20 = vrot.slane %v7646_v28, %v7545_v6 }
 0x3e0   : > { %v1408_v33 = vadd.f32 %v7652_v34, %v1063_v20  ;;  %v1418_v34 = vadd.f32 %v7664_v48, %v1063_v20 }
 0x3e1   : > { %v1724_v24 = vpop.xlane.xlu0 %1723 }
 0x3e2   : > { %v1730_v25 = vsub.f32 %v1713_v37, %v1724_v24  ;;  %v1907_v24 = vsel %vm1767_vm1, %v5779_v13, 0 }
 0x3e3   : > { %v6579_v29 = vpop.eup %6578 }
 0x3e4   : > { %v1736_v30 = vmul.f32 1.442695, %v1730_v25  ;;  %v1740_v32 = vsel %vm1715_vm2, %v6579_v29, 0.0 }
 0x3e5   : > { %1741 = vadd.xlane.f32.xlu1 %v1740_v32 }
 0x3e6   : > { %6582 = vpow2.f32 %v1736_v30  ;;  %v1055_v30 = vrot.slane %v7646_v28, %v7542_v5 }
 0x3e9   : > { %v1727_v35 = vpop.xlane.xlu0 %1726 }
 0x3ea   : > { %v1731_v36 = vsub.f32 %v1714_v54, %v1727_v35  ;;  %v5778_v54 = vpack.c.bf16 %v7688_v21, %v7688_v21  ;;  %v5784_v35 = vpack.c.bf16 %v1408_v33, %v1408_v33 }
 0x3eb   : > { %v6581_v39 = vpop.eup %6580 }
 0x3ec   : > { %v1738_v41 = vmul.f32 1.442695, %v1731_v36  ;;  %v1743_v62 = vsel %vm1715_vm2, %v6581_v39, 0.0  ;;  %v1861_v9 = vsel %vm1767_vm1, %v5778_v54, 0  ;;  %v1355_v36 = vadd.f32 %v7654_v38, %v1055_v30 }
 0x3ed   : > { %1744 = vadd.xlane.f32.xlu0 %v1743_v62  ;;  %v1359_v38 = vadd.f32 %v7659_v46, %v1055_v30 }
 0x3ee   : > { %6584 = vpow2.f32 %v1738_v41  ;;  %v1412_v41 = vadd.f32 %v7657_v40, %v1063_v20  ;;  %v1422_v40 = vadd.f32 %v7680_v16, %v1063_v20 }
 0x3f0   : > { %v5787_v54 = vpack.c.bf16 %v1422_v40, %v1422_v40 }
 0x3f3   : > { %v6583_v42 = vpop.eup %6582 }
 0x3f4   : > { %v1746_v22 = vsel %vm1715_vm2, %v6583_v42, 0.0 }
 0x3f5   : > { %1747 = vadd.xlane.f32.xlu1 %v1746_v22  ;;  %v5785_v22 = vpack.c.bf16 %v1412_v41, %v1412_v41 }
 0x3fb   : > { %v6585_v43 = vpop.eup %6584 }
 0x3fc   : > { %v1749_v37 = vsel %vm1715_vm2, %v6585_v43, 0.0 }
 0x3fd   : > { %1750 = vadd.xlane.f32.xlu0 %v1749_v37  ;;  %v5786_v37 = vpack.c.bf16 %v1418_v34, %v1418_v34 }
 0x46e   : > { %v1742_v45 = vpop.xlane.xlu1 %1741 }
 0x46f   : > { %6586 = vrcp.f32 %v1742_v45  ;;  %v1461_v45 = vadd.f32 %v7690_v23, %v7686_v17  ;;  %v1464_v23 = vpop.f32.mrf.mxu0 }
 0x471   : > { %v5788_v48 = vpack.c.bf16 %v1461_v45, %v1461_v45 }
 0x473   : > { %v2207_v46 = vsel %vm1767_vm1, %v5788_v48, 0 }
 0x476   : > { %v1745_v47 = vpop.xlane.xlu0 %1744 }
 0x477   : > { %6588 = vrcp.f32 %v1745_v47  ;;  %v1365_v47 = vadd.f32 %v7668_v56, %v1055_v30  ;;  %v1465_v56 = vadd.f32 %v1464_v23, %v7686_v17 }
 0x479   : > { %v5789_v16 = vpack.c.bf16 %v1465_v56, %v1465_v56 }
 0x47c   : > { %v6587_v51 = vpop.eup %6586 }
 0x47d   : > { %v1756_v55 = vmul.f32 %v6587_v51, %v6579_v29  ;;  %v5782_v51 = vpack.c.bf16 %v1365_v47, %v1365_v47 }
 0x47e   : > { %v1748_v57 = vpop.xlane.xlu1 %1747 }
 0x47f   : > { %6590 = vrcp.f32 %v1748_v57  ;;  %v1760_v7 = vpack.c.bf16 %v1756_v55, %v1756_v55  ;;  %v1369_v55 = vadd.f32 %v7678_v15, %v1055_v30 }
 0x481   : > { %6003 = vmatmul.mubr.msk.bf16.vlgmr.msra.gmra.mxu0 %vm1715_vm2, %v1760_v7  ;;  %v5783_v57 = vpack.c.bf16 %v1369_v55, %v1369_v55  ;;  %v2253_v7 = vsel %vm1767_vm1, %v5789_v16, 0 }
 0x482   : > { %6013 = vmatpush3.bf16.msra.mxu0 %v1861_v9  ;;  %6014 = vmatprep.mubr.msk.bf16.mxu0 %vm7038_vm0, %v7037_v27 }
 0x483   : > { %6024 = vmatprep.subr.bf16.mxu0 %v7037_v27 }
 0x484   : > { %v6589_v63 = vpop.eup %6588 }
 0x485   : > { %v1757_v18 = vmul.f32 %v6589_v63, %v6581_v39 }
 0x486   : > { %v1751_v21 = vpop.xlane.xlu0 %1750 }
 0x487   : > { %6592 = vrcp.f32 %v1751_v21  ;;  %v1761_v19 = vpack.c.bf16 %v1757_v18, %v1757_v18 }
 0x489   : > { %6009 = vmatmul.mubr.msk.bf16.vlgmr.msra.gmra.mxu1 %vm1715_vm2, %v1761_v19 }
 0x48a   : > { %6019 = vmatpush3.bf16.msra.mxu1 %v1907_v24  ;;  %6020 = vmatprep.mubr.msk.bf16.mxu1 %vm7038_vm0, %v7037_v27 }
 0x48b   : > { %6030 = vmatprep.subr.bf16.mxu1 %v7037_v27 }
 0x48c   : > { %v6591_v25 = vpop.eup %6590 }
 0x48d   : > { %v1758_v29 = vmul.f32 %v6591_v25, %v6583_v42  ;;  %v5780_v42 = vpack.c.bf16 %v1355_v36, %v1355_v36 }
 0x48f   : > { %v1762_v32 = vpack.c.bf16 %v1758_v29, %v1758_v29 }
 0x491   : > { %6015 = vmatmul.mubr.msk.bf16.vlgmr.msra.gmra.mxu0 %vm1715_vm2, %v1762_v32 }
 0x492   : > { %6025 = vmatpush3.bf16.xpose.msra.mxu0 %v5784_v35  ;;  %6026 = vmatprep.mubr.msk.bf16.mxu0 %vm7038_vm0, %v7037_v27 }
 0x493   : > { %6036 = vmatprep.subr.bf16.mxu0 %v7037_v27 }
 0x494   : > { %v6593_v39 = vpop.eup %6592 }
 0x495   : > { %v1759_v62 = vmul.f32 %v6593_v39, %v6585_v43  ;;  %v5781_v43 = vpack.c.bf16 %v1359_v38, %v1359_v38 }
 0x497   : > { %v1763_v28 = vpack.c.bf16 %v1759_v62, %v1759_v62 }
 0x499   : > { %6021 = vmatmul.mubr.msk.bf16.vlgmr.msra.gmra.mxu1 %vm1715_vm2, %v1763_v28  ;;  %6027 = vmatmul.mubr.bf16.vlgmr.msra.gmra.mxu0 %v5780_v42 }
 0x49a   : > { %6031 = vmatpush3.bf16.xpose.msra.mxu1 %v5785_v22  ;;  %6037 = vmatpush3.bf16.xpose.msra.mxu0 %v5786_v37 }
 0x49b   : > { %6032 = vmatprep.mubr.msk.bf16.mxu1 %vm7038_vm0, %v7037_v27  ;;  %6038 = vmatprep.mubr.msk.bf16.mxu0 %vm7038_vm0, %v7037_v27 }
 0x49c   : > { %6042 = vmatprep.subr.bf16.mxu1 %v7037_v27  ;;  %6048 = vmatprep.subr.bf16.mxu0 %v7037_v27 }
 0x4a1   : > { %6033 = vmatmul.mubr.bf16.vlgmr.msra.gmra.mxu1 %v5781_v43  ;;  %6039 = vmatmul.mubr.bf16.vlgmr.msra.gmra.mxu0 %v5782_v51 }
 0x4a2   : > { %6043 = vmatpush3.bf16.xpose.msra.mxu1 %v5787_v54  ;;  %6049 = vmatpush3.bf16.msra.mxu0 %v2207_v46 }
 0x4a3   : > { %6044 = vmatprep.mubr.msk.bf16.mxu1 %vm7038_vm0, %v7037_v27  ;;  %6054 = vmatprep.subr.bf16.mxu1 %v7037_v27 }
 0x4a4   : > { %6050 = vmatprep.mubr.msk.bf16.mxu0 %vm7038_vm0, %v7037_v27  ;;  %6060 = vmatprep.subr.bf16.mxu0 %v7037_v27 }
 0x4a9   : > { %6045 = vmatmul.mubr.bf16.vlgmr.msra.gmra.mxu1 %v5783_v57 }
 0x4aa   : > { %6055 = vmatpush3.bf16.msra.mxu1 %v2253_v7  ;;  %6056 = vmatprep.mubr.msk.bf16.mxu1 %vm7038_vm0, %v7037_v27 }
 0x4ab   : > { %6066 = vmatprep.subr.bf16.mxu1 %v7037_v27 }
 0x541   : > { %v7782_v15 = vpop.f32.mrf.mxu0 }
 0x543   : > { %v6004_v9 = vpop.f32.mrf.mxu0 }
 0x545   : > { %v1808_v63 = vpop.f32.mrf.mxu0 }
 0x547   : > { %v6005_v13 = vpop.f32.mrf.mxu0 }
 0x549   : > { %v7784_v18 = vpop.f32.mrf.mxu1 }
 0x54a   : > { %v2387_v21 = vpack.c.bf16 %v7784_v18, %v7782_v15  ;;  %v975_v15 = vand.u32 127, %v919_v0 }
 0x54b   : > { %v6010_v19 = vpop.f32.mrf.mxu1 }
 0x54c   : > { %vm976_vm3 = vcmp.lt.s32.totalorder %v975_v15, 32  ;;  %v6458_v15 = vld [vmem:[%s7522_s27 + $0x38] sm:$0xff]  }
 0x54d   : > { %v1854_v20 = vpop.f32.mrf.mxu1 }
 0x54f   : > { %v6011_v24 = vpop.f32.mrf.mxu1 }
 0x551   : > { %v7788_v25 = vpop.f32.mrf.mxu0 }
 0x553   : > { %v6016_v33 = vpop.f32.mrf.mxu0 }
 0x555   : > { %v1900_v29 = vpop.f32.mrf.mxu0 }
 0x557   : > { %v6017_v30 = vpop.f32.mrf.mxu0 }
 0x559   : > { %v7790_v32 = vpop.f32.mrf.mxu1  ;;  %v2021_v35 = vpop.f32.mrf.mxu0 }
 0x55a   : > { %v2389_v36 = vpack.c.bf16 %v7790_v32, %v7788_v25  ;;  %v2147_v39 = vmul.f32 0.25, %v2021_v35 }
 0x55b   : > { %v6022_v41 = vpop.f32.mrf.mxu1  ;;  %v6028_v34 = vpop.f32.mrf.mxu0 }
 0x55c   : > { %v2151_v62 = vadd.f32 %v2147_v39, %v7708_v50 }
 0x55d   : > { %v1946_v42 = vpop.f32.mrf.mxu1  ;;  %v2024_v28 = vpop.f32.mrf.mxu0 }
 0x55e   : > { %v2155_v22 = vsel %vm1715_vm2, %v2151_v62, -inf }
 0x55f   : > { %2156 = vmax.xlane.f32.xlu1 %v2155_v22  ;;  %v6023_v37 = vpop.f32.mrf.mxu1  ;;  %v6029_v45 = vpop.f32.mrf.mxu0 }
 0x561   : > { %v2061_v38 = vpop.f32.mrf.mxu1  ;;  %v2101_v47 = vpop.f32.mrf.mxu0 }
 0x562   : > { %v2148_v40 = vmul.f32 0.25, %v2061_v38  ;;  %v2149_v48 = vmul.f32 0.25, %v2101_v47 }
 0x563   : > { %v6034_v23 = vpop.f32.mrf.mxu1  ;;  %v6040_v43 = vpop.f32.mrf.mxu0 }
 0x564   : > { %v2153_v51 = vadd.f32 %v2149_v48, %v7718_v31  ;;  %v2152_v54 = vadd.f32 %v2148_v40, %v7713_v14 }
 0x565   : > { %v2064_v46 = vpop.f32.mrf.mxu1  ;;  %v2104_v56 = vpop.f32.mrf.mxu0 }
 0x566   : > { %v2161_v55 = vsel %vm1715_vm2, %v2153_v51, -inf  ;;  %v2158_v16 = vsel %vm1715_vm2, %v2152_v54, -inf }
 0x567   : > { %2162 = vmax.xlane.f32.xlu1 %v2161_v55  ;;  %v6041_v57 = vpop.f32.mrf.mxu0  ;;  %2159 = vmax.xlane.f32.xlu0 %v2158_v16  ;;  %v6035_v7 = vpop.f32.mrf.mxu1 }
 0x568   : > { %v5790_v57 = vpack.c.bf16 %v7693_v26, %v7693_v26 }
 0x569   : > { %v2141_v9 = vpop.f32.mrf.mxu1 }
 0x56a   : > { %v2150_v63 = vmul.f32 0.25, %v2141_v9 }
 0x56b   : > { %v6046_v13 = vpop.f32.mrf.mxu1 }
 0x56c   : > { %v2154_v19 = vadd.f32 %v2150_v63, %v7723_v44  ;;  %v6442_v13 = vld [vmem:[%s7515_s3 + $0x78] sm:$0xff]  }
 0x56d   : > { %v2144_v20 = vpop.f32.mrf.mxu1 }
 0x56e   : > { %v2164_v24 = vsel %vm1715_vm2, %v2154_v19, -inf  ;;  %v1475_v20 = vadd.f32 %v7705_v49, %v7686_v17  ;;  %v6445_v49 = vld [vmem:[%s7515_s3 + $0x30] sm:$0xff]  }
 0x56f   : > { %2165 = vmax.xlane.f32.xlu0 %v2164_v24  ;;  %v6047_v33 = vpop.f32.mrf.mxu1 }
 0x5e8   : > { %v2157_v29 = vpop.xlane.xlu1 %2156 }
 0x5e9   : > { %v2167_v30 = vsub.f32 %v2151_v62, %v2157_v29  ;;  %v5791_v29 = vpack.c.bf16 %v1475_v20, %v1475_v20 }
 0x5eb   : > { %v2171_v35 = vmul.f32 1.442695, %v2167_v30  ;;  %v2345_v17 = vsel %vm1767_vm1, %v5791_v29, 0 }
 0x5ed   : > { %6594 = vpow2.f32 %v2171_v35  ;;  %v6443_v35 = vld [vmem:[%s7515_s3 + $0x38] sm:$0xff]  }
 0x5f0   : > { %v2163_v39 = vpop.xlane.xlu1 %2162  ;;  %v2160_v41 = vpop.xlane.xlu0 %2159 }
 0x5f1   : > { %v2169_v34 = vsub.f32 %v2153_v51, %v2163_v39  ;;  %v2168_v42 = vsub.f32 %v2152_v54, %v2160_v41 }
 0x5f3   : > { %v2175_v28 = vmul.f32 1.442695, %v2169_v34  ;;  %v2173_v22 = vmul.f32 1.442695, %v2168_v42  ;;  %v6444_v34 = vld [vmem:[%s7515_s3 + $0x70] sm:$0xff]   ;;  %v6446_v42 = vld [vmem:[%s7515_s3 + $0x68] sm:$0xff]  }
 0x5f5   : > { %6596 = vpow2.f32 %v2175_v28 }
 0x5f6   : > { %6598 = vpow2.f32 %v2173_v22 }
 0x5f8   : > { %v2166_v37 = vpop.xlane.xlu0 %2165 }
 0x5f9   : > { %v2170_v45 = vsub.f32 %v2154_v19, %v2166_v37  ;;  %v2299_v19 = vsel %vm1767_vm1, %v5790_v57, 0  ;;  %v6447_v37 = vld [vmem:[%s7515_s3 + $0x28] sm:$0xff]  }
 0x5fa   : > { %v6595_v38 = vpop.eup %6594 }
 0x5fb   : > { %v2177_v47 = vmul.f32 1.442695, %v2170_v45  ;;  %v2179_v40 = vsel %vm1715_vm2, %v6595_v38, 0.0 }
 0x5fc   : > { %2180 = vadd.xlane.f32.xlu1 %v2179_v40  ;;  %v6450_v40 = vld [vmem:[%s7515_s3 + $0x58] sm:$0xff]  }
 0x5fd   : > { %6600 = vpow2.f32 %v2177_v47  ;;  %v6449_v47 = vld [vmem:[%s7515_s3 + $0x20] sm:$0xff]  }
 0x602   : > { %v6597_v48 = vpop.eup %6596 }
 0x603   : > { %v6599_v62 = vpop.eup %6598  ;;  %v2185_v23 = vsel %vm1715_vm2, %v6597_v48, 0.0 }
 0x604   : > { %2186 = vadd.xlane.f32.xlu1 %v2185_v23  ;;  %v2182_v43 = vsel %vm1715_vm2, %v6599_v62, 0.0  ;;  %v6453_v23 = vld [vmem:[%s7515_s3 + $0x10] sm:$0xff]  }
 0x605   : > { %2183 = vadd.xlane.f32.xlu0 %v2182_v43  ;;  %v6454_v43 = vld [vmem:[%s7515_s3 + $0x48] sm:$0xff]  }
 0x60a   : > { %v6601_v51 = vpop.eup %6600 }
 0x60b   : > { %v2188_v54 = vsel %vm1715_vm2, %v6601_v51, 0.0 }
 0x60c   : > { %2189 = vadd.xlane.f32.xlu0 %v2188_v54  ;;  %v6456_v54 = vld [vmem:[%s7515_s3 + $0x40] sm:$0xff]  }
 0x685   : > { %v2181_v46 = vpop.xlane.xlu1 %2180 }
 0x686   : > { %6602 = vrcp.f32 %v2181_v46  ;;  %v6457_v46 = vld [vmem:[%s7515_s3] sm:$0xff]  }
 0x68d   : > { %v2187_v56 = vpop.xlane.xlu1 %2186 }
 0x68e   : > { %6604 = vrcp.f32 %v2187_v56  ;;  %v2184_v55 = vpop.xlane.xlu0 %2183 }
 0x68f   : > { %6606 = vrcp.f32 %v2184_v55 }
 0x693   : > { %v6603_v16 = vpop.eup %6602 }
 0x694   : > { %v2195_v7 = vmul.f32 %v6603_v16, %v6595_v38  ;;  %v6448_v38 = vld [vmem:[%s7515_s3 + $0x60] sm:$0xff]  }
 0x695   : > { %v2190_v9 = vpop.xlane.xlu0 %2189 }
 0x696   : > { %6608 = vrcp.f32 %v2190_v9  ;;  %v2199_v63 = vpack.c.bf16 %v2195_v7, %v2195_v7 }
 0x698   : > { %6051 = vmatmul.mubr.msk.bf16.vlgmr.msra.gmra.mxu0 %vm1715_vm2, %v2199_v63 }
 0x699   : > { %6061 = vmatpush3.bf16.msra.mxu0 %v2299_v19  ;;  %6062 = vmatprep.mubr.msk.bf16.mxu0 %vm7038_vm0, %v7037_v27 }
 0x69a   : > { %5848 = vmatprep.subr.bf16.mxu0 %v6442_v13 }
 0x69b   : > { %v6605_v26 = vpop.eup %6604 }
 0x69c   : > { %v6607_v24 = vpop.eup %6606  ;;  %v2197_v33 = vmul.f32 %v6605_v26, %v6597_v48  ;;  %v6451_v48 = vld [vmem:[%s7515_s3 + $0x18] sm:$0xff]  }
 0x69d   : > { %v2196_v30 = vmul.f32 %v6607_v24, %v6599_v62  ;;  %v6452_v62 = vld [vmem:[%s7515_s3 + $0x50] sm:$0xff]  }
 0x69e   : > { %v2201_v39 = vpack.c.bf16 %v2197_v33, %v2197_v33 }
 0x69f   : > { %v2200_v41 = vpack.c.bf16 %v2196_v30, %v2196_v30 }
 0x6a0   : > { %6063 = vmatmul.mubr.msk.bf16.vlgmr.msra.gmra.mxu0 %vm1715_vm2, %v2201_v39 }
 0x6a1   : > { %6057 = vmatmul.mubr.msk.bf16.vlgmr.msra.gmra.mxu1 %vm1715_vm2, %v2200_v41  ;;  %5849 = vmatpush3.bf16.msra.mxu0 %v6443_v35 }
 0x6a2   : > { %6067 = vmatpush3.bf16.msra.mxu1 %v2345_v17  ;;  %6068 = vmatprep.mubr.msk.bf16.mxu1 %vm7038_vm0, %v7037_v27  ;;  %v7855_v17 = vsel %vm976_vm3, 1.0, %v7037_v27 }
 0x6a3   : > { %v6609_v28 = vpop.eup %6608  ;;  %5850 = vmatprep.subr.bf16.mxu0 %v6444_v34  ;;  %6072 = vmatprep.subr.bf16.mxu1 %v6458_v15 }
 0x6a4   : > { %v2198_v22 = vmul.f32 %v6609_v28, %v6601_v51  ;;  %v6455_v51 = vld [vmem:[%s7515_s3 + $0x8] sm:$0xff]  }
 0x6a5   : > { %5851 = vmatpush3.bf16.msra.mxu0 %v6445_v49 }
 0x6a6   : > { %v2202_v45 = vpack.c.bf16 %v2198_v22, %v2198_v22  ;;  %5852 = vmatprep.subr.bf16.mxu0 %v6446_v42 }
 0x6a9   : > { %6069 = vmatmul.mubr.msk.bf16.vlgmr.msra.gmra.mxu1 %vm1715_vm2, %v2202_v45  ;;  %5853 = vmatpush3.bf16.msra.mxu0 %v6447_v37 }
 0x6aa   : > { %5854 = vmatprep.subr.bf16.mxu0 %v6448_v38  ;;  %6073 = vmatpush3.bf16.msra.mxu1 %v6458_v15 }
 0x6ad   : > { %5855 = vmatpush3.bf16.msra.mxu0 %v6449_v47 }
 0x6ae   : > { %5856 = vmatprep.subr.bf16.mxu0 %v6450_v40 }
 0x6b1   : > { %5857 = vmatpush3.bf16.msra.mxu0 %v6451_v48 }
 0x6b2   : > { %5858 = vmatprep.subr.bf16.mxu0 %v6452_v62 }
 0x6b5   : > { %5859 = vmatpush3.bf16.msra.mxu0 %v6453_v23 }
 0x6b6   : > { %5860 = vmatprep.subr.bf16.mxu0 %v6454_v43 }
 0x6b9   : > { %5861 = vmatpush3.bf16.msra.mxu0 %v6455_v51 }
 0x6ba   : > { %5862 = vmatprep.subr.bf16.mxu0 %v6456_v54 }
 0x6bd   : > { %5863 = vmatpush3.bf16.msra.mxu0 %v6457_v46 }
 0x758   : > { %v2243_v56 = vpop.f32.mrf.mxu0 }
 0x75a   : > { %v6052_v55 = vpop.f32.mrf.mxu0 }
 0x75c   : > { %v2246_v16 = vpop.f32.mrf.mxu0 }
 0x75e   : > { %v6053_v57 = vpop.f32.mrf.mxu0 }
 0x760   : > { %v2335_v7 = vpop.f32.mrf.mxu0 }
 0x761   : > { %v2289_v9 = vpop.f32.mrf.mxu1 }
 0x762   : > { %v2388_v63 = vpack.c.bf16 %v2289_v9, %v2243_v56  ;;  %v6064_v13 = vpop.f32.mrf.mxu0 }
 0x763   : > { %v6058_v19 = vpop.f32.mrf.mxu1 }
 0x764   : > { %2558 = vmatprep.mubr.bf16.mxu0 %v2388_v63  ;;  %v2338_v20 = vpop.f32.mrf.mxu0 }
 0x765   : > { %v2292_v26 = vpop.f32.mrf.mxu1  ;;  %2559 = vmatmul.mubr.bf16.vlgmr.msra.gmra.mxu0 %v2387_v21  ;;  %v5481_v21 = vld [vmem:[%s7851_s17] ss:$0 sm:$0xff] }
 0x766   : > { %v6065_v24 = vpop.f32.mrf.mxu0 }
 0x767   : > { %v6059_v33 = vpop.f32.mrf.mxu1 }
 0x769   : > { %v2381_v29 = vpop.f32.mrf.mxu1 }
 0x76a   : > { %v2390_v30 = vpack.c.bf16 %v2381_v29, %v2335_v7 }
 0x76b   : > { %v6070_v35 = vpop.f32.mrf.mxu1 }
 0x76c   : > { %2566 = vmatprep.mubr.bf16.mxu0 %v2390_v30 }
 0x76d   : > { %v2384_v39 = vpop.f32.mrf.mxu1  ;;  %2567 = vmatmul.mubr.bf16.gmra.mxu0 %v2389_v36 }
 0x76f   : > { %v6071_v41 = vpop.f32.mrf.mxu1 }
 0x825   : > { %v5864_v18 = vpop.f32.mrf.mxu0 }
 0x827   : > { %v5865_v34 = vpop.f32.mrf.mxu0 }
 0x828   : > { %v5866_v25 = vadd.f32 %v5865_v34, %v5864_v18  ;;  %v6459_v18 = vld [vmem:[%s7522_s27 + $0x30] sm:$0xff]   ;;  %v6461_v34 = vld [vmem:[%s7522_s27 + $0x20] sm:$0xff]  }
 0x829   : > { %v5867_v32 = vpop.f32.mrf.mxu0  ;;  %6074 = vmatprep.subr.bf16.mxu1 %v6459_v18 }
 0x82a   : > { %v2561_v36 = vadd.f32 %v5866_v25, %v5481_v21  ;;  %6075 = vmatpush3.bf16.msra.mxu1 %v6459_v18  ;;  %v6462_v25 = vld [vmem:[%s7522_s27 + $0x18] sm:$0xff]  }
 0x82b   : > { %v5868_v49 = vpop.f32.mrf.mxu0 }
 0x82c   : > { %v5869_v42 = vadd.f32 %v5868_v49, %v5867_v32  ;;  %v2575_v0 = vadd.f32 %v2561_v36, %v7603_v59  ;;  %v6463_v32 = vld [vmem:[%s7522_s27 + $0x10] sm:$0xff]   ;;  %v6464_v36 = vld [vmem:[%s7522_s27 + $0x8] sm:$0xff]   ;;  %v6465_v49 = vld [vmem:[%s7522_s27] sm:$0xff]  }
 0x82d   : > { %v5870_v28 = vpop.f32.mrf.mxu0 }
 0x82e   : > { %v2564_v22 = vadd.f32 %v5869_v42, %v5481_v21  ;;  %v2581_v37 = vmul.f32 %v7855_v17, %v2575_v0  ;;  %v6466_v42 = vld [vmem:[%s7524_s6 + $0x38] sm:$0xff]  }
 0x82f   : > { %v5871_v45 = vpop.f32.mrf.mxu0  ;;  %6092 = vmatprep.subr.bf16.mxu0 %v6466_v42 }
 0x830   : > { %v5872_v38 = vadd.f32 %v5871_v45, %v5870_v28  ;;  %2585 = vadd.xlane.f32.xlu1 %v2581_v37  ;;  %v2576_v47 = vadd.f32 %v2564_v22, %v7606_v60  ;;  %6093 = vmatpush3.bf16.msra.mxu0 %v6466_v42  ;;  %v6468_v28 = vld [vmem:[%s7524_s6 + $0x28] sm:$0xff]   ;;  %v6469_v22 = vld [vmem:[%s7524_s6 + $0x20] sm:$0xff]   ;;  %v6470_v37 = vld [vmem:[%s7524_s6 + $0x18] sm:$0xff]  }
 0x831   : > { %v5873_v40 = vpop.f32.mrf.mxu0  ;;  %v5500_v42 = vld [vmem:[%s7928_s23] ss:$0 sm:$0xff] }
 0x832   : > { %v2569_v48 = vadd.f32 %v5872_v38, %v5481_v21  ;;  %v2582_v62 = vmul.f32 %v7855_v17, %v2576_v47 }
 0x833   : > { %v5874_v23 = vpop.f32.mrf.mxu0 }
 0x834   : > { %v5875_v43 = vadd.f32 %v5874_v23, %v5873_v40  ;;  %2587 = vadd.xlane.f32.xlu0 %v2582_v62  ;;  %v2577_v51 = vadd.f32 %v2569_v48, %v7615_v11 }
 0x836   : > { %v2572_v54 = vadd.f32 %v5875_v43, %v5481_v21  ;;  %v2583_v59 = vmul.f32 %v7855_v17, %v2577_v51  ;;  %v6460_v21 = vld [vmem:[%s7522_s27 + $0x28] sm:$0xff]  }
 0x837   : > { %6076 = vmatprep.subr.bf16.mxu1 %v6460_v21 }
 0x838   : > { %2589 = vadd.xlane.f32.xlu1 %v2583_v59  ;;  %v2578_v46 = vadd.f32 %v2572_v54, %v7618_v12  ;;  %6077 = vmatpush3.bf16.msra.mxu1 %v6460_v21 }
 0x839   : > { %6078 = vmatprep.subr.bf16.mxu1 %v6461_v34 }
 0x83a   : > { %v2584_v56 = vmul.f32 %v7855_v17, %v2578_v46 }
 0x83c   : > { %2591 = vadd.xlane.f32.xlu0 %v2584_v56  ;;  %6079 = vmatpush3.bf16.msra.mxu1 %v6461_v34 }
 0x83d   : > { %6080 = vmatprep.subr.bf16.mxu1 %v6462_v25 }
 0x840   : > { %6081 = vmatpush3.bf16.msra.mxu1 %v6462_v25  ;;  %v6471_v25 = vld [vmem:[%s7524_s6 + $0x10] sm:$0xff]  }
 0x841   : > { %6082 = vmatprep.subr.bf16.mxu1 %v6463_v32 }
 0x844   : > { %6083 = vmatpush3.bf16.msra.mxu1 %v6463_v32  ;;  %v6472_v32 = vld [vmem:[%s7524_s6 + $0x8] sm:$0xff]  }
 0x845   : > { %6084 = vmatprep.subr.bf16.mxu1 %v6464_v36 }
 0x848   : > { %6085 = vmatpush3.bf16.msra.mxu1 %v6464_v36 }
 0x849   : > { %6086 = vmatprep.subr.bf16.mxu1 %v6465_v49 }
 0x84c   : > { %6087 = vmatpush3.bf16.msra.mxu1 %v6465_v49 }
 0x8b9   : > { %v2586_v55 = vpop.xlane.xlu1 %2585 }
 0x8ba   : > { %v2593_v60 = vmul.f32 0.03125, %v2586_v55  ;;  %v5498_v55 = vld [vmem:[%s7902_s5] ss:$0 sm:$0xff] }
 0x8bc   : > { %v2597_v16 = vsub.f32 %v2575_v0, %v2593_v60  ;;  %v6467_v0 = vld [vmem:[%s7524_s6 + $0x30] sm:$0xff]  }
 0x8bd   : > { %v2588_v57 = vpop.xlane.xlu0 %2587  ;;  %6094 = vmatprep.subr.bf16.mxu0 %v6467_v0 }
 0x8be   : > { %v2594_v7 = vmul.f32 0.03125, %v2588_v57  ;;  %v7866_v9 = vmul.f32 %v7855_v17, %v2597_v16  ;;  %6095 = vmatpush3.bf16.msra.mxu0 %v6467_v0 }
 0x8bf   : > { %6096 = vmatprep.subr.bf16.mxu0 %v6468_v28 }
 0x8c0   : > { %v2598_v63 = vsub.f32 %v2576_v47, %v2594_v7  ;;  %v2605_v11 = vmul.f32 %v7866_v9, %v7866_v9  ;;  %v5499_v7 = vld [vmem:[%s7909_s24] ss:$0 sm:$0xff] }
 0x8c1   : > { %v2590_v13 = vpop.xlane.xlu1 %2589 }
 0x8c2   : > { %v2595_v19 = vmul.f32 0.03125, %v2590_v13  ;;  %2609 = vadd.xlane.f32.xlu1 %v2605_v11  ;;  %v7871_v12 = vmul.f32 %v7855_v17, %v2598_v63  ;;  %6097 = vmatpush3.bf16.msra.mxu0 %v6468_v28 }
 0x8c3   : > { %6098 = vmatprep.subr.bf16.mxu0 %v6469_v22 }
 0x8c4   : > { %v2599_v20 = vsub.f32 %v2577_v51, %v2595_v19  ;;  %v2606_v26 = vmul.f32 %v7871_v12, %v7871_v12 }
 0x8c5   : > { %v2592_v24 = vpop.xlane.xlu0 %2591 }
 0x8c6   : > { %v2596_v33 = vmul.f32 0.03125, %v2592_v24  ;;  %2611 = vadd.xlane.f32.xlu0 %v2606_v26  ;;  %v7876_v29 = vmul.f32 %v7855_v17, %v2599_v20  ;;  %6099 = vmatpush3.bf16.msra.mxu0 %v6469_v22 }
 0x8c7   : > { %6100 = vmatprep.subr.bf16.mxu0 %v6470_v37 }
 0x8c8   : > { %v2600_v30 = vsub.f32 %v2578_v46, %v2596_v33  ;;  %v2607_v35 = vmul.f32 %v7876_v29, %v7876_v29 }
 0x8ca   : > { %2613 = vadd.xlane.f32.xlu1 %v2607_v35  ;;  %v7881_v39 = vmul.f32 %v7855_v17, %v2600_v30  ;;  %6101 = vmatpush3.bf16.msra.mxu0 %v6470_v37 }
 0x8cb   : > { %6102 = vmatprep.subr.bf16.mxu0 %v6471_v25 }
 0x8cc   : > { %v2608_v41 = vmul.f32 %v7881_v39, %v7881_v39 }
 0x8ce   : > { %2615 = vadd.xlane.f32.xlu0 %v2608_v41  ;;  %6103 = vmatpush3.bf16.msra.mxu0 %v6471_v25 }
 0x8cf   : > { %6104 = vmatprep.subr.bf16.mxu0 %v6472_v32 }
 0x8d2   : > { %6105 = vmatpush3.bf16.msra.mxu0 %v6472_v32 }
 0x94b   : > { %v2610_v45 = vpop.xlane.xlu1 %2609 }
 0x94c   : > { %v2617_v38 = vmul.f32 0.03125, %v2610_v45 }
 0x94e   : > { %v2621_v47 = vadd.f32 1e-05, %v2617_v38 }
 0x94f   : > { %v2612_v40 = vpop.xlane.xlu0 %2611 }
 0x950   : > { %6610 = vrsqrt.f32 %v2621_v47  ;;  %v2618_v48 = vmul.f32 0.03125, %v2612_v40 }
 0x952   : > { %v2622_v62 = vadd.f32 1e-05, %v2618_v48 }
 0x953   : > { %v2614_v23 = vpop.xlane.xlu1 %2613 }
 0x954   : > { %6612 = vrsqrt.f32 %v2622_v62  ;;  %v2619_v43 = vmul.f32 0.03125, %v2614_v23 }
 0x956   : > { %v2623_v51 = vadd.f32 1e-05, %v2619_v43 }
 0x957   : > { %v2616_v54 = vpop.xlane.xlu0 %2615 }
 0x958   : > { %6614 = vrsqrt.f32 %v2623_v51  ;;  %v2620_v59 = vmul.f32 0.03125, %v2616_v54  ;;  %v5509_v54 = vld [vmem:[%s7936_s18] ss:$0 sm:$0xff] }
 0x95a   : > { %v2624_v46 = vadd.f32 1e-05, %v2620_v59 }
 0x95c   : > { %6616 = vrsqrt.f32 %v2624_v46 }
 0x95d   : > { %v6611_v56 = vpop.eup %6610 }
 0x95e   : > { %v2629_v60 = vmul.f32 %v6611_v56, %v7866_v9 }
 0x960   : > { %v2639_v16 = vmul.f32 %v5498_v55, %v2629_v60 }
 0x961   : > { %v6613_v57 = vpop.eup %6612 }
 0x962   : > { %v2630_v63 = vmul.f32 %v6613_v57, %v7871_v12  ;;  %v2649_v13 = vadd.f32 %v5499_v7, %v2639_v16 }
 0x964   : > { %v2640_v11 = vmul.f32 %v5498_v55, %v2630_v63  ;;  %v2653_v24 = vmul.f32 %v2649_v13, %v7596_v52 }
 0x965   : > { %v6615_v19 = vpop.eup %6614 }
 0x966   : > { %v2650_v20 = vadd.f32 %v5499_v7, %v2640_v11  ;;  %v2631_v26 = vmul.f32 %v6615_v19, %v7876_v29 }
 0x968   : > { %v2654_v33 = vmul.f32 %v2650_v20, %v7600_v58  ;;  %v2641_v30 = vmul.f32 %v5498_v55, %v2631_v26 }
 0x969   : > { %v6617_v35 = vpop.eup %6616 }
 0x96a   : > { %v2657_v9 = vpack.c.bf16 %v2654_v33, %v2653_v24  ;;  %v2632_v41 = vmul.f32 %v6617_v35, %v7881_v39  ;;  %v2651_v15 = vadd.f32 %v5499_v7, %v2641_v30  ;;  %v6473_v39 = vld [vmem:[%s7524_s6] sm:$0xff]   ;;  %v6476_v35 = vld [vmem:[%s7505_s16 + $0x2d4] ss:$24 sps:$4 sm:$0xff]  }
 0x96b   : > { %6106 = vmatprep.subr.bf16.mxu0 %v6473_v39  ;;  %3311 = vmatprep.subr.bf16.mxu1 %v6476_v35  ;;  %v6513_v35 = vld [vmem:[%s7505_s16 + $0x1b8] ss:$24 sps:$4 sm:$0xff]  }
 0x96c   : > { %6088 = vmatprep.mubr.bf16.mxu1 %v2657_v9  ;;  %v2642_v12 = vmul.f32 %v5498_v55, %v2632_v41  ;;  %v2655_v21 = vmul.f32 %v2651_v15, %v7598_v53  ;;  %6107 = vmatpush3.bf16.msra.mxu0 %v6473_v39 }
 0x96e   : > { %v2652_v18 = vadd.f32 %v5499_v7, %v2642_v12 }
 0x970   : > { %v2656_v29 = vmul.f32 %v2652_v18, %v7609_v8 }
 0x972   : > { %v2658_v34 = vpack.c.bf16 %v2656_v29, %v2655_v21 }
 0x974   : > { %6089 = vmatmul.mubr.bf16.vlgmr.msra.gmra.mxu1 %v2658_v34 }
 0x975   : > { %3343 = vmatprep.mubr.bf16.mxu1 %v7036_v1 }
 0xa34   : > { %v6090_v36 = vpop.f32.mrf.mxu1 }
 0xa35   : > { %v2773_v37 = vadd.f32 %v6090_v36, %v5500_v42 }
 0xa36   : > { %v2764_v49 = vpop.f32.mrf.mxu1 }
 0xa37   : > { %v2765_v28 = vadd.f32 %v5500_v42, %v2764_v49  ;;  %v2781_v62 = vmax.f32 %v2773_v37, 0.0 }
 0xa38   : > { %v6091_v0 = vpop.f32.mrf.mxu1 }
 0xa39   : > { %v2776_v22 = vadd.f32 %v6091_v0, %v5500_v42  ;;  %v2779_v40 = vmax.f32 %v2765_v28, 0.0 }
 0xa3a   : > { %v2767_v45 = vpop.f32.mrf.mxu1 }
 0xa3b   : > { %v2768_v38 = vadd.f32 %v5500_v42, %v2767_v45  ;;  %v2782_v47 = vmax.f32 %v2776_v22, 0.0 }
 0xa3d   : > { %v2780_v48 = vmax.f32 %v2768_v38, 0.0  ;;  %v2784_v43 = vpack.c.bf16 %v2782_v47, %v2781_v62  ;;  %v6479_v38 = vld [vmem:[%s7505_s16 + $0x2dc] ss:$24 sps:$4 sm:$0xff]   ;;  %v6477_v47 = vld [vmem:[%s7505_s16 + $0x2d8] ss:$24 sps:$4 sm:$0xff]  }
 0xa3e   : > { %3364 = vmatprep.subr.bf16.mxu0 %v6479_v38  ;;  %v6485_v62 = vld [vmem:[%s7505_s16 + $0x2ac] ss:$24 sps:$4 sm:$0xff]  }
 0xa3f   : > { %v2783_v23 = vpack.c.bf16 %v2780_v48, %v2779_v40  ;;  %v6482_v40 = vld [vmem:[%s7505_s16 + $0x2a4] ss:$24 sps:$4 sm:$0xff]   ;;  %v6480_v48 = vld [vmem:[%s7505_s16 + $0x2a0] ss:$24 sps:$4 sm:$0xff]  }
 0xa41   : > { %6108 = vmatprep.mubr.bf16.mxu0 %v2783_v23  ;;  %v6483_v23 = vld [vmem:[%s7505_s16 + $0x2a8] ss:$24 sps:$4 sm:$0xff]  }
 0xa42   : > { %6109 = vmatmul.mubr.bf16.vlgmr.msra.gmra.mxu0 %v2784_v43  ;;  %v6488_v43 = vld [vmem:[%s7505_s16 + $0x274] ss:$24 sps:$4 sm:$0xff]  }
 0xa43   : > { %3396 = vmatprep.mubr.bf16.mxu0 %v7036_v1  ;;  %3365 = vmatpush1.bf16.msra.mxu0 %v6477_v47 }
 0xa44   : > { %3366 = vmatprep.subr.bf16.mxu0 %v6485_v62 }
 0xa47   : > { %3367 = vmatpush1.bf16.msra.mxu0 %v6483_v23 }
 0xb02   : > { %v6110_v51 = vpop.f32.mrf.mxu0 }
 0xb03   : > { %v2899_v46 = vadd.f32 %v6110_v51, %v5509_v54  ;;  %v6486_v51 = vld [vmem:[%s7505_s16 + $0x270] ss:$24 sps:$4 sm:$0xff]  }
 0xb04   : > { %v2890_v59 = vpop.f32.mrf.mxu0 }
 0xb05   : > { %v2891_v56 = vadd.f32 %v5509_v54, %v2890_v59  ;;  %v2907_v57 = vadd.f32 %v2899_v46, %v2655_v21  ;;  %v6489_v59 = vld [vmem:[%s7505_s16 + $0x278] ss:$24 sps:$4 sm:$0xff]   ;;  %v6494_v46 = vld [vmem:[%s7505_s16 + $0x244] ss:$24 sps:$4 sm:$0xff]  }
 0xb06   : > { %v6111_v55 = vpop.f32.mrf.mxu0 }
 0xb07   : > { %v2905_v60 = vadd.f32 %v2891_v56, %v2653_v24  ;;  %v2902_v7 = vadd.f32 %v6111_v55, %v5509_v54  ;;  %v2913_v26 = vmul.f32 %v7855_v17, %v2907_v57  ;;  %v6474_v24 = vld [vmem:[%s7505_s16 + $0x2d0] ss:$24 sps:$4 sm:$0xff]   ;;  %v6492_v56 = vld [vmem:[%s7505_s16 + $0x240] ss:$24 sps:$4 sm:$0xff]   ;;  %v6497_v55 = vld [vmem:[%s7505_s16 + $0x24c] ss:$24 sps:$4 sm:$0xff]  }
 0xb08   : > { %v2893_v16 = vpop.f32.mrf.mxu0  ;;  %3312 = vmatpush1.bf16.msra.mxu1 %v6474_v24  ;;  %v6510_v24 = vld [vmem:[%s7505_s16 + $0x1b0] ss:$24 sps:$4 sm:$0xff]  }
 0xb09   : > { %v2894_v63 = vadd.f32 %v5509_v54, %v2893_v16  ;;  %v2911_v11 = vmul.f32 %v7855_v17, %v2905_v60  ;;  %v2908_v19 = vadd.f32 %v2902_v7, %v2656_v29  ;;  %3313 = vmatprep.subr.bf16.mxu1 %v6482_v40  ;;  %v6491_v54 = vld [vmem:[%s7505_s16 + $0x27c] ss:$24 sps:$4 sm:$0xff]   ;;  %v5518_v40 = vld [vmem:[%s7998_s29] ss:$0 sm:$0xff] }
 0xb0a   : > { %3368 = vmatprep.subr.bf16.mxu0 %v6491_v54  ;;  %v6500_v16 = vld [vmem:[%s7505_s16 + $0x214] ss:$24 sps:$4 sm:$0xff]  }
 0xb0b   : > { %v2906_v13 = vadd.f32 %v2894_v63, %v2654_v33  ;;  %2915 = vadd.xlane.f32.xlu1 %v2911_v11  ;;  %v2914_v30 = vmul.f32 %v7855_v17, %v2908_v19  ;;  %3369 = vmatpush1.bf16.msra.mxu0 %v6489_v59  ;;  %v6503_v7 = vld [vmem:[%s7505_s16 + $0x21c] ss:$24 sps:$4 sm:$0xff]   ;;  %v6501_v63 = vld [vmem:[%s7505_s16 + $0x218] ss:$24 sps:$4 sm:$0xff]  }
 0xb0c   : > { %3314 = vmatpush1.bf16.msra.mxu1 %v6480_v48  ;;  %3370 = vmatprep.subr.bf16.mxu0 %v6497_v55  ;;  %v6506_v11 = vld [vmem:[%s7505_s16 + $0x1e4] ss:$24 sps:$4 sm:$0xff]  }
 0xb0d   : > { %v2912_v20 = vmul.f32 %v7855_v17, %v2906_v13  ;;  %3315 = vmatprep.subr.bf16.mxu1 %v6488_v43  ;;  %v5519_v43 = vld [vmem:[%s8005_s30] ss:$0 sm:$0xff] }
 0xb0f   : > { %2917 = vadd.xlane.f32.xlu0 %v2912_v20  ;;  %2919 = vadd.xlane.f32.xlu1 %v2913_v26  ;;  %v6507_v20 = vld [vmem:[%s7505_s16 + $0x1e8] ss:$24 sps:$4 sm:$0xff]   ;;  %v6512_v26 = vld [vmem:[%s7505_s16 + $0x1b4] ss:$24 sps:$4 sm:$0xff]  }
 0xb10   : > { %3316 = vmatpush1.bf16.msra.mxu1 %v6486_v51 }
 0xb11   : > { %3317 = vmatprep.subr.bf16.mxu1 %v6494_v46 }
 0xb13   : > { %2921 = vadd.xlane.f32.xlu0 %v2914_v30  ;;  %v6515_v30 = vld [vmem:[%s7505_s16 + $0x1bc] ss:$24 sps:$4 sm:$0xff]  }
 0xb14   : > { %3318 = vmatpush1.bf16.msra.mxu1 %v6492_v56 }
 0xb15   : > { %3319 = vmatprep.subr.bf16.mxu1 %v6500_v16 }
 0xb94   : > { %v2916_v9 = vpop.xlane.xlu1 %2915 }
 0xb95   : > { %v2923_v41 = vmul.f32 0.03125, %v2916_v9  ;;  %v6518_v9 = vld [vmem:[%s7505_s16 + $0x184] ss:$24 sps:$4 sm:$0xff]  }
 0xb97   : > { %v2927_v12 = vsub.f32 %v2905_v60, %v2923_v41  ;;  %v6495_v60 = vld [vmem:[%s7505_s16 + $0x248] ss:$24 sps:$4 sm:$0xff]   ;;  %v6521_v41 = vld [vmem:[%s7505_s16 + $0x18c] ss:$24 sps:$4 sm:$0xff]  }
 0xb98   : > { %v2918_v15 = vpop.xlane.xlu0 %2917  ;;  %v2920_v33 = vpop.xlane.xlu1 %2919  ;;  %3371 = vmatpush1.bf16.msra.mxu0 %v6495_v60 }
 0xb99   : > { %v2924_v18 = vmul.f32 0.03125, %v2918_v15  ;;  %v2925_v21 = vmul.f32 0.03125, %v2920_v33  ;;  %v7946_v29 = vmul.f32 %v7855_v17, %v2927_v12  ;;  %3372 = vmatprep.subr.bf16.mxu0 %v6503_v7  ;;  %v6516_v12 = vld [vmem:[%s7505_s16 + $0x180] ss:$24 sps:$4 sm:$0xff]   ;;  %v6524_v33 = vld [vmem:[%s7505_s16 + $0x2e4] ss:$24 sps:$4 sm:$0xff]  }
 0xb9a   : > { %v6519_v15 = vld [vmem:[%s7505_s16 + $0x188] ss:$24 sps:$4 sm:$0xff]  }
 0xb9b   : > { %v2928_v34 = vsub.f32 %v2906_v13, %v2924_v18  ;;  %v2929_v25 = vsub.f32 %v2907_v57, %v2925_v21  ;;  %v2935_v32 = vmul.f32 %v7946_v29, %v7946_v29  ;;  %v6498_v57 = vld [vmem:[%s7505_s16 + $0x210] ss:$24 sps:$4 sm:$0xff]   ;;  %v6509_v13 = vld [vmem:[%s7505_s16 + $0x1ec] ss:$24 sps:$4 sm:$0xff]  }
 0xb9c   : > { %v2922_v39 = vpop.xlane.xlu0 %2921  ;;  %3320 = vmatpush1.bf16.msra.mxu1 %v6498_v57  ;;  %3373 = vmatpush1.bf16.msra.mxu0 %v6501_v63 }
 0xb9d   : > { %v2926_v36 = vmul.f32 0.03125, %v2922_v39  ;;  %2939 = vadd.xlane.f32.xlu1 %v2935_v32  ;;  %v7951_v49 = vmul.f32 %v7855_v17, %v2928_v34  ;;  %v7954_v42 = vmul.f32 %v7855_v17, %v2929_v25  ;;  %3321 = vmatprep.subr.bf16.mxu1 %v6506_v11  ;;  %v6522_v11 = vld [vmem:[%s7505_s16 + $0x2e0] ss:$24 sps:$4 sm:$0xff]  }
 0xb9e   : > { %3374 = vmatprep.subr.bf16.mxu0 %v6509_v13 }
 0xb9f   : > { %v2930_v0 = vsub.f32 %v2908_v19, %v2926_v36  ;;  %v2936_v28 = vmul.f32 %v7951_v49, %v7951_v49  ;;  %v2937_v22 = vmul.f32 %v7954_v42, %v7954_v42  ;;  %v6504_v19 = vld [vmem:[%s7505_s16 + $0x1e0] ss:$24 sps:$4 sm:$0xff]  }
 0xba0   : > { %3322 = vmatpush1.bf16.msra.mxu1 %v6504_v19  ;;  %3375 = vmatpush1.bf16.msra.mxu0 %v6507_v20  ;;  %v6525_v19 = vld [vmem:[%s7505_s16 + $0x2b0] ss:$24 sps:$4 sm:$0xff]   ;;  %v6530_v20 = vld [vmem:[%s7505_s16 + $0x284] ss:$24 sps:$4 sm:$0xff]  }
 0xba1   : > { %2941 = vadd.xlane.f32.xlu0 %v2936_v28  ;;  %2943 = vadd.xlane.f32.xlu1 %v2937_v22  ;;  %v7961_v37 = vmul.f32 %v7855_v17, %v2930_v0 }
 0xba2   : > { %3323 = vmatprep.subr.bf16.mxu1 %v6512_v26  ;;  %3376 = vmatprep.subr.bf16.mxu0 %v6515_v30 }
 0xba3   : > { %v2938_v45 = vmul.f32 %v7961_v37, %v7961_v37 }
 0xba4   : > { %3324 = vmatpush1.bf16.msra.mxu1 %v6510_v24  ;;  %3377 = vmatpush1.bf16.msra.mxu0 %v6513_v35  ;;  %v6528_v24 = vld [vmem:[%s7505_s16 + $0x280] ss:$24 sps:$4 sm:$0xff]  }
 0xba5   : > { %2945 = vadd.xlane.f32.xlu0 %v2938_v45  ;;  %3325 = vmatprep.subr.bf16.mxu1 %v6518_v9  ;;  %v6533_v9 = vld [vmem:[%s7505_s16 + $0x254] ss:$24 sps:$4 sm:$0xff]  }
 0xba6   : > { %3378 = vmatprep.subr.bf16.mxu0 %v6521_v41  ;;  %v6531_v41 = vld [vmem:[%s7505_s16 + $0x250] ss:$24 sps:$4 sm:$0xff]  }
 0xba8   : > { %3326 = vmatpush1.bf16.msra.mxu1 %v6516_v12  ;;  %3379 = vmatpush1.bf16.msra.mxu0 %v6519_v15  ;;  %v6536_v12 = vld [vmem:[%s7505_s16 + $0x224] ss:$24 sps:$4 sm:$0xff]   ;;  %v6534_v15 = vld [vmem:[%s7505_s16 + $0x220] ss:$24 sps:$4 sm:$0xff]  }
 0xba9   : > { %3417 = vmatprep.subr.bf16.mxu1 %v6524_v33  ;;  %6112 = vmatprep.subr.bf16.mxu0 %v7037_v27  ;;  %v6539_v33 = vld [vmem:[%s7505_s16 + $0x1f4] ss:$24 sps:$4 sm:$0xff]  }
 0xc26   : > { %v2940_v18 = vpop.xlane.xlu1 %2939 }
 0xc27   : > { %v2947_v21 = vmul.f32 0.03125, %v2940_v18  ;;  %v6537_v18 = vld [vmem:[%s7505_s16 + $0x1f0] ss:$24 sps:$4 sm:$0xff]  }
 0xc29   : > { %v2951_v34 = vadd.f32 1e-05, %v2947_v21  ;;  %v6542_v21 = vld [vmem:[%s7505_s16 + $0x1c4] ss:$24 sps:$4 sm:$0xff]  }
 0xc2a   : > { %v2942_v25 = vpop.xlane.xlu0 %2941  ;;  %v2944_v32 = vpop.xlane.xlu1 %2943 }
 0xc2b   : > { %6618 = vrsqrt.f32 %v2951_v34  ;;  %v2948_v39 = vmul.f32 0.03125, %v2942_v25  ;;  %v2949_v36 = vmul.f32 0.03125, %v2944_v32  ;;  %v6540_v34 = vld [vmem:[%s7505_s16 + $0x1c0] ss:$24 sps:$4 sm:$0xff]   ;;  %v6545_v25 = vld [vmem:[%s7505_s16 + $0x194] ss:$24 sps:$4 sm:$0xff]  }
 0xc2c   : > { %v6543_v32 = vld [vmem:[%s7505_s16 + $0x190] ss:$24 sps:$4 sm:$0xff]  }
 0xc2d   : > { %v2952_v0 = vadd.f32 1e-05, %v2948_v39  ;;  %v2953_v28 = vadd.f32 1e-05, %v2949_v36  ;;  %v8053_v39 = vld [vmem:[%s7513_s10 + $0x6] sm:$0x3f] }
 0xc2e   : > { %v2946_v22 = vpop.xlane.xlu0 %2945  ;;  %v3052_v36 = vrot.slane %v8053_v39, %v7539_v4  ;;  %s892_s10 = scalar_lea.vmem [#allocation17], %s5386_s25 }
 0xc2f   : > { %6620 = vrsqrt.f32 %v2952_v0  ;;  %v2950_v45 = vmul.f32 0.03125, %v2946_v22 }
 0xc30   : > { %6622 = vrsqrt.f32 %v2953_v28 }
 0xc31   : > { %v2954_v38 = vadd.f32 1e-05, %v2950_v45  ;;  %v3044_v45 = vrot.slane %v8053_v39, %v7536_v3 }
 0xc33   : > { %6624 = vrsqrt.f32 %v2954_v38 }
 0xc38   : > { %v6619_v47 = vpop.eup %6618 }
 0xc39   : > { %v2959_v48 = vmul.f32 %v6619_v47, %v7946_v29 }
 0xc3b   : > { %v2969_v62 = vmul.f32 %v5518_v40, %v2959_v48 }
 0xc3c   : > { %v6621_v23 = vpop.eup %6620 }
 0xc3d   : > { %v6623_v51 = vpop.eup %6622  ;;  %v2960_v54 = vmul.f32 %v6621_v23, %v7951_v49  ;;  %v2979_v46 = vadd.f32 %v5519_v43, %v2969_v62 }
 0xc3e   : > { %v2961_v56 = vmul.f32 %v6623_v51, %v7954_v42  ;;  %v6527_v42 = vld [vmem:[%s7505_s16 + $0x2b4] ss:$24 sps:$4 sm:$0xff]   ;;  %s5760_s16 = sshll.u32 %s7142_s22, 6  ;;  %s7040_s22 = smov [#allocation17]  }
 0xc3f   : > { %v2970_v59 = vmul.f32 %v5518_v40, %v2960_v54  ;;  %v8013_v57 = vmul.f32 %v2979_v46, %v7596_v52  ;;  %s6939_s25 = sshll.u32 %s7040_s22, 4  ;;  %s6940_s25 = int_to_ptr.vmem [resolvable:$false] %s6939_s25 }
 0xc40   : > { %v6625_v55 = vpop.eup %6624  ;;  %v2971_v7 = vmul.f32 %v5518_v40, %v2961_v56  ;;  %s6941_s28 = scalar_lea.vmem %s6940_s25, 128 }
 0xc41   : > { %v2980_v60 = vadd.f32 %v5519_v43, %v2970_v59  ;;  %v2962_v16 = vmul.f32 %v6625_v55, %v7961_v37 }
 0xc42   : > { %v2981_v37 = vadd.f32 %v5519_v43, %v2971_v7 }
 0xc43   : > { %v8016_v29 = vmul.f32 %v2980_v60, %v7600_v58  ;;  %v2972_v63 = vmul.f32 %v5518_v40, %v2962_v16 }
 0xc44   : > { %v8030_v30 = vmul.f32 %v2981_v37, %v7598_v53 }
 0xc45   : > { %v2987_v49 = vpack.c.bf16 %v8016_v29, %v8013_v57  ;;  %v2982_v13 = vadd.f32 %v5519_v43, %v2972_v63 }
 0xc47   : > { %3344 = vmatmul.mubr.bf16.vlgmr.msra.gmra.mxu1 %v2987_v49  ;;  %3397 = vmatmul.mubr.bf16.vlgmr.msra.gmra.mxu0 %v2987_v49  ;;  %v8027_v26 = vmul.f32 %v2982_v13, %v7609_v8 }
 0xc48   : > { %3418 = vmatpush1.bf16.msra.mxu1 %v6522_v11  ;;  %3353 = vmatprep.mubr.bf16.mxu1 %v7036_v1 }
 0xc49   : > { %3419 = vmatprep.subr.bf16.mxu1 %v6527_v42  ;;  %3406 = vmatprep.mubr.bf16.mxu0 %v7036_v1  ;;  %v2988_v35 = vpack.c.bf16 %v8027_v26, %v8030_v30 }
 0xc4c   : > { %3420 = vmatpush1.bf16.msra.mxu1 %v6525_v19 }
 0xc4d   : > { %3421 = vmatprep.subr.bf16.mxu1 %v6530_v20 }
 0xc4f   : > { %3354 = vmatmul.mubr.bf16.gmra.mxu1 %v2988_v35  ;;  %3407 = vmatmul.mubr.bf16.gmra.mxu0 %v2988_v35 }
 0xc50   : > { %3422 = vmatpush1.bf16.msra.mxu1 %v6528_v24  ;;  %3449 = vmatprep.mubr.bf16.mxu1 %v7036_v1  ;;  %v3060_v24 = vrot.slane %v8053_v39, %v1066_v61  ;;  %v8097_v61 = vrot.slane %v8053_v39, %v1070_v10 }
 0xc51   : > { %3423 = vmatprep.subr.bf16.mxu1 %v6533_v9  ;;  %6114 = vmatprep.mubr.msk.bf16.mxu0 %vm7038_vm0, %v7037_v27 }
 0xc54   : > { %3424 = vmatpush1.bf16.msra.mxu1 %v6531_v41 }
 0xc55   : > { %3425 = vmatprep.subr.bf16.mxu1 %v6536_v12 }
 0xc58   : > { %3426 = vmatpush1.bf16.msra.mxu1 %v6534_v15 }
 0xc59   : > { %3427 = vmatprep.subr.bf16.mxu1 %v6539_v33 }
 0xc5c   : > { %3428 = vmatpush1.bf16.msra.mxu1 %v6537_v18 }
 0xc5d   : > { %3429 = vmatprep.subr.bf16.mxu1 %v6542_v21 }
 0xc60   : > { %3430 = vmatpush1.bf16.msra.mxu1 %v6540_v34 }
 0xc61   : > { %3431 = vmatprep.subr.bf16.mxu1 %v6545_v25 }
 0xc64   : > { %3432 = vmatpush1.bf16.msra.mxu1 %v6543_v32 }
 0xc65   : > { %6118 = vmatprep.subr.bf16.mxu1 %v7037_v27 }
 0xc67   : > { %3450 = vmatmul.mubr.bf16.vlgmr.msra.gmra.mxu1 %v2987_v49 }
 0xc68   : > { %3459 = vmatprep.mubr.bf16.mxu1 %v7036_v1 }
 0xc6f   : > { %3460 = vmatmul.mubr.bf16.gmra.mxu1 %v2988_v35 }
 0xc70   : > { %6120 = vmatprep.mubr.msk.bf16.mxu1 %vm7038_vm0, %v7037_v27 }
 0xd07   : > { %v3345_v0 = vpop.f32.mrf.mxu1  ;;  %v3398_v28 = vpop.f32.mrf.mxu0 }
 0xd08   : > { %v3399_v22 = vadd.f32 %v3398_v28, %v3052_v36  ;;  %v3346_v23 = vadd.f32 %v3345_v0, %v3044_v45 }
 0xd09   : > { %v8059_v38 = vpop.f32.mrf.mxu1  ;;  %v8061_v47 = vpop.f32.mrf.mxu0 }
 0xd0a   : > { %v5796_v1 = vpack.c.bf16 %v3399_v22, %v3399_v22  ;;  %v5792_v46 = vpack.c.bf16 %v3346_v23, %v3346_v23 }
 0xd0b   : > { %v3349_v40 = vpop.f32.mrf.mxu1  ;;  %v3402_v48 = vpop.f32.mrf.mxu0 }
 0xd0c   : > { %v3403_v62 = vadd.f32 %v3402_v48, %v3052_v36  ;;  %6113 = vmatpush3.bf16.xpose.msra.mxu0 %v5796_v1  ;;  %v3350_v56 = vadd.f32 %v3349_v40, %v3044_v45 }
 0xd0d   : > { %v8063_v43 = vpop.f32.mrf.mxu1  ;;  %v8065_v51 = vpop.f32.mrf.mxu0  ;;  %6124 = vmatprep.subr.bf16.mxu0 %v7037_v27 }
 0xd0e   : > { %v5797_v4 = vpack.c.bf16 %v3403_v62, %v3403_v62  ;;  %v5793_v11 = vpack.c.bf16 %v3350_v56, %v3350_v56 }
 0xd0f   : > { %v3355_v54 = vpop.f32.mrf.mxu1  ;;  %v3408_v59 = vpop.f32.mrf.mxu0 }
 0xd10   : > { %v3409_v3 = vadd.f32 %v3408_v59, %v3052_v36  ;;  %6119 = vmatpush3.bf16.xpose.msra.mxu1 %v5797_v4  ;;  %v3356_v49 = vadd.f32 %v3355_v54, %v3044_v45 }
 0xd11   : > { %v8068_v55 = vpop.f32.mrf.mxu0  ;;  %6130 = vmatprep.subr.bf16.mxu1 %v7037_v27  ;;  %v8071_v16 = vpop.f32.mrf.mxu1 }
 0xd12   : > { %v5798_v60 = vpack.c.bf16 %v3409_v3, %v3409_v3  ;;  %v5794_v37 = vpack.c.bf16 %v3356_v49, %v3356_v49 }
 0xd13   : > { %v3412_v7 = vpop.f32.mrf.mxu0  ;;  %6115 = vmatmul.mubr.bf16.vlgmr.msra.gmra.mxu0 %v5792_v46  ;;  %v3359_v42 = vpop.f32.mrf.mxu1 }
 0xd14   : > { %v3413_v63 = vadd.f32 %v3412_v7, %v3052_v36  ;;  %6125 = vmatpush3.bf16.xpose.msra.mxu0 %v5798_v60  ;;  %6126 = vmatprep.mubr.msk.bf16.mxu0 %vm7038_vm0, %v7037_v27  ;;  %v3360_v19 = vadd.f32 %v3359_v42, %v3044_v45 }
 0xd15   : > { %6136 = vmatprep.subr.bf16.mxu0 %v7037_v27  ;;  %v8086_v35 = vpop.f32.mrf.mxu1  ;;  %v8108_v40 = vpop.f32.mrf.mxu0 }
 0xd16   : > { %v5799_v13 = vpack.c.bf16 %v3413_v63, %v3413_v63  ;;  %v5795_v20 = vpack.c.bf16 %v3360_v19, %v3360_v19 }
 0xd17   : > { %6121 = vmatmul.mubr.bf16.vlgmr.msra.gmra.mxu1 %v5793_v11 }
 0xd18   : > { %6131 = vmatpush3.bf16.xpose.msra.mxu1 %v5799_v13  ;;  %6132 = vmatprep.mubr.msk.bf16.mxu1 %vm7038_vm0, %v7037_v27 }
 0xd19   : > { %6142 = vmatprep.subr.bf16.mxu1 %v7037_v27 }
 0xd1b   : > { %6127 = vmatmul.mubr.bf16.vlgmr.msra.gmra.mxu0 %v5794_v37 }
 0xd1c   : > { %6138 = vmatprep.mubr.msk.bf16.mxu0 %vm7038_vm0, %v7037_v27 }
 0xd1f   : > { %6133 = vmatmul.mubr.bf16.vlgmr.msra.gmra.mxu1 %v5795_v20 }
 0xd20   : > { %6144 = vmatprep.mubr.msk.bf16.mxu1 %vm7038_vm0, %v7037_v27 }
 0xd27   : > { %v3451_v9 = vpop.f32.mrf.mxu1 }
 0xd28   : > { %v3452_v41 = vadd.f32 %v3451_v9, %v3060_v24 }
 0xd29   : > { %v8088_v12 = vpop.f32.mrf.mxu1 }
 0xd2a   : > { %v5800_v15 = vpack.c.bf16 %v3452_v41, %v3452_v41 }
 0xd2b   : > { %v3455_v33 = vpop.f32.mrf.mxu1 }
 0xd2c   : > { %v3740_v18 = vsel %vm1767_vm1, %v5800_v15, 0  ;;  %v3456_v21 = vadd.f32 %v3455_v33, %v3060_v24 }
 0xd2d   : > { %v8091_v34 = vpop.f32.mrf.mxu1  ;;  %6137 = vmatpush3.bf16.msra.mxu0 %v3740_v18 }
 0xd2e   : > { %v5801_v25 = vpack.c.bf16 %v3456_v21, %v3456_v21  ;;  %6148 = vmatprep.subr.bf16.mxu0 %v7037_v27 }
 0xd2f   : > { %v3461_v32 = vpop.f32.mrf.mxu1 }
 0xd30   : > { %v3786_v36 = vsel %vm1767_vm1, %v5801_v25, 0  ;;  %v8100_v0 = vadd.f32 %v3461_v32, %v3060_v24 }
 0xd31   : > { %v3463_v28 = vpop.f32.mrf.mxu1  ;;  %6143 = vmatpush3.bf16.msra.mxu1 %v3786_v36 }
 0xd32   : > { %v8103_v22 = vadd.f32 %v3463_v28, %v8097_v61  ;;  %6154 = vmatprep.subr.bf16.mxu1 %v7037_v27 }
 0xd33   : > { %v3465_v45 = vpop.f32.mrf.mxu1 }
 0xd34   : > { %v8106_v1 = vadd.f32 %v3465_v45, %v3060_v24 }
 0xd35   : > { %v8110_v10 = vpop.f32.mrf.mxu1 }
 0xdd3   : > { %v3554_v2 = vpop.f32.mrf.mxu0 }
 0xdd4   : > { %v3680_v48 = vmul.f32 0.25, %v3554_v2 }
 0xdd5   : > { %v6116_v62 = vpop.f32.mrf.mxu0 }
 0xdd6   : > { %v3684_v23 = vadd.f32 %v3680_v48, %v7708_v50 }
 0xdd7   : > { %v3557_v4 = vpop.f32.mrf.mxu0  ;;  %v3594_v54 = vpop.f32.mrf.mxu1 }
 0xdd8   : > { %v3681_v59 = vmul.f32 0.25, %v3594_v54  ;;  %v3688_v3 = vsel %vm1715_vm2, %v3684_v23, -inf }
 0xdd9   : > { %3689 = vmax.xlane.f32.xlu1 %v3688_v3  ;;  %v6117_v46 = vpop.f32.mrf.mxu0  ;;  %v6122_v56 = vpop.f32.mrf.mxu1 }
 0xdda   : > { %v3685_v60 = vadd.f32 %v3681_v59, %v7713_v14 }
 0xddb   : > { %v3597_v7 = vpop.f32.mrf.mxu1  ;;  %v3634_v63 = vpop.f32.mrf.mxu0 }
 0xddc   : > { %v3682_v11 = vmul.f32 0.25, %v3634_v63  ;;  %v3691_v49 = vsel %vm1715_vm2, %v3685_v60, -inf }
 0xddd   : > { %3692 = vmax.xlane.f32.xlu0 %v3691_v49  ;;  %v6123_v42 = vpop.f32.mrf.mxu1  ;;  %v6128_v13 = vpop.f32.mrf.mxu0 }
 0xdde   : > { %v3686_v37 = vadd.f32 %v3682_v11, %v7718_v31 }
 0xddf   : > { %v3637_v19 = vpop.f32.mrf.mxu0  ;;  %v3674_v20 = vpop.f32.mrf.mxu1 }
 0xde0   : > { %v3683_v24 = vmul.f32 0.25, %v3674_v20  ;;  %v3694_v9 = vsel %vm1715_vm2, %v3686_v37, -inf }
 0xde1   : > { %v6134_v41 = vpop.f32.mrf.mxu1  ;;  %3695 = vmax.xlane.f32.xlu1 %v3694_v9  ;;  %v6129_v15 = vpop.f32.mrf.mxu0  ;;  %v5802_v9 = vpack.c.bf16 %v8100_v0, %v8100_v0 }
 0xde2   : > { %v3687_v33 = vadd.f32 %v3683_v24, %v7723_v44 }
 0xde3   : > { %v3677_v18 = vpop.f32.mrf.mxu1 }
 0xde4   : > { %v3697_v21 = vsel %vm1715_vm2, %v3687_v33, -inf  ;;  %v3056_v18 = vrot.slane %v8053_v39, %v7545_v6 }
 0xde5   : > { %3698 = vmax.xlane.f32.xlu0 %v3697_v21  ;;  %v6135_v25 = vpop.f32.mrf.mxu1  ;;  %v3832_v21 = vsel %vm1767_vm1, %v5802_v9, 0 }
 0xde6   : > { %v5803_v25 = vpack.c.bf16 %v8106_v1, %v8106_v1  ;;  %v3048_v1 = vrot.slane %v8053_v39, %v7542_v5  ;;  %v3411_v39 = vadd.f32 %v8068_v55, %v3056_v18 }
 0xde8   : > { %v3878_v6 = vsel %vm1767_vm1, %v5803_v25, 0 }
 0xe62   : > { %v3690_v32 = vpop.xlane.xlu1 %3689 }
 0xe63   : > { %v3700_v36 = vsub.f32 %v3684_v23, %v3690_v32 }
 0xe65   : > { %v3704_v28 = vmul.f32 1.442695, %v3700_v36 }
 0xe66   : > { %v3693_v45 = vpop.xlane.xlu0 %3692 }
 0xe67   : > { %6626 = vpow2.f32 %v3704_v28  ;;  %v3701_v2 = vsub.f32 %v3685_v60, %v3693_v45  ;;  %v3401_v28 = vadd.f32 %v8061_v47, %v3056_v18 }
 0xe69   : > { %v3706_v48 = vmul.f32 1.442695, %v3701_v2 }
 0xe6a   : > { %v3696_v62 = vpop.xlane.xlu1 %3695 }
 0xe6b   : > { %6628 = vpow2.f32 %v3706_v48  ;;  %v3702_v4 = vsub.f32 %v3686_v37, %v3696_v62  ;;  %v5808_v62 = vpack.c.bf16 %v3401_v28, %v3401_v28 }
 0xe6d   : > { %v3708_v54 = vmul.f32 1.442695, %v3702_v4  ;;  %v3405_v4 = vadd.f32 %v8065_v51, %v3056_v18 }
 0xe6e   : > { %v3699_v59 = vpop.xlane.xlu0 %3698 }
 0xe6f   : > { %6630 = vpow2.f32 %v3708_v54  ;;  %v3703_v3 = vsub.f32 %v3687_v33, %v3699_v59  ;;  %v3348_v54 = vadd.f32 %v8059_v38, %v3048_v1  ;;  %v5809_v5 = vpack.c.bf16 %v3405_v4, %v3405_v4 }
 0xe70   : > { %v3415_v38 = vadd.f32 %v8108_v40, %v3056_v18  ;;  %v3362_v40 = vadd.f32 %v8086_v35, %v3048_v1 }
 0xe71   : > { %v3710_v46 = vmul.f32 1.442695, %v3703_v3  ;;  %v5804_v51 = vpack.c.bf16 %v3348_v54, %v3348_v54  ;;  %v3352_v3 = vadd.f32 %v8063_v43, %v3048_v1 }
 0xe73   : > { %6632 = vpow2.f32 %v3710_v46  ;;  %v5810_v46 = vpack.c.bf16 %v3411_v39, %v3411_v39  ;;  %v5805_v55 = vpack.c.bf16 %v3352_v3, %v3352_v3 }
 0xe74   : > { %v6627_v56 = vpop.eup %6626 }
 0xe75   : > { %v3712_v7 = vsel %vm1715_vm2, %v6627_v56, 0.0 }
 0xe76   : > { %3713 = vadd.xlane.f32.xlu1 %v3712_v7  ;;  %v3358_v7 = vadd.f32 %v8071_v16, %v3048_v1 }
 0xe78   : > { %v6629_v63 = vpop.eup %6628 }
 0xe79   : > { %v3715_v23 = vsel %vm1715_vm2, %v6629_v63, 0.0 }
 0xe7a   : > { %3716 = vadd.xlane.f32.xlu0 %v3715_v23  ;;  %v3458_v23 = vadd.f32 %v8091_v34, %v8097_v61 }
 0xe7c   : > { %v6631_v11 = vpop.eup %6630  ;;  %v5813_v16 = vpack.c.bf16 %v3458_v23, %v3458_v23 }
 0xe7d   : > { %v3718_v60 = vsel %vm1715_vm2, %v6631_v11, 0.0 }
 0xe7e   : > { %3719 = vadd.xlane.f32.xlu1 %v3718_v60  ;;  %v5807_v60 = vpack.c.bf16 %v3362_v40, %v3362_v40  ;;  %v4224_v34 = vsel %vm1767_vm1, %v5813_v16, 0 }
 0xe80   : > { %v6633_v49 = vpop.eup %6632 }
 0xe81   : > { %v3721_v42 = vsel %vm1715_vm2, %v6633_v49, 0.0 }
 0xe82   : > { %3722 = vadd.xlane.f32.xlu0 %v3721_v42 }
 0xeff   : > { %v3714_v13 = vpop.xlane.xlu1 %3713 }
 0xf00   : > { %6634 = vrcp.f32 %v3714_v13 }
 0xf03   : > { %v3717_v37 = vpop.xlane.xlu0 %3716 }
 0xf04   : > { %6636 = vrcp.f32 %v3717_v37 }
 0xf07   : > { %v3720_v19 = vpop.xlane.xlu1 %3719 }
 0xf08   : > { %6638 = vrcp.f32 %v3720_v19 }
 0xf0b   : > { %v3723_v20 = vpop.xlane.xlu0 %3722 }
 0xf0c   : > { %6640 = vrcp.f32 %v3723_v20 }
 0xf0d   : > { %v6635_v24 = vpop.eup %6634 }
 0xf0e   : > { %v3728_v41 = vmul.f32 %v6635_v24, %v6627_v56  ;;  %v3454_v56 = vadd.f32 %v8088_v12, %v8097_v61  ;;  %v5806_v12 = vpack.c.bf16 %v3358_v7, %v3358_v7 }
 0xf10   : > { %v3732_v15 = vpack.c.bf16 %v3728_v41, %v3728_v41  ;;  %v5812_v43 = vpack.c.bf16 %v3454_v56, %v3454_v56 }
 0xf11   : > { %v6637_v33 = vpop.eup %6636 }
 0xf12   : > { %6139 = vmatmul.mubr.msk.bf16.vlgmr.msra.gmra.mxu0 %vm1715_vm2, %v3732_v15  ;;  %v3729_v32 = vmul.f32 %v6637_v33, %v6629_v63  ;;  %v5811_v63 = vpack.c.bf16 %v3415_v38, %v3415_v38 }
 0xf13   : > { %6149 = vmatpush3.bf16.msra.mxu0 %v3832_v21  ;;  %6150 = vmatprep.mubr.msk.bf16.mxu0 %vm7038_vm0, %v7037_v27 }
 0xf14   : > { %v3733_v36 = vpack.c.bf16 %v3729_v32, %v3729_v32  ;;  %6160 = vmatprep.subr.bf16.mxu0 %v7037_v27 }
 0xf15   : > { %v6639_v0 = vpop.eup %6638 }
 0xf16   : > { %6145 = vmatmul.mubr.msk.bf16.vlgmr.msra.gmra.mxu1 %vm1715_vm2, %v3733_v36  ;;  %v3730_v45 = vmul.f32 %v6639_v0, %v6631_v11  ;;  %v4178_v11 = vsel %vm1767_vm1, %v5812_v43, 0 }
 0xf17   : > { %6155 = vmatpush3.bf16.msra.mxu1 %v3878_v6  ;;  %6156 = vmatprep.mubr.msk.bf16.mxu1 %vm7038_vm0, %v7037_v27 }
 0xf18   : > { %v3734_v2 = vpack.c.bf16 %v3730_v45, %v3730_v45  ;;  %6166 = vmatprep.subr.bf16.mxu1 %v7037_v27 }
 0xf19   : > { %v6641_v48 = vpop.eup %6640 }
 0xf1a   : > { %6151 = vmatmul.mubr.msk.bf16.vlgmr.msra.gmra.mxu0 %vm1715_vm2, %v3734_v2  ;;  %v3731_v47 = vmul.f32 %v6641_v48, %v6633_v49 }
 0xf1b   : > { %6161 = vmatpush3.bf16.xpose.msra.mxu0 %v5808_v62  ;;  %6162 = vmatprep.mubr.msk.bf16.mxu0 %vm7038_vm0, %v7037_v27 }
 0xf1c   : > { %v3735_v59 = vpack.c.bf16 %v3731_v47, %v3731_v47  ;;  %6172 = vmatprep.subr.bf16.mxu0 %v7037_v27 }
 0xf1e   : > { %6157 = vmatmul.mubr.msk.bf16.vlgmr.msra.gmra.mxu1 %vm1715_vm2, %v3735_v59 }
 0xf1f   : > { %6167 = vmatpush3.bf16.xpose.msra.mxu1 %v5809_v5  ;;  %6168 = vmatprep.mubr.msk.bf16.mxu1 %vm7038_vm0, %v7037_v27 }
 0xf20   : > { %6178 = vmatprep.subr.bf16.mxu1 %v7037_v27 }
 0xf22   : > { %6163 = vmatmul.mubr.bf16.vlgmr.msra.gmra.mxu0 %v5804_v51 }
 0xf23   : > { %6173 = vmatpush3.bf16.xpose.msra.mxu0 %v5810_v46  ;;  %6174 = vmatprep.mubr.msk.bf16.mxu0 %vm7038_vm0, %v7037_v27 }
 0xf24   : > { %6184 = vmatprep.subr.bf16.mxu0 %v7037_v27 }
 0xf26   : > { %6169 = vmatmul.mubr.bf16.vlgmr.msra.gmra.mxu1 %v5805_v55 }
 0xf27   : > { %6179 = vmatpush3.bf16.xpose.msra.mxu1 %v5811_v63  ;;  %6180 = vmatprep.mubr.msk.bf16.mxu1 %vm7038_vm0, %v7037_v27 }
 0xf28   : > { %6190 = vmatprep.subr.bf16.mxu1 %v7037_v27 }
 0xf2a   : > { %6175 = vmatmul.mubr.bf16.vlgmr.msra.gmra.mxu0 %v5806_v12 }
 0xf2b   : > { %6185 = vmatpush3.bf16.msra.mxu0 %v4178_v11  ;;  %6186 = vmatprep.mubr.msk.bf16.mxu0 %vm7038_vm0, %v7037_v27 }
 0xf2c   : > { %6196 = vmatprep.subr.bf16.mxu0 %v7037_v27 }
 0xf2e   : > { %6181 = vmatmul.mubr.bf16.vlgmr.msra.gmra.mxu1 %v5807_v60 }
 0xf2f   : > { %6191 = vmatpush3.bf16.msra.mxu1 %v4224_v34  ;;  %6192 = vmatprep.mubr.msk.bf16.mxu1 %vm7038_vm0, %v7037_v27 }
 0xf30   : > { %6202 = vmatprep.subr.bf16.mxu1 %v7037_v27 }
 0xfd2   : > { %v8176_v35 = vpop.f32.mrf.mxu0 }
 0xfd4   : > { %v6140_v49 = vpop.f32.mrf.mxu0 }
 0xfd6   : > { %v3779_v42 = vpop.f32.mrf.mxu0  ;;  %v8178_v13 = vpop.f32.mrf.mxu1 }
 0xfd7   : > { %v4358_v37 = vpack.c.bf16 %v8178_v13, %v8176_v35 }
 0xfd8   : > { %v6141_v19 = vpop.f32.mrf.mxu0  ;;  %v6146_v20 = vpop.f32.mrf.mxu1 }
 0xfda   : > { %v3825_v24 = vpop.f32.mrf.mxu1  ;;  %v8182_v9 = vpop.f32.mrf.mxu0 }
 0xfdc   : > { %v6147_v41 = vpop.f32.mrf.mxu1  ;;  %v6152_v15 = vpop.f32.mrf.mxu0 }
 0xfde   : > { %v3871_v33 = vpop.f32.mrf.mxu0  ;;  %v8184_v18 = vpop.f32.mrf.mxu1 }
 0xfdf   : > { %v4360_v21 = vpack.c.bf16 %v8184_v18, %v8182_v9 }
 0xfe0   : > { %v6153_v25 = vpop.f32.mrf.mxu0  ;;  %v6158_v32 = vpop.f32.mrf.mxu1 }
 0xfe2   : > { %v3917_v36 = vpop.f32.mrf.mxu1  ;;  %v3992_v0 = vpop.f32.mrf.mxu0 }
 0xfe3   : > { %v4118_v28 = vmul.f32 0.25, %v3992_v0 }
 0xfe4   : > { %v6159_v6 = vpop.f32.mrf.mxu1  ;;  %v6164_v45 = vpop.f32.mrf.mxu0 }
 0xfe5   : > { %v4122_v1 = vadd.f32 %v4118_v28, %v7708_v50 }
 0xfe6   : > { %v3995_v2 = vpop.f32.mrf.mxu0  ;;  %v4032_v48 = vpop.f32.mrf.mxu1 }
 0xfe7   : > { %v4119_v62 = vmul.f32 0.25, %v4032_v48  ;;  %v4126_v4 = vsel %vm1715_vm2, %v4122_v1, -inf }
 0xfe8   : > { %v6170_v47 = vpop.f32.mrf.mxu1  ;;  %4127 = vmax.xlane.f32.xlu1 %v4126_v4  ;;  %v6165_v54 = vpop.f32.mrf.mxu0 }
 0xfe9   : > { %v4123_v59 = vadd.f32 %v4119_v62, %v7713_v14  ;;  %v5814_v47 = vpack.c.bf16 %v8103_v22, %v8103_v22  ;;  %v3468_v54 = vadd.f32 %v8110_v10, %v8097_v61 }
 0xfea   : > { %v4035_v5 = vpop.f32.mrf.mxu1  ;;  %v4072_v39 = vpop.f32.mrf.mxu0 }
 0xfeb   : > { %v4120_v51 = vmul.f32 0.25, %v4072_v39  ;;  %v4129_v3 = vsel %vm1715_vm2, %v4123_v59, -inf  ;;  %v6546_v39 = vld [vmem:[%s7515_s3 + $0xf8] sm:$0xff]  }
 0xfec   : > { %4130 = vmax.xlane.f32.xlu0 %v4129_v3  ;;  %v6171_v46 = vpop.f32.mrf.mxu1  ;;  %v6176_v38 = vpop.f32.mrf.mxu0  ;;  %v4270_v3 = vsel %vm1767_vm1, %v5814_v47, 0 }
 0xfed   : > { %v4124_v50 = vadd.f32 %v4120_v51, %v7718_v31  ;;  %v5815_v46 = vpack.c.bf16 %v3468_v54, %v3468_v54 }
 0xfee   : > { %v4075_v56 = vpop.f32.mrf.mxu0  ;;  %v4112_v55 = vpop.f32.mrf.mxu1 }
 0xfef   : > { %v4121_v7 = vmul.f32 0.25, %v4112_v55  ;;  %v4132_v63 = vsel %vm1715_vm2, %v4124_v50, -inf  ;;  %v4316_v10 = vsel %vm1767_vm1, %v5815_v46, 0  ;;  %v6547_v56 = vld [vmem:[%s7515_s3 + $0xb8] sm:$0xff]  }
 0xff0   : > { %v6182_v43 = vpop.f32.mrf.mxu1  ;;  %4133 = vmax.xlane.f32.xlu1 %v4132_v63  ;;  %v6177_v23 = vpop.f32.mrf.mxu0 }
 0xff1   : > { %v4125_v14 = vadd.f32 %v4121_v7, %v7723_v44  ;;  %v6548_v7 = vld [vmem:[%s7515_s3 + $0xf0] sm:$0xff]  }
 0xff2   : > { %v4115_v12 = vpop.f32.mrf.mxu1  ;;  %v6549_v23 = vld [vmem:[%s7515_s3 + $0xb0] sm:$0xff]  }
 0xff3   : > { %v4135_v40 = vsel %vm1715_vm2, %v4125_v14, -inf  ;;  %v6550_v12 = vld [vmem:[%s7515_s3 + $0xe8] sm:$0xff]  }
 0xff4   : > { %4136 = vmax.xlane.f32.xlu0 %v4135_v40  ;;  %v6183_v11 = vpop.f32.mrf.mxu1  ;;  %v6552_v40 = vld [vmem:[%s7515_s3 + $0xe0] sm:$0xff]  }
 0xff5   : > { %v6553_v11 = vld [vmem:[%s7515_s3 + $0xa0] sm:$0xff]  }
0x1071   : > { %v4128_v16 = vpop.xlane.xlu1 %4127 }
0x1072   : > { %v4138_v60 = vsub.f32 %v4122_v1, %v4128_v16  ;;  %v6554_v16 = vld [vmem:[%s7515_s3 + $0xd8] sm:$0xff]  }
0x1074   : > { %v4142_v34 = vmul.f32 1.442695, %v4138_v60  ;;  %v6555_v60 = vld [vmem:[%s7515_s3 + $0x98] sm:$0xff]  }
0x1075   : > { %v4131_v49 = vpop.xlane.xlu0 %4130 }
0x1076   : > { %6642 = vpow2.f32 %v4142_v34  ;;  %v4139_v31 = vsub.f32 %v4123_v59, %v4131_v49  ;;  %v6556_v34 = vld [vmem:[%s7515_s3 + $0xd0] sm:$0xff]  }
0x1077   : > { %v6557_v49 = vld [vmem:[%s7515_s3 + $0x90] sm:$0xff]  }
0x1078   : > { %v4144_v42 = vmul.f32 1.442695, %v4139_v31  ;;  %v6558_v31 = vld [vmem:[%s7515_s3 + $0xc8] sm:$0xff]  }
0x1079   : > { %v4134_v19 = vpop.xlane.xlu1 %4133 }
0x107a   : > { %6644 = vpow2.f32 %v4144_v42  ;;  %v4140_v20 = vsub.f32 %v4124_v50, %v4134_v19  ;;  %v6559_v42 = vld [vmem:[%s7515_s3 + $0x88] sm:$0xff]   ;;  %v6560_v19 = vld [vmem:[%s7515_s3 + $0xc0] sm:$0xff]  }
0x107c   : > { %v4146_v24 = vmul.f32 1.442695, %v4140_v20  ;;  %v6561_v20 = vld [vmem:[%s7515_s3 + $0x80] sm:$0xff]  }
0x107d   : > { %v4137_v41 = vpop.xlane.xlu0 %4136 }
0x107e   : > { %6646 = vpow2.f32 %v4146_v24  ;;  %v4141_v15 = vsub.f32 %v4125_v14, %v4137_v41 }
0x1080   : > { %v4148_v44 = vmul.f32 1.442695, %v4141_v15 }
0x1082   : > { %6648 = vpow2.f32 %v4148_v44 }
0x1083   : > { %v6643_v33 = vpop.eup %6642 }
0x1084   : > { %v4150_v25 = vsel %vm1715_vm2, %v6643_v33, 0.0 }
0x1085   : > { %4151 = vadd.xlane.f32.xlu1 %v4150_v25 }
0x1087   : > { %v6645_v32 = vpop.eup %6644 }
0x1088   : > { %v4153_v36 = vsel %vm1715_vm2, %v6645_v32, 0.0 }
0x1089   : > { %4154 = vadd.xlane.f32.xlu0 %v4153_v36 }
0x108b   : > { %v6647_v0 = vpop.eup %6646 }
0x108c   : > { %v4156_v28 = vsel %vm1715_vm2, %v6647_v0, 0.0 }
0x108d   : > { %4157 = vadd.xlane.f32.xlu1 %v4156_v28 }
0x108f   : > { %v6649_v6 = vpop.eup %6648 }
0x1090   : > { %v4159_v45 = vsel %vm1715_vm2, %v6649_v6, 0.0 }
0x1091   : > { %4160 = vadd.xlane.f32.xlu0 %v4159_v45 }
0x110e   : > { %v4152_v1 = vpop.xlane.xlu1 %4151 }
0x110f   : > { %6650 = vrcp.f32 %v4152_v1 }
0x1112   : > { %v4155_v2 = vpop.xlane.xlu0 %4154 }
0x1113   : > { %6652 = vrcp.f32 %v4155_v2 }
0x1116   : > { %v4158_v48 = vpop.xlane.xlu1 %4157 }
0x1117   : > { %6654 = vrcp.f32 %v4158_v48 }
0x111a   : > { %v4161_v62 = vpop.xlane.xlu0 %4160 }
0x111b   : > { %6656 = vrcp.f32 %v4161_v62 }
0x111c   : > { %v6651_v4 = vpop.eup %6650 }
0x111d   : > { %v4166_v59 = vmul.f32 %v6651_v4, %v6643_v33 }
0x111f   : > { %v4170_v5 = vpack.c.bf16 %v4166_v59, %v4166_v59  ;;  %v5682_v59 = vld [vmem:[%s7851_s17 + $0x1] ss:$0 sm:$0xff]  ;;  %s8318_s17 = scalar_lea.hbm %s8433_s26, %s5760_s16 }
0x1120   : > { %v6653_v51 = vpop.eup %6652 }
0x1121   : > { %6187 = vmatmul.mubr.msk.bf16.vlgmr.msra.gmra.mxu0 %vm1715_vm2, %v4170_v5  ;;  %v4167_v38 = vmul.f32 %v6653_v51, %v6645_v32 }
0x1122   : > { %6197 = vmatpush3.bf16.msra.mxu0 %v4270_v3  ;;  %6198 = vmatprep.mubr.msk.bf16.mxu0 %vm7038_vm0, %v7037_v27 }
0x1123   : > { %v4171_v22 = vpack.c.bf16 %v4167_v38, %v4167_v38  ;;  %5928 = vmatprep.subr.bf16.mxu0 %v6546_v39 }
0x1124   : > { %v6655_v61 = vpop.eup %6654 }
0x1125   : > { %6193 = vmatmul.mubr.msk.bf16.vlgmr.msra.gmra.mxu1 %vm1715_vm2, %v4171_v22  ;;  %v4168_v50 = vmul.f32 %v6655_v61, %v6647_v0 }
0x1126   : > { %6203 = vmatpush3.bf16.msra.mxu1 %v4316_v10  ;;  %6204 = vmatprep.mubr.msk.bf16.mxu1 %vm7038_vm0, %v7037_v27  ;;  %v6551_v27 = vld [vmem:[%s7515_s3 + $0xa8] sm:$0xff]   ;;  %s5046_s3 = sshll.u32 %s892_s10, 4  ;;  %s5047_s3 = int_to_ptr.vmem [resolvable:$true] %s5046_s3 }
0x1127   : > { %v4172_v55 = vpack.c.bf16 %v4168_v50, %v4168_v50  ;;  %p6942_p3 = scmp.lt.s32.totalorder %s5047_s3, %s6940_s25 }
0x1128   : > { %v6657_v63 = vpop.eup %6656 }
0x1129   : > { %6199 = vmatmul.mubr.msk.bf16.vlgmr.msra.gmra.mxu0 %vm1715_vm2, %v4172_v55  ;;  %v4169_v43 = vmul.f32 %v6657_v63, %v6649_v6 }
0x112a   : > { %5929 = vmatpush3.bf16.msra.mxu0 %v6547_v56 }
0x112b   : > { %v4173_v14 = vpack.c.bf16 %v4169_v43, %v4169_v43  ;;  %5930 = vmatprep.subr.bf16.mxu0 %v6548_v7 }
0x112d   : > { %6205 = vmatmul.mubr.msk.bf16.vlgmr.msra.gmra.mxu1 %vm1715_vm2, %v4173_v14 }
0x112e   : > { %5931 = vmatpush3.bf16.msra.mxu0 %v6549_v23 }
0x112f   : > { %5932 = vmatprep.subr.bf16.mxu0 %v6550_v12 }
0x1132   : > { %5933 = vmatpush3.bf16.msra.mxu0 %v6551_v27 }
0x1133   : > { %5934 = vmatprep.subr.bf16.mxu0 %v6552_v40 }
0x1136   : > { %5935 = vmatpush3.bf16.msra.mxu0 %v6553_v11 }
0x1137   : > { %5936 = vmatprep.subr.bf16.mxu0 %v6554_v16 }
0x113a   : > { %5937 = vmatpush3.bf16.msra.mxu0 %v6555_v60 }
0x113b   : > { %5938 = vmatprep.subr.bf16.mxu0 %v6556_v34 }
0x113e   : > { %5939 = vmatpush3.bf16.msra.mxu0 %v6557_v49 }
0x113f   : > { %5940 = vmatprep.subr.bf16.mxu0 %v6558_v31 }
0x1142   : > { %5941 = vmatpush3.bf16.msra.mxu0 %v6559_v42 }
0x1143   : > { %5942 = vmatprep.subr.bf16.mxu0 %v6560_v19 }
0x1146   : > { %5943 = vmatpush3.bf16.msra.mxu0 %v6561_v20 }
0x11e1   : > { %v4214_v24 = vpop.f32.mrf.mxu0 }
0x11e3   : > { %v6188_v41 = vpop.f32.mrf.mxu0 }
0x11e5   : > { %v4217_v15 = vpop.f32.mrf.mxu0  ;;  %v4260_v44 = vpop.f32.mrf.mxu1 }
0x11e6   : > { %v4359_v33 = vpack.c.bf16 %v4260_v44, %v4214_v24 }
0x11e7   : > { %v6189_v25 = vpop.f32.mrf.mxu0  ;;  %v6194_v32 = vpop.f32.mrf.mxu1 }
0x11e8   : > { %4531 = vmatprep.mubr.bf16.mxu0 %v4359_v33  ;;  %v6562_v33 = vld [vmem:[%s7522_s27 + $0x78] sm:$0xff]   ;;  %v6563_v25 = vld [vmem:[%s7522_s27 + $0x70] sm:$0xff]   ;;  %v6564_v32 = vld [vmem:[%s7522_s27 + $0x68] sm:$0xff]  }
0x11e9   : > { %v4263_v36 = vpop.f32.mrf.mxu1  ;;  %v4306_v0 = vpop.f32.mrf.mxu0  ;;  %4532 = vmatmul.mubr.bf16.vlgmr.msra.gmra.mxu0 %v4358_v37  ;;  %6208 = vmatprep.subr.bf16.mxu1 %v6562_v33 }
0x11ea   : > { %6209 = vmatpush3.bf16.msra.mxu1 %v6562_v33  ;;  %v6565_v36 = vld [vmem:[%s7522_s27 + $0x60] sm:$0xff]  }
0x11eb   : > { %v6195_v28 = vpop.f32.mrf.mxu1  ;;  %v6200_v6 = vpop.f32.mrf.mxu0  ;;  %6210 = vmatprep.subr.bf16.mxu1 %v6563_v25 }
0x11ec   : > { %v6567_v28 = vld [vmem:[%s7522_s27 + $0x50] sm:$0xff]   ;;  %v6568_v6 = vld [vmem:[%s7522_s27 + $0x48] sm:$0xff]  }
0x11ed   : > { %v4309_v45 = vpop.f32.mrf.mxu0  ;;  %v4352_v1 = vpop.f32.mrf.mxu1 }
0x11ee   : > { %v4361_v2 = vpack.c.bf16 %v4352_v1, %v4306_v0  ;;  %6211 = vmatpush3.bf16.msra.mxu1 %v6563_v25  ;;  %v6566_v0 = vld [vmem:[%s7522_s27 + $0x58] sm:$0xff]   ;;  %v6569_v45 = vld [vmem:[%s7522_s27 + $0x40] sm:$0xff]  }
0x11ef   : > { %v6201_v48 = vpop.f32.mrf.mxu0  ;;  %v6206_v62 = vpop.f32.mrf.mxu1  ;;  %6212 = vmatprep.subr.bf16.mxu1 %v6564_v32  ;;  %v6570_v1 = vld [vmem:[%s7524_s6 + $0x78] sm:$0xff]  }
0x11f0   : > { %4539 = vmatprep.mubr.bf16.mxu0 %v4361_v2  ;;  %v6571_v2 = vld [vmem:[%s7524_s6 + $0x70] sm:$0xff]   ;;  %6228 = vmatprep.subr.bf16.mxu0 %v6570_v1  ;;  %v6572_v48 = vld [vmem:[%s7524_s6 + $0x68] sm:$0xff]   ;;  %v6573_v62 = vld [vmem:[%s7524_s6 + $0x60] sm:$0xff]  }
0x11f1   : > { %v4355_v4 = vpop.f32.mrf.mxu1  ;;  %4540 = vmatmul.mubr.bf16.gmra.mxu0 %v4360_v21 }
0x11f2   : > { %6213 = vmatpush3.bf16.msra.mxu1 %v6564_v32  ;;  %6229 = vmatpush3.bf16.msra.mxu0 %v6570_v1  ;;  %v6574_v4 = vld [vmem:[%s7524_s6 + $0x58] sm:$0xff]   ;;  %v5746_v1 = vld [vmem:[%s7936_s18 + $0x1] ss:$0 sm:$0xff] }
0x11f3   : > { %v6207_v47 = vpop.f32.mrf.mxu1  ;;  %6214 = vmatprep.subr.bf16.mxu1 %v6565_v36  ;;  %6230 = vmatprep.subr.bf16.mxu0 %v6571_v2 }
0x11f6   : > { %6215 = vmatpush3.bf16.msra.mxu1 %v6565_v36  ;;  %6231 = vmatpush3.bf16.msra.mxu0 %v6571_v2 }
0x11f7   : > { %6216 = vmatprep.subr.bf16.mxu1 %v6566_v0  ;;  %6232 = vmatprep.subr.bf16.mxu0 %v6572_v48 }
0x11fa   : > { %6217 = vmatpush3.bf16.msra.mxu1 %v6566_v0  ;;  %6233 = vmatpush3.bf16.msra.mxu0 %v6572_v48 }
0x11fb   : > { %6218 = vmatprep.subr.bf16.mxu1 %v6567_v28  ;;  %6234 = vmatprep.subr.bf16.mxu0 %v6573_v62 }
0x11fe   : > { %6219 = vmatpush3.bf16.msra.mxu1 %v6567_v28  ;;  %6235 = vmatpush3.bf16.msra.mxu0 %v6573_v62 }
0x11ff   : > { %6220 = vmatprep.subr.bf16.mxu1 %v6568_v6  ;;  %6236 = vmatprep.subr.bf16.mxu0 %v6574_v4 }
0x1202   : > { %6221 = vmatpush3.bf16.msra.mxu1 %v6568_v6  ;;  %6237 = vmatpush3.bf16.msra.mxu0 %v6574_v4 }
0x1203   : > { %6222 = vmatprep.subr.bf16.mxu1 %v6569_v45 }
0x1206   : > { %6223 = vmatpush3.bf16.msra.mxu1 %v6569_v45 }
0x12a9   : > { %v5944_v54 = vpop.f32.mrf.mxu0 }
0x12ab   : > { %v5945_v5 = vpop.f32.mrf.mxu0 }
0x12ac   : > { %v5946_v39 = vadd.f32 %v5945_v5, %v5944_v54 }
0x12ad   : > { %v5947_v35 = vpop.f32.mrf.mxu0 }
0x12ae   : > { %v4534_v13 = vadd.f32 %v5946_v39, %v5682_v59 }
0x12af   : > { %v5948_v37 = vpop.f32.mrf.mxu0 }
0x12b0   : > { %v5949_v51 = vadd.f32 %v5948_v37, %v5947_v35  ;;  %v4548_v3 = vadd.f32 %v4534_v13, %v8013_v57 }
0x12b1   : > { %v5950_v46 = vpop.f32.mrf.mxu0 }
0x12b2   : > { %v4537_v38 = vadd.f32 %v5949_v51, %v5682_v59  ;;  %v4556_v22 = vmul.f32 %v7855_v17, %v4548_v3 }
0x12b3   : > { %v5951_v61 = vpop.f32.mrf.mxu0 }
0x12b4   : > { %v5952_v10 = vadd.f32 %v5951_v61, %v5950_v46  ;;  %4560 = vadd.xlane.f32.xlu1 %v4556_v22  ;;  %v4549_v9 = vadd.f32 %v4537_v38, %v8016_v29  ;;  %v5701_v61 = vld [vmem:[%s7902_s5 + $0x1] ss:$0 sm:$0xff]  ;;  %s5033_s5 = scalar_lea.sflag [#allocation4], %s7481_s14 }
0x12b5   : > { %v5953_v18 = vpop.f32.mrf.mxu0 }
0x12b6   : > { %v4542_v21 = vadd.f32 %v5952_v10, %v5682_v59  ;;  %v4557_v50 = vmul.f32 %v7855_v17, %v4549_v9 }
0x12b7   : > { %v5954_v56 = vpop.f32.mrf.mxu0 }
0x12b8   : > { %v5955_v55 = vadd.f32 %v5954_v56, %v5953_v18  ;;  %4562 = vadd.xlane.f32.xlu0 %v4557_v50  ;;  %v4550_v7 = vadd.f32 %v4542_v21, %v8030_v30  ;;  %v5702_v21 = vld [vmem:[%s7909_s24 + $0x1] ss:$0 sm:$0xff]  ;;  %s6935_s24 = scalar_lea.vmem %s5047_s3, 64 }
0x12b9   : > { %p6936_p7 = scmp.ne.s32.totalorder %s5047_s3, %s6935_s24  ;;  %p6943_p9 = scmp.lt.s32.totalorder %s6941_s28, %s6935_s24 }
0x12ba   : > { %v4545_v63 = vadd.f32 %v5955_v55, %v5682_v59  ;;  %v4558_v57 = vmul.f32 %v7855_v17, %v4550_v7 }
0x12bb   : > { %p6944_p0 = por %p6943_p9, %p6942_p3 }
0x12bc   : > { %4564 = vadd.xlane.f32.xlu1 %v4558_v57  ;;  %v4551_v43 = vadd.f32 %v4545_v63, %v8027_v26 }
0x12be   : > { %v4559_v23 = vmul.f32 %v7855_v17, %v4551_v43 }
0x12c0   : > { %4566 = vadd.xlane.f32.xlu0 %v4559_v23 }
0x133d   : > { %v4561_v14 = vpop.xlane.xlu1 %4560 }
0x133e   : > { %v4568_v29 = vmul.f32 0.03125, %v4561_v14 }
0x1340   : > { %v4572_v12 = vsub.f32 %v4548_v3, %v4568_v29 }
0x1341   : > { %v4563_v27 = vpop.xlane.xlu0 %4562 }
0x1342   : > { %v4569_v40 = vmul.f32 0.03125, %v4563_v27  ;;  %v8246_v11 = vmul.f32 %v7855_v17, %v4572_v12 }
0x1344   : > { %v4573_v16 = vsub.f32 %v4549_v9, %v4569_v40  ;;  %v4580_v30 = vmul.f32 %v8246_v11, %v8246_v11 }
0x1345   : > { %v4565_v60 = vpop.xlane.xlu1 %4564 }
0x1346   : > { %v4570_v34 = vmul.f32 0.03125, %v4565_v60  ;;  %4584 = vadd.xlane.f32.xlu1 %v4580_v30  ;;  %v8251_v26 = vmul.f32 %v7855_v17, %v4573_v16 }
0x1348   : > { %v4574_v49 = vsub.f32 %v4550_v7, %v4570_v34  ;;  %v4581_v31 = vmul.f32 %v8251_v26, %v8251_v26 }
0x1349   : > { %v4567_v42 = vpop.xlane.xlu0 %4566 }
0x134a   : > { %v4571_v19 = vmul.f32 0.03125, %v4567_v42  ;;  %4586 = vadd.xlane.f32.xlu0 %v4581_v31  ;;  %v8256_v20 = vmul.f32 %v7855_v17, %v4574_v49  ;;  %v6576_v49 = vld [vmem:[%s7524_s6 + $0x48] sm:$0xff]   ;;  %v6577_v31 = vld [vmem:[%s7524_s6 + $0x40] sm:$0xff]  }
0x134c   : > { %v4575_v24 = vsub.f32 %v4551_v43, %v4571_v19  ;;  %v4582_v41 = vmul.f32 %v8256_v20, %v8256_v20 }
0x134e   : > { %4588 = vadd.xlane.f32.xlu1 %v4582_v41  ;;  %v8261_v15 = vmul.f32 %v7855_v17, %v4575_v24 }
0x1350   : > { %v4583_v44 = vmul.f32 %v8261_v15, %v8261_v15 }
0x1352   : > { %4590 = vadd.xlane.f32.xlu0 %v4583_v44 }
0x13cf   : > { %v4585_v47 = vpop.xlane.xlu1 %4584 }
0x13d0   : > { %v4592_v54 = vmul.f32 0.03125, %v4585_v47 }
0x13d2   : > { %v4596_v59 = vadd.f32 1e-05, %v4592_v54 }
0x13d3   : > { %v4587_v5 = vpop.xlane.xlu0 %4586 }
0x13d4   : > { %6658 = vrsqrt.f32 %v4596_v59  ;;  %v4593_v39 = vmul.f32 0.03125, %v4587_v5 }
0x13d6   : > { %v4597_v35 = vadd.f32 1e-05, %v4593_v39 }
0x13d7   : > { %v4589_v13 = vpop.xlane.xlu1 %4588 }
0x13d8   : > { %6660 = vrsqrt.f32 %v4597_v35  ;;  %v4594_v37 = vmul.f32 0.03125, %v4589_v13 }
0x13da   : > { %v4598_v51 = vadd.f32 1e-05, %v4594_v37 }
0x13db   : > { %v4591_v3 = vpop.xlane.xlu0 %4590 }
0x13dc   : > { %6662 = vrsqrt.f32 %v4598_v51  ;;  %v4595_v46 = vmul.f32 0.03125, %v4591_v3 }
0x13de   : > { %v4599_v38 = vadd.f32 1e-05, %v4595_v46 }
0x13e0   : > { %6664 = vrsqrt.f32 %v4599_v38 }
0x13e1   : > { %v6659_v22 = vpop.eup %6658 }
0x13e2   : > { %v4604_v10 = vmul.f32 %v6659_v22, %v8246_v11 }
0x13e4   : > { %v4614_v9 = vmul.f32 %v5701_v61, %v4604_v10 }
0x13e5   : > { %v6661_v18 = vpop.eup %6660 }
0x13e6   : > { %v4605_v50 = vmul.f32 %v6661_v18, %v8251_v26  ;;  %v4624_v55 = vadd.f32 %v5702_v21, %v4614_v9  ;;  %v6575_v26 = vld [vmem:[%s7524_s6 + $0x50] sm:$0xff]  }
0x13e7   : > { %6238 = vmatprep.subr.bf16.mxu0 %v6575_v26 }
0x13e8   : > { %v4615_v56 = vmul.f32 %v5701_v61, %v4605_v50  ;;  %v4628_v43 = vmul.f32 %v4624_v55, %v7596_v52  ;;  %6239 = vmatpush3.bf16.msra.mxu0 %v6575_v26 }
0x13e9   : > { %v6663_v7 = vpop.eup %6662  ;;  %6240 = vmatprep.subr.bf16.mxu0 %v6576_v49 }
0x13ea   : > { %v4625_v63 = vadd.f32 %v5702_v21, %v4615_v56  ;;  %v4606_v57 = vmul.f32 %v6663_v7, %v8256_v20  ;;  %v5720_v20 = vld [vmem:[%s7928_s23 + $0x1] ss:$0 sm:$0xff] }
0x13ec   : > { %v4629_v23 = vmul.f32 %v4625_v63, %v7600_v58  ;;  %v4616_v14 = vmul.f32 %v5701_v61, %v4606_v57  ;;  %6241 = vmatpush3.bf16.msra.mxu0 %v6576_v49 }
0x13ed   : > { %v6665_v29 = vpop.eup %6664  ;;  %6242 = vmatprep.subr.bf16.mxu0 %v6577_v31 }
0x13ee   : > { %v4632_v12 = vpack.c.bf16 %v4629_v23, %v4628_v43  ;;  %v4607_v27 = vmul.f32 %v6665_v29, %v8261_v15  ;;  %v4626_v11 = vadd.f32 %v5702_v21, %v4616_v14 }
0x13f0   : > { %6224 = vmatprep.mubr.bf16.mxu1 %v4632_v12  ;;  %v4617_v40 = vmul.f32 %v5701_v61, %v4607_v27  ;;  %v4630_v30 = vmul.f32 %v4626_v11, %v7598_v53  ;;  %6243 = vmatpush3.bf16.msra.mxu0 %v6577_v31 }
0x13f2   : > { %v4627_v16 = vadd.f32 %v5702_v21, %v4617_v40 }
0x13f4   : > { %v4631_v60 = vmul.f32 %v4627_v16, %v7609_v8  ;;  %v6682_v16 = vld [vmem:[%s7495_s20] sm:$0xf]  ;;  %s8432_s20 = sld [smem:[#allocation28_spill]] }
0x13f6   : > { %v4633_v34 = vpack.c.bf16 %v4631_v60, %v4630_v30 }
0x13f8   : > { %6225 = vmatmul.mubr.bf16.vlgmr.msra.gmra.mxu1 %v4633_v34 }
0x13fa   : > { %p8434_p8 = scmp.ne.s32.totalorder %s8432_s20, 0 }
0x13fc   : > { %p6937_p10 = pnand %p6936_p7, %p8434_p8 }
0x13fe   : > { %p6938_p1 = pneg %p6937_p10 }
0x1400   : > { %p6945_p6 = pnand %p6944_p0, %p6938_p1 }
0x14b8   : > { %v6226_v42 = vpop.f32.mrf.mxu1 }
0x14b9   : > { %v4750_v44 = vadd.f32 %v6226_v42, %v5720_v20 }
0x14ba   : > { %v4741_v19 = vpop.f32.mrf.mxu1 }
0x14bb   : > { %v4742_v41 = vadd.f32 %v5720_v20, %v4741_v19  ;;  %v4758_v28 = vmax.f32 %v4750_v44, 0.0 }
0x14bc   : > { %v6227_v24 = vpop.f32.mrf.mxu1 }
0x14bd   : > { %v4753_v15 = vadd.f32 %v6227_v24, %v5720_v20  ;;  %v4756_v36 = vmax.f32 %v4742_v41, 0.0 }
0x14be   : > { %v4744_v33 = vpop.f32.mrf.mxu1 }
0x14bf   : > { %v4745_v25 = vadd.f32 %v5720_v20, %v4744_v33  ;;  %v4759_v32 = vmax.f32 %v4753_v15, 0.0  ;;  %v5757_v33 = vld [vmem:[%s7998_s29 + $0x1] ss:$0 sm:$0xff] }
0x14c1   : > { %v4757_v0 = vmax.f32 %v4745_v25, 0.0  ;;  %v4761_v45 = vpack.c.bf16 %v4759_v32, %v4758_v28 }
0x14c3   : > { %v4760_v6 = vpack.c.bf16 %v4757_v0, %v4756_v36  ;;  %v5758_v36 = vld [vmem:[%s8005_s30 + $0x1] ss:$0 sm:$0xff] }
0x14c5   : > { %6244 = vmatprep.mubr.bf16.mxu0 %v4760_v6 }
0x14c6   : > { %6245 = vmatmul.mubr.bf16.vlgmr.msra.gmra.mxu0 %v4761_v45 }
0x1586   : > { %v6246_v2 = vpop.f32.mrf.mxu0 }
0x1587   : > { %v4878_v48 = vadd.f32 %v6246_v2, %v5746_v1 }
0x1588   : > { %v4869_v62 = vpop.f32.mrf.mxu0 }
0x1589   : > { %v4886_v4 = vadd.f32 %v4878_v48, %v4630_v30  ;;  %v4870_v39 = vadd.f32 %v5746_v1, %v4869_v62  ;;  %v4969_v30 = vsel %vm4968_vm4, %v6682_v16, 0.0 }
0x158a   : > { %v6247_v47 = vpop.f32.mrf.mxu0 }
0x158b   : > { %v4881_v54 = vadd.f32 %v6247_v47, %v5746_v1  ;;  %v4894_v59 = vmul.f32 %v7855_v17, %v4886_v4  ;;  %v4884_v3 = vadd.f32 %v4870_v39, %v4628_v43 }
0x158c   : > { %v4872_v5 = vpop.f32.mrf.mxu0 }
0x158d   : > { %v4887_v35 = vadd.f32 %v4881_v54, %v4631_v60  ;;  %v4873_v13 = vadd.f32 %v5746_v1, %v4872_v5  ;;  %4900 = vadd.xlane.f32.xlu0 %v4894_v59  ;;  %v4892_v38 = vmul.f32 %v7855_v17, %v4884_v3 }
0x158f   : > { %v4885_v37 = vadd.f32 %v4873_v13, %v4629_v23  ;;  %v4895_v51 = vmul.f32 %v7855_v17, %v4887_v35 }
0x1591   : > { %4902 = vadd.xlane.f32.xlu0 %v4895_v51  ;;  %v4893_v46 = vmul.f32 %v7855_v17, %v4885_v37 }
0x1593   : > { %4898 = vadd.xlane.f32.xlu1 %v4893_v46 }
0x1597   : > { %4896 = vadd.xlane.f32.xlu1 %v4892_v38 }
0x1616   : > { %v4901_v22 = vpop.xlane.xlu0 %4900 }
0x1617   : > { %v4906_v61 = vmul.f32 0.03125, %v4901_v22 }
0x1619   : > { %v4910_v10 = vsub.f32 %v4886_v4, %v4906_v61 }
0x161a   : > { %v4903_v9 = vpop.xlane.xlu0 %4902 }
0x161b   : > { %v4907_v18 = vmul.f32 0.03125, %v4903_v9  ;;  %v4914_v21 = vmul.f32 %v7855_v17, %v4910_v10 }
0x161c   : > { %v4899_v50 = vpop.xlane.xlu1 %4898 }
0x161d   : > { %v4911_v56 = vsub.f32 %v4887_v35, %v4907_v18  ;;  %v4905_v55 = vmul.f32 0.03125, %v4899_v50  ;;  %v4918_v7 = vmul.f32 %v4914_v21, %v4914_v21 }
0x161f   : > { %v4909_v63 = vsub.f32 %v4885_v37, %v4905_v55  ;;  %4924 = vadd.xlane.f32.xlu0 %v4918_v7  ;;  %v4915_v57 = vmul.f32 %v7855_v17, %v4911_v56 }
0x1620   : > { %v4897_v43 = vpop.xlane.xlu1 %4896 }
0x1621   : > { %v4904_v23 = vmul.f32 0.03125, %v4897_v43  ;;  %v4919_v14 = vmul.f32 %v4915_v57, %v4915_v57  ;;  %v4913_v29 = vmul.f32 %v7855_v17, %v4909_v63 }
0x1623   : > { %v4908_v12 = vsub.f32 %v4884_v3, %v4904_v23  ;;  %4926 = vadd.xlane.f32.xlu0 %v4919_v14  ;;  %v4917_v27 = vmul.f32 %v4913_v29, %v4913_v29 }
0x1625   : > { %4922 = vadd.xlane.f32.xlu1 %v4917_v27  ;;  %v4912_v40 = vmul.f32 %v7855_v17, %v4908_v12 }
0x1627   : > { %v4916_v11 = vmul.f32 %v4912_v40, %v4912_v40 }
0x1629   : > { %4920 = vadd.xlane.f32.xlu1 %v4916_v11 }
0x162d   : > { %4970 = vadd.xlane.f32.xlu1 %v4969_v30 }
0x16a8   : > { %v4925_v60 = vpop.xlane.xlu0 %4924 }
0x16a9   : > { %v4930_v34 = vmul.f32 0.03125, %v4925_v60 }
0x16ab   : > { %v4934_v26 = vadd.f32 1e-05, %v4930_v34 }
0x16ac   : > { %v4927_v49 = vpop.xlane.xlu0 %4926 }
0x16ad   : > { %6666 = vrsqrt.f32 %v4934_v26  ;;  %v4931_v31 = vmul.f32 0.03125, %v4927_v49 }
0x16ae   : > { %v4923_v42 = vpop.xlane.xlu1 %4922 }
0x16af   : > { %v4935_v19 = vadd.f32 1e-05, %v4931_v31  ;;  %v4929_v20 = vmul.f32 0.03125, %v4923_v42 }
0x16b1   : > { %6668 = vrsqrt.f32 %v4935_v19  ;;  %v4933_v24 = vadd.f32 1e-05, %v4929_v20 }
0x16b2   : > { %v4921_v17 = vpop.xlane.xlu1 %4920 }
0x16b3   : > { %6670 = vrsqrt.f32 %v4933_v24  ;;  %v4928_v41 = vmul.f32 0.03125, %v4921_v17 }
0x16b5   : > { %v4932_v15 = vadd.f32 1e-05, %v4928_v41 }
0x16b6   : > { %v4971_v32 = vpop.xlane.xlu1 %4970 }
0x16b7   : > { %6672 = vrsqrt.f32 %v4932_v15  ;;  %v4972_v6 = vmax.f32 %v4971_v32, 1.0 }
0x16b9   : > { %v5002_v48 = vrot.slane %v4972_v6, 1  ;;  %v5003_v54 = vrot.slane %v4972_v6, 2  ;;  %v5004_v13 = vrot.slane %v4972_v6, 3 }
0x16ba   : > { %v6667_v44 = vpop.eup %6666 }
0x16bb   : > { %v4942_v25 = vmul.f32 %v6667_v44, %v4914_v21  ;;  %6674 = vrcp.f32 %v5002_v48 }
0x16bc   : > { %6676 = vrcp.f32 %v5003_v54 }
0x16bd   : > { %v4952_v0 = vmul.f32 %v5757_v33, %v4942_v25  ;;  %6678 = vrcp.f32 %v5004_v13 }
0x16be   : > { %v6669_v28 = vpop.eup %6668  ;;  %6680 = vrcp.f32 %v4972_v6 }
0x16bf   : > { %v4962_v45 = vadd.f32 %v5758_v36, %v4952_v0  ;;  %v4943_v1 = vmul.f32 %v6669_v28, %v4915_v57 }
0x16c0   : > { %v6671_v2 = vpop.eup %6670 }
0x16c1   : > { %v4966_v62 = vmul.f32 %v4962_v45, %v7598_v53  ;;  %v4953_v4 = vmul.f32 %v5757_v33, %v4943_v1  ;;  %v4941_v47 = vmul.f32 %v6671_v2, %v4913_v29 }
0x16c3   : > { %v4963_v59 = vadd.f32 %v5758_v36, %v4953_v4  ;;  %v4951_v5 = vmul.f32 %v5757_v33, %v4941_v47  ;;  %v4975_v39 = vmul.f32 %v4966_v62, %v7598_v53 }
0x16c4   : > { %v6673_v35 = vpop.eup %6672 }
0x16c5   : > { %v4967_v37 = vmul.f32 %v4963_v59, %v7609_v8  ;;  %v4961_v51 = vadd.f32 %v5758_v36, %v4951_v5  ;;  %v4940_v3 = vmul.f32 %v6673_v35, %v4912_v40  ;;  %v4989_v46 = vrot.slane %v4975_v39, 4 }
0x16c7   : > { %v4965_v38 = vmul.f32 %v4961_v51, %v7600_v58  ;;  %v4950_v22 = vmul.f32 %v5757_v33, %v4940_v3  ;;  %v4976_v61 = vmul.f32 %v4967_v37, %v7609_v8  ;;  %v4990_v10 = vadd.f32 %v4989_v46, %v4975_v39 }
0x16c8   : > { %v6675_v12 = vpop.eup %6674 }
0x16c9   : > { %v4974_v9 = vmul.f32 %v4965_v38, %v7600_v58  ;;  %v4960_v18 = vadd.f32 %v5758_v36, %v4950_v22  ;;  %v4991_v53 = vrot.slane %v4990_v10, 2  ;;  %v4995_v21 = vrot.slane %v4976_v61, 4  ;;  %v6677_v11 = vpop.eup %6676 }
0x16ca   : > { %v6679_v34 = vpop.eup %6678 }
0x16cb   : > { %v4964_v50 = vmul.f32 %v4960_v18, %v7596_v52  ;;  %v4983_v56 = vrot.slane %v4974_v9, 4  ;;  %v4996_v55 = vadd.f32 %v4995_v21, %v4976_v61  ;;  %v4992_v7 = vadd.f32 %v4991_v53, %v4990_v10  ;;  %v6681_v17 = vpop.eup %6680 }
0x16cd   : > { %v4973_v63 = vmul.f32 %v4964_v50, %v7596_v52  ;;  %v4984_v57 = vadd.f32 %v4983_v56, %v4974_v9  ;;  %v4997_v43 = vrot.slane %v4996_v55, 2  ;;  %v4993_v29 = vrot.slane %v4992_v7, 1 }
0x16cf   : > { %v4977_v23 = vrot.slane %v4973_v63, 4  ;;  %v4985_v14 = vrot.slane %v4984_v57, 2  ;;  %v4998_v8 = vadd.f32 %v4997_v43, %v4996_v55  ;;  %v4994_v60 = vadd.f32 %v4993_v29, %v4992_v7 }
0x16d1   : > { %v4978_v27 = vadd.f32 %v4977_v23, %v4973_v63  ;;  %v4986_v58 = vadd.f32 %v4985_v14, %v4984_v57  ;;  %v4999_v40 = vrot.slane %v4998_v8, 1  ;;  %v5014_v19 = vmul.f32 %v6677_v11, %v4994_v60 }
0x16d3   : > { %v4979_v16 = vrot.slane %v4978_v27, 2  ;;  %v4987_v30 = vrot.slane %v4986_v58, 1  ;;  %v5000_v49 = vadd.f32 %v4999_v40, %v4998_v8  ;;  %v5024_v44 = vrot.slane %v5014_v19, 6 }
0x16d5   : > { %v4980_v26 = vadd.f32 %v4979_v16, %v4978_v27  ;;  %v4988_v52 = vadd.f32 %v4987_v30, %v4986_v58  ;;  %v5016_v24 = vmul.f32 %v6679_v34, %v5000_v49 }
0x16d7   : > { %v4981_v31 = vrot.slane %v4980_v26, 1  ;;  %v5012_v42 = vmul.f32 %v6675_v12, %v4988_v52  ;;  %v5027_v25 = vrot.slane %v5016_v24, 5 }
0x16d9   : > { %v4982_v20 = vadd.f32 %v4981_v31, %v4980_v26  ;;  %v5021_v15 = vrot.slane %v5012_v42, 7 }
0x16db   : > { %v5010_v41 = vmul.f32 %v6681_v17, %v4982_v20 }
0x16dd   : > { %v5023_v33 = vsel %vm5022_vm5, %v5021_v15, %v5010_v41 }
0x16de   : > { %v5026_v32 = vsel %vm5025_vm6, %v5024_v44, %v5023_v33 }
0x16df   : > { %v5029_v36 = vsel %vm5028_vm7, %v5027_v25, %v5026_v32 }
0x16e0   : > { %5031 = vst [vmem:[%s892_s10] sm:$0xf] %v5029_v36 }
0x16e1   : > { %6948 = shalt.err (!%p6945_p6)
}
0x16e2   : > { %s6949_s23 = scalar_lea.hbm %s8318_s17, 64  ;;  %s6953_s11 = scalar_lea.hbm %s8433_s26, 128 }
0x16e3   : > { %p6950_p11 = scmp.ne.s32.totalorder %s8318_s17, %s6949_s23  ;;  %p6954_p2 = scmp.lt.s32.totalorder %s8318_s17, %s8433_s26 }
0x16e4   : > { %p6955_p5 = scmp.lt.s32.totalorder %s6953_s11, %s6949_s23 }
0x16e5   : > { %p6951_p4 = pnand %p6950_p11, %p8434_p8 }
0x16e6   : > { %p6956_p13 = por %p6955_p5, %p6954_p2 }
0x16e7   : > { %p6952_p12 = pneg %p6951_p4 }
0x16e9   : > { %p6957_p7 = pnand %p6956_p13, %p6952_p12 }
0x16eb   : > { %6960 = shalt.err (!%p6957_p7)
}
0x16ec   : > { %6288 = dma.vmem_to_hbm [thread:$0]  (%p8434_p8), %s5047_s3, 64, %s8318_s17, %s5033_s5  }
0x16ed PF: > { %s8435_s1 = sld [smem:[#allocation24_spill]]  ;;  %p8438_p1 = scmp.ge.s32.totalorder %s7015_s21, 2 }
0x16ee   : > { %s8436_s29 = sld [smem:[#allocation29_spill]] }
0x16f3   : > { %s5058_s12 = sand.u32 1, %s8435_s1  }
0x16f4   : > { %p8437_p10 = scmp.ne.s32.totalorder %s8436_s29, 0  ;;  %s5059_s7 = scalar_lea.sflag [#allocation4], %s5058_s12 }
0x16f6   : > { %p6319_p3 = pnand %p8438_p1, %p8437_p10 }
0x16f8   : > { %p6320_p9 = pneg %p6319_p3 }
0x16fa   : > { %6998 = dma.done.wait (%p6320_p9), %s5059_s7, 64  }
0x16fb   : > { %7000 = vsyncadd (%p6320_p9), %s5059_s7, 4294967232  ;;  %s8439_s21 = sld [smem:[#allocation26_spill]]  ;;  %s8442_s18 = smov %s7007_s19 }
0x16fc   : > { %s8440_s0 = sld [smem:[#allocation25_spill]] }
0x16fd   : > { %s8441_s20 = sld [smem:[#allocation27_spill]] }
0x1701   : > { %p40_p0 = scmp.ge.s32.totalorder %s8439_s21, 4  }
0x1702   : > { %s8443_s19 = smov %s8440_s0 }
0x1703   :  { %42 = sbr.rel (!%p40_p0) target bundleno = 26 (0x1a), region = 251 }
0x1708   :  { %5064 = vsyncpa [#allocation3], 1 }
0x1709   :  { %5066 = vsyncpa [#allocation3 + $0x1], 1 }
0x170a   :  { %5067 = vsyncpa [#allocation6], 1 }
0x170b   :  { %5069 = vsyncpa [#allocation6 + $0x1], 1 }
0x170c   :  { %5070 = vsyncpa [#allocation9], 1 }
0x170d   :  { %5072 = vsyncpa [#allocation9 + $0x1], 1 }
0x170e   :  { %5073 = vsyncpa [#allocation12], 1 }
0x170f   :  { %5075 = vsyncpa [#allocation12 + $0x1], 1 }
0x1710   :  { %5076 = vsyncpa [#allocation15], 1 }
0x1711   :  { %5078 = vsyncpa [#allocation15 + $0x1], 1 }
0x1712   :  { %5079 = vsyncpa [#allocation4], 1 }
0x1713   :  { %5081 = vsyncpa [#allocation4 + $0x1], 1 }

</bundles_post_ra>
